<compile_context>
chip_gen: v5e
topology: v5e:2x2
jax: 0.10.0
libtpu: 0.0.40
codegen_flags: <defaults>
</compile_context>

<pallas_src>
import functools
import math

import jax
import jax.numpy as jnp
from jax.experimental import pallas as pl
from jax.experimental.pallas import tpu as pltpu
from jax.scipy.special import erf as _erf_exact


_LN_EPS = 1e-5
_INV_SQRT2 = 1.0 / math.sqrt(2.0)


def _erf_poly(x):
    """Abramowitz & Stegun 7.1.26 erf approximation (max abs err ~1.5e-7).

    Uses only ops with guaranteed Mosaic lowerings; the divide goes to the
    EUP via pl.reciprocal(approx=True) (free under MXU/VALU pressure).
    """
    a1, a2, a3 = 0.254829592, -0.284496736, 1.421413741
    a4, a5, pp = -1.453152027, 1.061405429, 0.3275911
    ax = jnp.abs(x)
    t = pl.reciprocal(1.0 + pp * ax, approx=True)
    poly = ((((a5 * t + a4) * t + a3) * t + a2) * t + a1) * t
    y = 1.0 - poly * jnp.exp(-ax * ax)
    return jnp.where(x >= 0, y, -y)


def _gelu_in_kernel(x):
    # Exact (erf-based) GELU, matching the PyTorch module's `gelu`.
    return x * 0.5 * (1.0 + _erf_poly(x * _INV_SQRT2))


def _layer_norm(x, gamma, beta):
    # nn.LayerNorm semantics: biased variance over the last dim, eps=1e-5.
    mean = jnp.mean(x, axis=-1, keepdims=True)
    c = x - mean
    var = jnp.mean(c * c, axis=-1, keepdims=True)
    return c * jax.lax.rsqrt(var + _LN_EPS) * gamma + beta


def _sketch_stack_kernel(x_ref, mask_ref,
                         wqkv_ref, bqkv_ref, wo_ref, bo_ref, g1_ref, be1_ref,
                         wi_ref, bi_ref, wo2_ref, bo2_ref, g2_ref, be2_ref,
                         o_ref, ctx_ref, *,
                         num_layers, num_heads, seq_len, batch_blk,
                         activation, matmul_dtype):
    """num_layers SketchLayers over Bblk batch elements, fully in VMEM.

    x_ref:    [M, D]        flattened hidden rows, M = Bblk * S (lane-dense)
    mask_ref: [Bblk, 1, S]  additive attention mask (broadcast over queries)
    wqkv:     [L, D, 3D]    fused Q|K|V projection (query scale pre-folded)
    wo:       [L, D, D]     attention output projection
    wi/wo2:   [L, D, I] / [L, I, D]   FFN
    biases / LN params:  [L, 1, X]
    ctx_ref:  [M, D] f32 VMEM scratch for the per-head attention context.
    """
    S, H, Bb, L = seq_len, num_heads, batch_blk, num_layers
    D = x_ref.shape[-1]
    hd = D // H

    def mm(a, w):  # MXU matmul, f32 accumulation; optionally bf16 operands.
        return jnp.dot(a.astype(matmul_dtype), w,
                       preferred_element_type=jnp.float32)

    # Hoisted once: per-batch [S, S] mask broadcast, reused by every head and
    # every layer (JAX does not CSE broadcast_in_dim inside unrolled loops).
    masks = [jnp.broadcast_to(mask_ref[b], (S, S)).astype(jnp.float32)
             for b in range(Bb)]

    h = x_ref[...].astype(jnp.float32)                        # [M, D]
    for l in range(L):                                         # static unroll
        # ---- fused QKV projection: ONE lane-dense [M, D] @ [D, 3D] --------
        qkv = mm(h, wqkv_ref[l]) + bqkv_ref[l]                 # [M, 3D] f32

        # ---- attention: per batch element / per head ([S, S] scores) ------
        for b in range(Bb):
            r0 = b * S                       # sublane-aligned when S % 8 == 0
            q_b = qkv[r0:r0 + S, 0:D]        # 1/sqrt(hd) already folded in
            k_b = qkv[r0:r0 + S, D:2 * D]
            v_b = qkv[r0:r0 + S, 2 * D:3 * D]
            for hh in range(H):
                c0 = hh * hd
                scores = jnp.einsum("qd,kd->qk",
                                    q_b[:, c0:c0 + hd], k_b[:, c0:c0 + hd],
                                    preferred_element_type=jnp.float32)
                scores = scores + masks[b]
                mrow = jnp.max(scores, axis=-1, keepdims=True)
                e = jnp.exp(scores - mrow)
                denom = jnp.sum(e, axis=-1, keepdims=True)
                ctx_h = jnp.dot(e, v_b[:, c0:c0 + hd],
                                preferred_element_type=jnp.float32)
                # Flash-style normalization: [S,1] EUP reciprocal instead of
                # an [S,S] elementwise divide.
                ctx_h = ctx_h * pl.reciprocal(denom, approx=True)
                ctx_ref[r0:r0 + S, c0:c0 + hd] = ctx_h

        # ---- output projection (ONE [M, D] @ [D, D]) + residual + LN ------
        attn = mm(ctx_ref[...], wo_ref[l]) + bo_ref[l]
        h1 = _layer_norm(attn + h, g1_ref[l], be1_ref[l])

        # ---- FFN: up-proj -> activation -> down-proj -> residual + LN -----
        inter = mm(h1, wi_ref[l]) + bi_ref[l]                  # [M, I]
        if activation == "gelu":
            inter = _gelu_in_kernel(inter)
        else:  # "relu"
            inter = jnp.maximum(inter, 0.0)
        ffn = mm(inter, wo2_ref[l]) + bo2_ref[l]
        h = _layer_norm(ffn + h1, g2_ref[l], be2_ref[l])

    o_ref[...] = h.astype(o_ref.dtype)


class SketchEncoderPallas:
    """JAX/Pallas port of SketchEncoder (stack of SketchLayer transformer blocks).

    layers_setting: list of [num_heads, hidden_dim, inter_dim] per layer.
    Consecutive layers with identical settings are fused into a single
    pallas_call (static in-kernel layer loop).  Dropout probabilities are
    accepted for API parity but applied as eval-mode identities.  Only
    attention_norm_type='LN' is supported.
    """

    def __init__(self, layers_setting, attention_norm_type="LN",
                 inter_activation="gelu", attention_dropout_prob=0.0,
                 hidden_dropout_prob=0.0, output_dropout_prob=0.0,
                 matmul_dtype=jnp.float32, key=None):
        if attention_norm_type != "LN":
            # TODO(synk): BatchNorm ('BN1d'/'BN2d') variants need running stats; not ported.
            raise ValueError("Only attention_norm_type='LN' is implemented.")
        if inter_activation not in ("gelu", "relu"):
            raise ValueError("inter_activation must be 'gelu' or 'relu'.")
        # TODO(synk): train-mode dropout (attention/hidden/output) is treated as identity.
        self.inter_activation = inter_activation
        self.matmul_dtype = matmul_dtype
        if key is None:
            key = jax.random.PRNGKey(0)
        self.layers = []
        for (num_heads, hidden_dim, inter_dim) in layers_setting:
            if hidden_dim % num_heads != 0:
                raise ValueError("hidden_dim must be divisible by num_heads")
            key, lkey = jax.random.split(key)
            self.layers.append(
                self._init_layer(lkey, num_heads, hidden_dim, inter_dim))
        self.chunks = self._build_chunks(self.layers)
        self._layer_chunks = None     # built lazily (output_all_states path)

    # ------------------------------------------------------------------ init
    @staticmethod
    def _init_linear(key, fan_in, fan_out):
        # PyTorch nn.Linear default init: U(-1/sqrt(fan_in), 1/sqrt(fan_in)).
        kw, kb = jax.random.split(key)
        bound = 1.0 / math.sqrt(fan_in)
        w = jax.random.uniform(kw, (fan_out, fan_in), jnp.float32, -bound, bound)
        b = jax.random.uniform(kb, (fan_out,), jnp.float32, -bound, bound)
        return w, b

    def _init_layer(self, key, num_heads, hidden_dim, inter_dim):
        D, I, H = hidden_dim, inter_dim, num_heads
        hd = D // H
        ks = jax.random.split(key, 6)
        wq_pt, bq = self._init_linear(ks[0], D, D)
        wk_pt, bk = self._init_linear(ks[1], D, D)
        wv_pt, bv = self._init_linear(ks[2], D, D)
        wo_pt, bo = self._init_linear(ks[3], D, D)
        wi_pt, bi = self._init_linear(ks[4], D, I)
        wo2_pt, bo2 = self._init_linear(ks[5], I, D)

        # Hoisted transposes: [out, in] -> [in, out], done once at init.
        wq, wk, wv, wo = wq_pt.T, wk_pt.T, wv_pt.T, wo_pt.T
        wi, wo2 = wi_pt.T, wo2_pt.T
        scale = math.sqrt(hd)
        ones = jnp.ones((1, D), jnp.float32)
        zeros = jnp.zeros((1, D), jnp.float32)
        mdt = self.matmul_dtype

        kernel_params = {
            # Fused Q|K|V projection; 1/sqrt(head_dim) folded into Wq / bq.
            "w_qkv": jnp.concatenate([wq / scale, wk, wv], axis=1).astype(mdt)[None],
            "b_qkv": jnp.concatenate([bq / scale, bk, bv]).reshape(1, 3 * D)[None],
            "wo": wo.astype(mdt)[None], "bo": bo.reshape(1, D)[None],
            "g1": ones[None], "be1": zeros[None],
            "wi": wi.astype(mdt)[None], "bi": bi.reshape(1, I)[None],
            "wo2": wo2.astype(mdt)[None], "bo2": bo2.reshape(1, D)[None],
            "g2": ones[None], "be2": zeros[None],
        }
        ref_params = {
            "wq": wq, "bq": bq, "wk": wk, "bk": bk, "wv": wv, "bv": bv,
            "wo": wo, "bo": bo, "wi": wi, "bi": bi, "wo2": wo2, "bo2": bo2,
            "scale": scale, "g1": ones, "be1": zeros, "g2": ones, "be2": zeros,
        }
        return {"num_heads": H, "hidden_dim": D, "inter_dim": I,
                "kernel": kernel_params, "ref": ref_params}

    @staticmethod
    def _setting(layer):
        return (layer["num_heads"], layer["hidden_dim"], layer["inter_dim"])

    def _stack(self, layer_list):
        keys = ["w_qkv", "b_qkv", "wo", "bo", "g1", "be1",
                "wi", "bi", "wo2", "bo2", "g2", "be2"]
        params = {k: jnp.concatenate([l["kernel"][k] for l in layer_list], axis=0)
                  for k in keys}
        first = layer_list[0]
        return {"num_layers": len(layer_list),
                "num_heads": first["num_heads"],
                "hidden_dim": first["hidden_dim"],
                "inter_dim": first["inter_dim"],
                "params": params}

    def _build_chunks(self, layers):
        chunks, i = [], 0
        while i < len(layers):
            j = i + 1
            while j < len(layers) and self._setting(layers[j]) == self._setting(layers[i]):
                j += 1
            chunks.append(self._stack(layers[i:j]))
            i = j
        return chunks

    # --------------------------------------------------------------- forward
    @staticmethod
    def _pick_batch_block(B, S):
        # Largest divisor of B with Bblk*S rows bounded for VMEM; bigger M =
        # better MXU row utilization and fewer grid-step overheads.
        best = 1
        for c in range(1, B + 1):
            if B % c == 0 and c * S <= 1024:
                best = c
        return best

    def _run_chunk(self, x2d, mask3, chunk):
        B, S = mask3.shape[0], mask3.shape[-1]
        D, I = chunk["hidden_dim"], chunk["inter_dim"]
        H, L = chunk["num_heads"], chunk["num_layers"]
        p = chunk["params"]
        Bblk = self._pick_batch_block(B, S)
        M = Bblk * S
        w_itemsize = jnp.dtype(self.matmul_dtype).itemsize

        kernel = functools.partial(
            _sketch_stack_kernel, num_layers=L, num_heads=H, seq_len=S,
            batch_blk=Bblk, activation=self.inter_activation,
            matmul_dtype=self.matmul_dtype)

        wmap = lambda i: (0, 0, 0)   # constant block index -> stays VMEM-resident
        in_specs = [
            pl.BlockSpec((M, D), lambda i: (i, 0)),              # hidden rows
            pl.BlockSpec((Bblk, 1, S), lambda i: (i, 0, 0)),     # additive mask
            pl.BlockSpec((L, D, 3 * D), wmap), pl.BlockSpec((L, 1, 3 * D), wmap),
            pl.BlockSpec((L, D, D), wmap), pl.BlockSpec((L, 1, D), wmap),
            pl.BlockSpec((L, 1, D), wmap), pl.BlockSpec((L, 1, D), wmap),   # LN1
            pl.BlockSpec((L, D, I), wmap), pl.BlockSpec((L, 1, I), wmap),
            pl.BlockSpec((L, I, D), wmap), pl.BlockSpec((L, 1, D), wmap),
            pl.BlockSpec((L, 1, D), wmap), pl.BlockSpec((L, 1, D), wmap),   # LN2
        ]

        # Explicit VMEM budget (double-buffered weights + activations + slack),
        # clamped to the v7x physical ceiling (64 MiB).
        weight_bytes = L * (w_itemsize * (4 * D * D + 2 * D * I) + 4 * (8 * D + I))
        act_bytes = 4 * M * (3 * D + I + 4 * D)
        vmem_limit = int(min(max(2 * weight_bytes + 2 * act_bytes + (8 << 20),
                                 32 << 20), 64 << 20))

        flops = L * B * S * (8 * D * D + 4 * D * I) + L * B * 4 * S * S * D
        trans = L * B * (H * S * S + S * I)
        # NB: weights counted once (advisory only, not per grid step).
        bytes_acc = weight_bytes + 4 * (2 * B * S * D + B * S)

        return pl.pallas_call(
            kernel,
            out_shape=jax.ShapeDtypeStruct((B * S, D), x2d.dtype),
            grid=(B // Bblk,),
            in_specs=in_specs,
            out_specs=pl.BlockSpec((M, D), lambda i: (i, 0)),
            scratch_shapes=[pltpu.VMEM((M, D), jnp.float32)],   # attention ctx
            compiler_params=pltpu.CompilerParams(
                dimension_semantics=("parallel",),
                vmem_limit_bytes=vmem_limit),
            cost_estimate=pl.CostEstimate(flops=int(flops),
                                          transcendentals=int(trans),
                                          bytes_accessed=int(bytes_acc)),
        )(x2d, mask3, p["w_qkv"], p["b_qkv"], p["wo"], p["bo"],
          p["g1"], p["be1"], p["wi"], p["bi"], p["wo2"], p["bo2"],
          p["g2"], p["be2"])

    def __call__(self, input_states, attention_mask, head_mask=None,
                 output_all_states=False):
        # attention_mask: [B, 1, 1, S] additive mask (0 keep / -10000 masked).
        # TODO(synk): head_mask and output_attentions are not supported.
        B, S, D = input_states.shape
        mask3 = attention_mask.reshape(B, 1, -1).astype(jnp.float32)
        # Flatten to a lane-dense [B*S, D] slab outside the kernel (layout
        # plumbing only; no in-kernel reshape/transpose needed).
        x2d = input_states.reshape(B * S, D).astype(jnp.float32)

        if output_all_states:
            if self._layer_chunks is None:
                self._layer_chunks = [self._stack([l]) for l in self.layers]
            chunks = self._layer_chunks
        else:
            chunks = self.chunks

        all_states = []
        for chunk in chunks:
            x2d = self._run_chunk(x2d, mask3, chunk)
            if output_all_states:
                all_states.append(x2d.reshape(B, S, chunk["hidden_dim"]))
        if not output_all_states:
            all_states.append(x2d.reshape(B, S, chunks[-1]["hidden_dim"]))
        return all_states

    # ------------------------------------------------------------- reference
    def reference(self, input_states, attention_mask, output_all_states=False):
        """Plain-JAX mirror of the PyTorch SketchEncoder forward (eval mode)."""
        x = input_states
        B, S, D = x.shape
        all_states = []
        for layer in self.layers:
            r = layer["ref"]
            H = layer["num_heads"]
            hd = layer["hidden_dim"] // H
            q = jnp.dot(x, r["wq"]) + r["bq"]
            k = jnp.dot(x, r["wk"]) + r["bk"]
            v = jnp.dot(x, r["wv"]) + r["bv"]

            def split(t):
                return t.reshape(B, S, H, hd).transpose(0, 2, 1, 3)

            qh, kh, vh = split(q), split(k), split(v)
            scores = jnp.einsum("bhqd,bhkd->bhqk", qh, kh) / r["scale"]
            scores = scores + attention_mask
            probs = jax.nn.softmax(scores, axis=-1)
            ctx = jnp.einsum("bhqk,bhkd->bhqd", probs, vh)
            ctx = ctx.transpose(0, 2, 1, 3).reshape(B, S, D)
            attn = jnp.dot(ctx, r["wo"]) + r["bo"]
            h1 = _layer_norm(attn + x, r["g1"], r["be1"])
            inter = jnp.dot(h1, r["wi"]) + r["bi"]
            if self.inter_activation == "gelu":
                inter = inter * 0.5 * (1.0 + _erf_exact(inter * _INV_SQRT2))
            else:
                inter = jnp.maximum(inter, 0.0)
            ffn = jnp.dot(inter, r["wo2"]) + r["bo2"]
            x = _layer_norm(ffn + h1, r["g2"], r["be2"])
            if output_all_states:
                all_states.append(x)
        if not output_all_states:
            all_states.append(x)
        return all_states


if __name__ == "__main__":
    # Small shapes consistent with the module: 2 transformer layers, each
    # [num_heads=4, hidden_dim=128, inter_dim=256]; batch=2, seq=8.
    layers_setting = [[4, 128, 256], [4, 128, 256]]
    batch, seq = 2, 8
    hidden_dim = layers_setting[0][1]

    root = jax.random.PRNGKey(0)
    k_param, k_x = jax.random.split(root)

    input_states = jax.random.normal(k_x, (batch, seq, hidden_dim), jnp.float32)
    # Additive attention mask [B, 1, 1, S]: 0 = visible, -10000 = masked.
    # Second sequence has its last 3 positions masked out.
    keep = jnp.array([[1.0] * seq, [1.0] * (seq - 3) + [0.0] * 3], jnp.float32)
    attention_mask = (1.0 - keep)[:, None, None, :] * -10000.0

    # f32 matmul operands: tight check against the plain-JAX reference.
    enc = SketchEncoderPallas(
        layers_setting, attention_norm_type="LN", inter_activation="gelu",
        attention_dropout_prob=0.0, hidden_dropout_prob=0.0,
        output_dropout_prob=0.0, key=k_param)
    out = jax.block_until_ready(enc(input_states, attention_mask)[-1])
    assert out.shape == (batch, seq, hidden_dim), out.shape
    ref = jax.block_until_ready(enc.reference(input_states, attention_mask)[-1])
    err_f32 = float(jnp.max(jnp.abs(out - ref)))
    assert err_f32 < 5e-3, err_f32

    # bf16 matmul operands with f32 accumulation (v6e/v7x production path);
    # same parameters (same PRNG key), looser tolerance for bf16 rounding.
    enc_bf16 = SketchEncoderPallas(
        layers_setting, attention_norm_type="LN", inter_activation="gelu",
        matmul_dtype=jnp.bfloat16, key=k_param)
    out_bf16 = jax.block_until_ready(enc_bf16(input_states, attention_mask)[-1])
    err_bf16 = float(jnp.max(jnp.abs(out_bf16 - ref)))
    assert err_bf16 < 1e-1, err_bf16

    print("KERNEL_OK")
</pallas_src>

<mosaic_0001>
module attributes {stable_mosaic.version = 11 : i64} {
  func.func @_sketch_stack_kernel(%arg0: i32, %arg1: memref<16x128xf32, #tpu.memory_space<vmem>>, %arg2: memref<2x1x8xf32, #tpu.memory_space<vmem>>, %arg3: memref<2x128x384xf32, #tpu.memory_space<vmem>>, %arg4: memref<2x1x384xf32, #tpu.memory_space<vmem>>, %arg5: memref<2x128x128xf32, #tpu.memory_space<vmem>>, %arg6: memref<2x1x128xf32, #tpu.memory_space<vmem>>, %arg7: memref<2x1x128xf32, #tpu.memory_space<vmem>>, %arg8: memref<2x1x128xf32, #tpu.memory_space<vmem>>, %arg9: memref<2x128x256xf32, #tpu.memory_space<vmem>>, %arg10: memref<2x1x256xf32, #tpu.memory_space<vmem>>, %arg11: memref<2x256x128xf32, #tpu.memory_space<vmem>>, %arg12: memref<2x1x128xf32, #tpu.memory_space<vmem>>, %arg13: memref<2x1x128xf32, #tpu.memory_space<vmem>>, %arg14: memref<2x1x128xf32, #tpu.memory_space<vmem>>, %arg15: memref<16x128xf32, #tpu.memory_space<vmem>>, %arg16: memref<16x128xf32, #tpu.memory_space<vmem>>) attributes {dimension_semantics = [#tpu.dimension_semantics<parallel>], iteration_bounds = array<i64: 1>, scalar_prefetch = 0 : i64, scratch_operands = 1 : i64, tpu.core_type = #tpu.core_type<tc>, window_params = [{transform_indices = @transform_0, window_bounds = array<i64: 16, 128>}, {transform_indices = @transform_1, window_bounds = array<i64: 2, 1, 8>}, {pipeline_mode = #tpu.pipeline_mode<synchronous>, transform_indices = @transform_2, window_bounds = array<i64: 2, 128, 384>}, {pipeline_mode = #tpu.pipeline_mode<synchronous>, transform_indices = @transform_3, window_bounds = array<i64: 2, 1, 384>}, {pipeline_mode = #tpu.pipeline_mode<synchronous>, transform_indices = @transform_4, window_bounds = array<i64: 2, 128, 128>}, {pipeline_mode = #tpu.pipeline_mode<synchronous>, transform_indices = @transform_5, window_bounds = array<i64: 2, 1, 128>}, {pipeline_mode = #tpu.pipeline_mode<synchronous>, transform_indices = @transform_6, window_bounds = array<i64: 2, 1, 128>}, {pipeline_mode = #tpu.pipeline_mode<synchronous>, transform_indices = @transform_7, window_bounds = array<i64: 2, 1, 128>}, {pipeline_mode = #tpu.pipeline_mode<synchronous>, transform_indices = @transform_8, window_bounds = array<i64: 2, 128, 256>}, {pipeline_mode = #tpu.pipeline_mode<synchronous>, transform_indices = @transform_9, window_bounds = array<i64: 2, 1, 256>}, {pipeline_mode = #tpu.pipeline_mode<synchronous>, transform_indices = @transform_10, window_bounds = array<i64: 2, 256, 128>}, {pipeline_mode = #tpu.pipeline_mode<synchronous>, transform_indices = @transform_11, window_bounds = array<i64: 2, 1, 128>}, {pipeline_mode = #tpu.pipeline_mode<synchronous>, transform_indices = @transform_12, window_bounds = array<i64: 2, 1, 128>}, {pipeline_mode = #tpu.pipeline_mode<synchronous>, transform_indices = @transform_13, window_bounds = array<i64: 2, 1, 128>}, {transform_indices = @transform_14, window_bounds = array<i64: 16, 128>}]} {
    %c0 = arith.constant 0 : index
    %c0_0 = arith.constant 0 : index
    %c0_1 = arith.constant 0 : index
    %0 = vector.load %arg2[%c0, %c0_0, %c0_1] : memref<2x1x8xf32, #tpu.memory_space<vmem>>, vector<1x1x8xf32>
    %1 = vector.shape_cast %0 : vector<1x1x8xf32> to vector<1x8xf32>
    %2 = vector.shape_cast %1 : vector<1x8xf32> to vector<1x8xf32>
    %3 = vector.broadcast %2 : vector<1x8xf32> to vector<8x8xf32>
    %c1 = arith.constant 1 : index
    %c0_2 = arith.constant 0 : index
    %c0_3 = arith.constant 0 : index
    %4 = vector.load %arg2[%c1, %c0_2, %c0_3] : memref<2x1x8xf32, #tpu.memory_space<vmem>>, vector<1x1x8xf32>
    %5 = vector.shape_cast %4 : vector<1x1x8xf32> to vector<1x8xf32>
    %6 = vector.shape_cast %5 : vector<1x8xf32> to vector<1x8xf32>
    %7 = vector.broadcast %6 : vector<1x8xf32> to vector<8x8xf32>
    %c0_4 = arith.constant 0 : index
    %c0_5 = arith.constant 0 : index
    %8 = vector.load %arg1[%c0_4, %c0_5] : memref<16x128xf32, #tpu.memory_space<vmem>>, vector<16x128xf32>
    %c0_6 = arith.constant 0 : index
    %c0_7 = arith.constant 0 : index
    %c0_8 = arith.constant 0 : index
    %9 = vector.load %arg3[%c0_6, %c0_7, %c0_8] : memref<2x128x384xf32, #tpu.memory_space<vmem>>, vector<1x128x384xf32>
    %10 = vector.shape_cast %9 : vector<1x128x384xf32> to vector<128x384xf32>
    %cst = arith.constant dense<0.000000e+00> : vector<16x384xf32>
    %11 = tpu.matmul %8, %10, %cst {dimension_numbers = #tpu.dot_dimension_numbers<[1], [0], [0], [1], [0, 0, 1, 1], [], []>} : vector<16x128xf32>, vector<128x384xf32>, vector<16x384xf32> -> vector<16x384xf32>
    %c0_9 = arith.constant 0 : index
    %c0_10 = arith.constant 0 : index
    %c0_11 = arith.constant 0 : index
    %12 = vector.load %arg4[%c0_9, %c0_10, %c0_11] : memref<2x1x384xf32, #tpu.memory_space<vmem>>, vector<1x1x384xf32>
    %13 = vector.shape_cast %12 : vector<1x1x384xf32> to vector<1x384xf32>
    %14 = vector.broadcast %13 : vector<1x384xf32> to vector<16x384xf32>
    %15 = arith.addf %11, %14 : vector<16x384xf32>
    %16 = vector.extract_strided_slice %15 {offsets = [0, 0], sizes = [8, 128], strides = [1, 1]} : vector<16x384xf32> to vector<8x128xf32>
    %17 = vector.extract_strided_slice %15 {offsets = [0, 128], sizes = [8, 128], strides = [1, 1]} : vector<16x384xf32> to vector<8x128xf32>
    %18 = vector.extract_strided_slice %15 {offsets = [0, 256], sizes = [8, 128], strides = [1, 1]} : vector<16x384xf32> to vector<8x128xf32>
    %19 = vector.extract_strided_slice %16 {offsets = [0, 0], sizes = [8, 32], strides = [1, 1]} : vector<8x128xf32> to vector<8x32xf32>
    %20 = vector.extract_strided_slice %17 {offsets = [0, 0], sizes = [8, 32], strides = [1, 1]} : vector<8x128xf32> to vector<8x32xf32>
    "tpu.trace_start"() <{level = 10 : i32, message = "qd,kd->qk"}> : () -> ()
    %cst_12 = arith.constant dense<0.000000e+00> : vector<8x8xf32>
    %21 = tpu.matmul %19, %20, %cst_12 {dimension_numbers = #tpu.dot_dimension_numbers<[1], [1], [0], [0], [0, 0, 1, 0], [], []>} : vector<8x32xf32>, vector<8x32xf32>, vector<8x8xf32> -> vector<8x8xf32>
    "tpu.trace_stop"() : () -> ()
    %22 = arith.addf %21, %3 : vector<8x8xf32>
    %cst_13 = arith.constant dense<0xFF800000> : vector<8xf32>
    %23 = vector.multi_reduction <maximumf>, %22, %cst_13 [1] : vector<8x8xf32> to vector<8xf32>
    %24 = vector.shape_cast %23 : vector<8xf32> to vector<8x1xf32>
    %25 = vector.broadcast %24 : vector<8x1xf32> to vector<8x8xf32>
    %26 = arith.subf %22, %25 : vector<8x8xf32>
    %27 = math.exp %26 : vector<8x8xf32>
    %cst_14 = arith.constant dense<0.000000e+00> : vector<8xf32>
    %28 = vector.multi_reduction <add>, %27, %cst_14 [1] : vector<8x8xf32> to vector<8xf32>
    %29 = vector.shape_cast %28 : vector<8xf32> to vector<8x1xf32>
    %30 = vector.extract_strided_slice %18 {offsets = [0, 0], sizes = [8, 32], strides = [1, 1]} : vector<8x128xf32> to vector<8x32xf32>
    %cst_15 = arith.constant dense<0.000000e+00> : vector<8x32xf32>
    %31 = tpu.matmul %27, %30, %cst_15 {dimension_numbers = #tpu.dot_dimension_numbers<[1], [0], [0], [1], [0, 0, 1, 1], [], []>} : vector<8x8xf32>, vector<8x32xf32>, vector<8x32xf32> -> vector<8x32xf32>
    %32 = tpu.reciprocal %29 {approx = true} : vector<8x1xf32> -> vector<8x1xf32>
    %33 = vector.broadcast %32 : vector<8x1xf32> to vector<8x32xf32>
    %34 = arith.mulf %31, %33 : vector<8x32xf32>
    %c0_16 = arith.constant 0 : index
    %c0_17 = arith.constant 0 : index
    %35 = vector.load %arg16[%c0_16, %c0_17] : memref<16x128xf32, #tpu.memory_space<vmem>>, vector<8x32xf32>
    tpu.vector_store %arg16[%c0_16, %c0_17], %34 {strides = array<i32>} : memref<16x128xf32, #tpu.memory_space<vmem>>, vector<8x32xf32>,
    %36 = vector.extract_strided_slice %16 {offsets = [0, 32], sizes = [8, 32], strides = [1, 1]} : vector<8x128xf32> to vector<8x32xf32>
    %37 = vector.extract_strided_slice %17 {offsets = [0, 32], sizes = [8, 32], strides = [1, 1]} : vector<8x128xf32> to vector<8x32xf32>
    "tpu.trace_start"() <{level = 10 : i32, message = "qd,kd->qk"}> : () -> ()
    %cst_18 = arith.constant dense<0.000000e+00> : vector<8x8xf32>
    %38 = tpu.matmul %36, %37, %cst_18 {dimension_numbers = #tpu.dot_dimension_numbers<[1], [1], [0], [0], [0, 0, 1, 0], [], []>} : vector<8x32xf32>, vector<8x32xf32>, vector<8x8xf32> -> vector<8x8xf32>
    "tpu.trace_stop"() : () -> ()
    %39 = arith.addf %38, %3 : vector<8x8xf32>
    %cst_19 = arith.constant dense<0xFF800000> : vector<8xf32>
    %40 = vector.multi_reduction <maximumf>, %39, %cst_19 [1] : vector<8x8xf32> to vector<8xf32>
    %41 = vector.shape_cast %40 : vector<8xf32> to vector<8x1xf32>
    %42 = vector.broadcast %41 : vector<8x1xf32> to vector<8x8xf32>
    %43 = arith.subf %39, %42 : vector<8x8xf32>
    %44 = math.exp %43 : vector<8x8xf32>
    %cst_20 = arith.constant dense<0.000000e+00> : vector<8xf32>
    %45 = vector.multi_reduction <add>, %44, %cst_20 [1] : vector<8x8xf32> to vector<8xf32>
    %46 = vector.shape_cast %45 : vector<8xf32> to vector<8x1xf32>
    %47 = vector.extract_strided_slice %18 {offsets = [0, 32], sizes = [8, 32], strides = [1, 1]} : vector<8x128xf32> to vector<8x32xf32>
    %cst_21 = arith.constant dense<0.000000e+00> : vector<8x32xf32>
    %48 = tpu.matmul %44, %47, %cst_21 {dimension_numbers = #tpu.dot_dimension_numbers<[1], [0], [0], [1], [0, 0, 1, 1], [], []>} : vector<8x8xf32>, vector<8x32xf32>, vector<8x32xf32> -> vector<8x32xf32>
    %49 = tpu.reciprocal %46 {approx = true} : vector<8x1xf32> -> vector<8x1xf32>
    %50 = vector.broadcast %49 : vector<8x1xf32> to vector<8x32xf32>
    %51 = arith.mulf %48, %50 : vector<8x32xf32>
    %c0_22 = arith.constant 0 : index
    %c32 = arith.constant 32 : index
    %52 = vector.load %arg16[%c0_22, %c32] : memref<16x128xf32, #tpu.memory_space<vmem>>, vector<8x32xf32>
    tpu.vector_store %arg16[%c0_22, %c32], %51 {strides = array<i32>} : memref<16x128xf32, #tpu.memory_space<vmem>>, vector<8x32xf32>,
    %53 = vector.extract_strided_slice %16 {offsets = [0, 64], sizes = [8, 32], strides = [1, 1]} : vector<8x128xf32> to vector<8x32xf32>
    %54 = vector.extract_strided_slice %17 {offsets = [0, 64], sizes = [8, 32], strides = [1, 1]} : vector<8x128xf32> to vector<8x32xf32>
    "tpu.trace_start"() <{level = 10 : i32, message = "qd,kd->qk"}> : () -> ()
    %cst_23 = arith.constant dense<0.000000e+00> : vector<8x8xf32>
    %55 = tpu.matmul %53, %54, %cst_23 {dimension_numbers = #tpu.dot_dimension_numbers<[1], [1], [0], [0], [0, 0, 1, 0], [], []>} : vector<8x32xf32>, vector<8x32xf32>, vector<8x8xf32> -> vector<8x8xf32>
    "tpu.trace_stop"() : () -> ()
    %56 = arith.addf %55, %3 : vector<8x8xf32>
    %cst_24 = arith.constant dense<0xFF800000> : vector<8xf32>
    %57 = vector.multi_reduction <maximumf>, %56, %cst_24 [1] : vector<8x8xf32> to vector<8xf32>
    %58 = vector.shape_cast %57 : vector<8xf32> to vector<8x1xf32>
    %59 = vector.broadcast %58 : vector<8x1xf32> to vector<8x8xf32>
    %60 = arith.subf %56, %59 : vector<8x8xf32>
    %61 = math.exp %60 : vector<8x8xf32>
    %cst_25 = arith.constant dense<0.000000e+00> : vector<8xf32>
    %62 = vector.multi_reduction <add>, %61, %cst_25 [1] : vector<8x8xf32> to vector<8xf32>
    %63 = vector.shape_cast %62 : vector<8xf32> to vector<8x1xf32>
    %64 = vector.extract_strided_slice %18 {offsets = [0, 64], sizes = [8, 32], strides = [1, 1]} : vector<8x128xf32> to vector<8x32xf32>
    %cst_26 = arith.constant dense<0.000000e+00> : vector<8x32xf32>
    %65 = tpu.matmul %61, %64, %cst_26 {dimension_numbers = #tpu.dot_dimension_numbers<[1], [0], [0], [1], [0, 0, 1, 1], [], []>} : vector<8x8xf32>, vector<8x32xf32>, vector<8x32xf32> -> vector<8x32xf32>
    %66 = tpu.reciprocal %63 {approx = true} : vector<8x1xf32> -> vector<8x1xf32>
    %67 = vector.broadcast %66 : vector<8x1xf32> to vector<8x32xf32>
    %68 = arith.mulf %65, %67 : vector<8x32xf32>
    %c0_27 = arith.constant 0 : index
    %c64 = arith.constant 64 : index
    %69 = vector.load %arg16[%c0_27, %c64] : memref<16x128xf32, #tpu.memory_space<vmem>>, vector<8x32xf32>
    tpu.vector_store %arg16[%c0_27, %c64], %68 {strides = array<i32>} : memref<16x128xf32, #tpu.memory_space<vmem>>, vector<8x32xf32>,
    %70 = vector.extract_strided_slice %16 {offsets = [0, 96], sizes = [8, 32], strides = [1, 1]} : vector<8x128xf32> to vector<8x32xf32>
    %71 = vector.extract_strided_slice %17 {offsets = [0, 96], sizes = [8, 32], strides = [1, 1]} : vector<8x128xf32> to vector<8x32xf32>
    "tpu.trace_start"() <{level = 10 : i32, message = "qd,kd->qk"}> : () -> ()
    %cst_28 = arith.constant dense<0.000000e+00> : vector<8x8xf32>
    %72 = tpu.matmul %70, %71, %cst_28 {dimension_numbers = #tpu.dot_dimension_numbers<[1], [1], [0], [0], [0, 0, 1, 0], [], []>} : vector<8x32xf32>, vector<8x32xf32>, vector<8x8xf32> -> vector<8x8xf32>
    "tpu.trace_stop"() : () -> ()
    %73 = arith.addf %72, %3 : vector<8x8xf32>
    %cst_29 = arith.constant dense<0xFF800000> : vector<8xf32>
    %74 = vector.multi_reduction <maximumf>, %73, %cst_29 [1] : vector<8x8xf32> to vector<8xf32>
    %75 = vector.shape_cast %74 : vector<8xf32> to vector<8x1xf32>
    %76 = vector.broadcast %75 : vector<8x1xf32> to vector<8x8xf32>
    %77 = arith.subf %73, %76 : vector<8x8xf32>
    %78 = math.exp %77 : vector<8x8xf32>
    %cst_30 = arith.constant dense<0.000000e+00> : vector<8xf32>
    %79 = vector.multi_reduction <add>, %78, %cst_30 [1] : vector<8x8xf32> to vector<8xf32>
    %80 = vector.shape_cast %79 : vector<8xf32> to vector<8x1xf32>
    %81 = vector.extract_strided_slice %18 {offsets = [0, 96], sizes = [8, 32], strides = [1, 1]} : vector<8x128xf32> to vector<8x32xf32>
    %cst_31 = arith.constant dense<0.000000e+00> : vector<8x32xf32>
    %82 = tpu.matmul %78, %81, %cst_31 {dimension_numbers = #tpu.dot_dimension_numbers<[1], [0], [0], [1], [0, 0, 1, 1], [], []>} : vector<8x8xf32>, vector<8x32xf32>, vector<8x32xf32> -> vector<8x32xf32>
    %83 = tpu.reciprocal %80 {approx = true} : vector<8x1xf32> -> vector<8x1xf32>
    %84 = vector.broadcast %83 : vector<8x1xf32> to vector<8x32xf32>
    %85 = arith.mulf %82, %84 : vector<8x32xf32>
    %c0_32 = arith.constant 0 : index
    %c96 = arith.constant 96 : index
    %86 = vector.load %arg16[%c0_32, %c96] : memref<16x128xf32, #tpu.memory_space<vmem>>, vector<8x32xf32>
    tpu.vector_store %arg16[%c0_32, %c96], %85 {strides = array<i32>} : memref<16x128xf32, #tpu.memory_space<vmem>>, vector<8x32xf32>,
    %87 = vector.extract_strided_slice %15 {offsets = [8, 0], sizes = [8, 128], strides = [1, 1]} : vector<16x384xf32> to vector<8x128xf32>
    %88 = vector.extract_strided_slice %15 {offsets = [8, 128], sizes = [8, 128], strides = [1, 1]} : vector<16x384xf32> to vector<8x128xf32>
    %89 = vector.extract_strided_slice %15 {offsets = [8, 256], sizes = [8, 128], strides = [1, 1]} : vector<16x384xf32> to vector<8x128xf32>
    %90 = vector.extract_strided_slice %87 {offsets = [0, 0], sizes = [8, 32], strides = [1, 1]} : vector<8x128xf32> to vector<8x32xf32>
    %91 = vector.extract_strided_slice %88 {offsets = [0, 0], sizes = [8, 32], strides = [1, 1]} : vector<8x128xf32> to vector<8x32xf32>
    "tpu.trace_start"() <{level = 10 : i32, message = "qd,kd->qk"}> : () -> ()
    %cst_33 = arith.constant dense<0.000000e+00> : vector<8x8xf32>
    %92 = tpu.matmul %90, %91, %cst_33 {dimension_numbers = #tpu.dot_dimension_numbers<[1], [1], [0], [0], [0, 0, 1, 0], [], []>} : vector<8x32xf32>, vector<8x32xf32>, vector<8x8xf32> -> vector<8x8xf32>
    "tpu.trace_stop"() : () -> ()
    %93 = arith.addf %92, %7 : vector<8x8xf32>
    %cst_34 = arith.constant dense<0xFF800000> : vector<8xf32>
    %94 = vector.multi_reduction <maximumf>, %93, %cst_34 [1] : vector<8x8xf32> to vector<8xf32>
    %95 = vector.shape_cast %94 : vector<8xf32> to vector<8x1xf32>
    %96 = vector.broadcast %95 : vector<8x1xf32> to vector<8x8xf32>
    %97 = arith.subf %93, %96 : vector<8x8xf32>
    %98 = math.exp %97 : vector<8x8xf32>
    %cst_35 = arith.constant dense<0.000000e+00> : vector<8xf32>
    %99 = vector.multi_reduction <add>, %98, %cst_35 [1] : vector<8x8xf32> to vector<8xf32>
    %100 = vector.shape_cast %99 : vector<8xf32> to vector<8x1xf32>
    %101 = vector.extract_strided_slice %89 {offsets = [0, 0], sizes = [8, 32], strides = [1, 1]} : vector<8x128xf32> to vector<8x32xf32>
    %cst_36 = arith.constant dense<0.000000e+00> : vector<8x32xf32>
    %102 = tpu.matmul %98, %101, %cst_36 {dimension_numbers = #tpu.dot_dimension_numbers<[1], [0], [0], [1], [0, 0, 1, 1], [], []>} : vector<8x8xf32>, vector<8x32xf32>, vector<8x32xf32> -> vector<8x32xf32>
    %103 = tpu.reciprocal %100 {approx = true} : vector<8x1xf32> -> vector<8x1xf32>
    %104 = vector.broadcast %103 : vector<8x1xf32> to vector<8x32xf32>
    %105 = arith.mulf %102, %104 : vector<8x32xf32>
    %c8 = arith.constant 8 : index
    %c0_37 = arith.constant 0 : index
    %106 = vector.load %arg16[%c8, %c0_37] : memref<16x128xf32, #tpu.memory_space<vmem>>, vector<8x32xf32>
    tpu.vector_store %arg16[%c8, %c0_37], %105 {strides = array<i32>} : memref<16x128xf32, #tpu.memory_space<vmem>>, vector<8x32xf32>,
    %107 = vector.extract_strided_slice %87 {offsets = [0, 32], sizes = [8, 32], strides = [1, 1]} : vector<8x128xf32> to vector<8x32xf32>
    %108 = vector.extract_strided_slice %88 {offsets = [0, 32], sizes = [8, 32], strides = [1, 1]} : vector<8x128xf32> to vector<8x32xf32>
    "tpu.trace_start"() <{level = 10 : i32, message = "qd,kd->qk"}> : () -> ()
    %cst_38 = arith.constant dense<0.000000e+00> : vector<8x8xf32>
    %109 = tpu.matmul %107, %108, %cst_38 {dimension_numbers = #tpu.dot_dimension_numbers<[1], [1], [0], [0], [0, 0, 1, 0], [], []>} : vector<8x32xf32>, vector<8x32xf32>, vector<8x8xf32> -> vector<8x8xf32>
    "tpu.trace_stop"() : () -> ()
    %110 = arith.addf %109, %7 : vector<8x8xf32>
    %cst_39 = arith.constant dense<0xFF800000> : vector<8xf32>
    %111 = vector.multi_reduction <maximumf>, %110, %cst_39 [1] : vector<8x8xf32> to vector<8xf32>
    %112 = vector.shape_cast %111 : vector<8xf32> to vector<8x1xf32>
    %113 = vector.broadcast %112 : vector<8x1xf32> to vector<8x8xf32>
    %114 = arith.subf %110, %113 : vector<8x8xf32>
    %115 = math.exp %114 : vector<8x8xf32>
    %cst_40 = arith.constant dense<0.000000e+00> : vector<8xf32>
    %116 = vector.multi_reduction <add>, %115, %cst_40 [1] : vector<8x8xf32> to vector<8xf32>
    %117 = vector.shape_cast %116 : vector<8xf32> to vector<8x1xf32>
    %118 = vector.extract_strided_slice %89 {offsets = [0, 32], sizes = [8, 32], strides = [1, 1]} : vector<8x128xf32> to vector<8x32xf32>
    %cst_41 = arith.constant dense<0.000000e+00> : vector<8x32xf32>
    %119 = tpu.matmul %115, %118, %cst_41 {dimension_numbers = #tpu.dot_dimension_numbers<[1], [0], [0], [1], [0, 0, 1, 1], [], []>} : vector<8x8xf32>, vector<8x32xf32>, vector<8x32xf32> -> vector<8x32xf32>
    %120 = tpu.reciprocal %117 {approx = true} : vector<8x1xf32> -> vector<8x1xf32>
    %121 = vector.broadcast %120 : vector<8x1xf32> to vector<8x32xf32>
    %122 = arith.mulf %119, %121 : vector<8x32xf32>
    %c8_42 = arith.constant 8 : index
    %c32_43 = arith.constant 32 : index
    %123 = vector.load %arg16[%c8_42, %c32_43] : memref<16x128xf32, #tpu.memory_space<vmem>>, vector<8x32xf32>
    tpu.vector_store %arg16[%c8_42, %c32_43], %122 {strides = array<i32>} : memref<16x128xf32, #tpu.memory_space<vmem>>, vector<8x32xf32>,
    %124 = vector.extract_strided_slice %87 {offsets = [0, 64], sizes = [8, 32], strides = [1, 1]} : vector<8x128xf32> to vector<8x32xf32>
    %125 = vector.extract_strided_slice %88 {offsets = [0, 64], sizes = [8, 32], strides = [1, 1]} : vector<8x128xf32> to vector<8x32xf32>
    "tpu.trace_start"() <{level = 10 : i32, message = "qd,kd->qk"}> : () -> ()
    %cst_44 = arith.constant dense<0.000000e+00> : vector<8x8xf32>
    %126 = tpu.matmul %124, %125, %cst_44 {dimension_numbers = #tpu.dot_dimension_numbers<[1], [1], [0], [0], [0, 0, 1, 0], [], []>} : vector<8x32xf32>, vector<8x32xf32>, vector<8x8xf32> -> vector<8x8xf32>
    "tpu.trace_stop"() : () -> ()
    %127 = arith.addf %126, %7 : vector<8x8xf32>
    %cst_45 = arith.constant dense<0xFF800000> : vector<8xf32>
    %128 = vector.multi_reduction <maximumf>, %127, %cst_45 [1] : vector<8x8xf32> to vector<8xf32>
    %129 = vector.shape_cast %128 : vector<8xf32> to vector<8x1xf32>
    %130 = vector.broadcast %129 : vector<8x1xf32> to vector<8x8xf32>
    %131 = arith.subf %127, %130 : vector<8x8xf32>
    %132 = math.exp %131 : vector<8x8xf32>
    %cst_46 = arith.constant dense<0.000000e+00> : vector<8xf32>
    %133 = vector.multi_reduction <add>, %132, %cst_46 [1] : vector<8x8xf32> to vector<8xf32>
    %134 = vector.shape_cast %133 : vector<8xf32> to vector<8x1xf32>
    %135 = vector.extract_strided_slice %89 {offsets = [0, 64], sizes = [8, 32], strides = [1, 1]} : vector<8x128xf32> to vector<8x32xf32>
    %cst_47 = arith.constant dense<0.000000e+00> : vector<8x32xf32>
    %136 = tpu.matmul %132, %135, %cst_47 {dimension_numbers = #tpu.dot_dimension_numbers<[1], [0], [0], [1], [0, 0, 1, 1], [], []>} : vector<8x8xf32>, vector<8x32xf32>, vector<8x32xf32> -> vector<8x32xf32>
    %137 = tpu.reciprocal %134 {approx = true} : vector<8x1xf32> -> vector<8x1xf32>
    %138 = vector.broadcast %137 : vector<8x1xf32> to vector<8x32xf32>
    %139 = arith.mulf %136, %138 : vector<8x32xf32>
    %c8_48 = arith.constant 8 : index
    %c64_49 = arith.constant 64 : index
    %140 = vector.load %arg16[%c8_48, %c64_49] : memref<16x128xf32, #tpu.memory_space<vmem>>, vector<8x32xf32>
    tpu.vector_store %arg16[%c8_48, %c64_49], %139 {strides = array<i32>} : memref<16x128xf32, #tpu.memory_space<vmem>>, vector<8x32xf32>,
    %141 = vector.extract_strided_slice %87 {offsets = [0, 96], sizes = [8, 32], strides = [1, 1]} : vector<8x128xf32> to vector<8x32xf32>
    %142 = vector.extract_strided_slice %88 {offsets = [0, 96], sizes = [8, 32], strides = [1, 1]} : vector<8x128xf32> to vector<8x32xf32>
    "tpu.trace_start"() <{level = 10 : i32, message = "qd,kd->qk"}> : () -> ()
    %cst_50 = arith.constant dense<0.000000e+00> : vector<8x8xf32>
    %143 = tpu.matmul %141, %142, %cst_50 {dimension_numbers = #tpu.dot_dimension_numbers<[1], [1], [0], [0], [0, 0, 1, 0], [], []>} : vector<8x32xf32>, vector<8x32xf32>, vector<8x8xf32> -> vector<8x8xf32>
    "tpu.trace_stop"() : () -> ()
    %144 = arith.addf %143, %7 : vector<8x8xf32>
    %cst_51 = arith.constant dense<0xFF800000> : vector<8xf32>
    %145 = vector.multi_reduction <maximumf>, %144, %cst_51 [1] : vector<8x8xf32> to vector<8xf32>
    %146 = vector.shape_cast %145 : vector<8xf32> to vector<8x1xf32>
    %147 = vector.broadcast %146 : vector<8x1xf32> to vector<8x8xf32>
    %148 = arith.subf %144, %147 : vector<8x8xf32>
    %149 = math.exp %148 : vector<8x8xf32>
    %cst_52 = arith.constant dense<0.000000e+00> : vector<8xf32>
    %150 = vector.multi_reduction <add>, %149, %cst_52 [1] : vector<8x8xf32> to vector<8xf32>
    %151 = vector.shape_cast %150 : vector<8xf32> to vector<8x1xf32>
    %152 = vector.extract_strided_slice %89 {offsets = [0, 96], sizes = [8, 32], strides = [1, 1]} : vector<8x128xf32> to vector<8x32xf32>
    %cst_53 = arith.constant dense<0.000000e+00> : vector<8x32xf32>
    %153 = tpu.matmul %149, %152, %cst_53 {dimension_numbers = #tpu.dot_dimension_numbers<[1], [0], [0], [1], [0, 0, 1, 1], [], []>} : vector<8x8xf32>, vector<8x32xf32>, vector<8x32xf32> -> vector<8x32xf32>
    %154 = tpu.reciprocal %151 {approx = true} : vector<8x1xf32> -> vector<8x1xf32>
    %155 = vector.broadcast %154 : vector<8x1xf32> to vector<8x32xf32>
    %156 = arith.mulf %153, %155 : vector<8x32xf32>
    %c8_54 = arith.constant 8 : index
    %c96_55 = arith.constant 96 : index
    %157 = vector.load %arg16[%c8_54, %c96_55] : memref<16x128xf32, #tpu.memory_space<vmem>>, vector<8x32xf32>
    tpu.vector_store %arg16[%c8_54, %c96_55], %156 {strides = array<i32>} : memref<16x128xf32, #tpu.memory_space<vmem>>, vector<8x32xf32>,
    %c0_56 = arith.constant 0 : index
    %c0_57 = arith.constant 0 : index
    %158 = vector.load %arg16[%c0_56, %c0_57] : memref<16x128xf32, #tpu.memory_space<vmem>>, vector<16x128xf32>
    %c0_58 = arith.constant 0 : index
    %c0_59 = arith.constant 0 : index
    %c0_60 = arith.constant 0 : index
    %159 = vector.load %arg5[%c0_58, %c0_59, %c0_60] : memref<2x128x128xf32, #tpu.memory_space<vmem>>, vector<1x128x128xf32>
    %160 = vector.shape_cast %159 : vector<1x128x128xf32> to vector<128x128xf32>
    %cst_61 = arith.constant dense<0.000000e+00> : vector<16x128xf32>
    %161 = tpu.matmul %158, %160, %cst_61 {dimension_numbers = #tpu.dot_dimension_numbers<[1], [0], [0], [1], [0, 0, 1, 1], [], []>} : vector<16x128xf32>, vector<128x128xf32>, vector<16x128xf32> -> vector<16x128xf32>
    %c0_62 = arith.constant 0 : index
    %c0_63 = arith.constant 0 : index
    %c0_64 = arith.constant 0 : index
    %162 = vector.load %arg6[%c0_62, %c0_63, %c0_64] : memref<2x1x128xf32, #tpu.memory_space<vmem>>, vector<1x1x128xf32>
    %163 = vector.shape_cast %162 : vector<1x1x128xf32> to vector<1x128xf32>
    %164 = vector.broadcast %163 : vector<1x128xf32> to vector<16x128xf32>
    %165 = arith.addf %161, %164 : vector<16x128xf32>
    %166 = arith.addf %165, %8 : vector<16x128xf32>
    %c0_65 = arith.constant 0 : index
    %c0_66 = arith.constant 0 : index
    %c0_67 = arith.constant 0 : index
    %167 = vector.load %arg7[%c0_65, %c0_66, %c0_67] : memref<2x1x128xf32, #tpu.memory_space<vmem>>, vector<1x1x128xf32>
    %168 = vector.shape_cast %167 : vector<1x1x128xf32> to vector<1x128xf32>
    %c0_68 = arith.constant 0 : index
    %c0_69 = arith.constant 0 : index
    %c0_70 = arith.constant 0 : index
    %169 = vector.load %arg8[%c0_68, %c0_69, %c0_70] : memref<2x1x128xf32, #tpu.memory_space<vmem>>, vector<1x1x128xf32>
    %170 = vector.shape_cast %169 : vector<1x1x128xf32> to vector<1x128xf32>
    %cst_71 = arith.constant dense<0.000000e+00> : vector<16xf32>
    %171 = vector.multi_reduction <add>, %166, %cst_71 [1] : vector<16x128xf32> to vector<16xf32>
    %172 = vector.shape_cast %171 : vector<16xf32> to vector<16x1xf32>
    %cst_72 = arith.constant 1.280000e+02 : f32
    %173 = vector.broadcast %cst_72 : f32 to vector<16x1xf32>
    %174 = arith.divf %172, %173 : vector<16x1xf32>
    %175 = vector.broadcast %174 : vector<16x1xf32> to vector<16x128xf32>
    %176 = arith.subf %166, %175 : vector<16x128xf32>
    %177 = arith.mulf %176, %176 : vector<16x128xf32>
    %cst_73 = arith.constant dense<0.000000e+00> : vector<16xf32>
    %178 = vector.multi_reduction <add>, %177, %cst_73 [1] : vector<16x128xf32> to vector<16xf32>
    %179 = vector.shape_cast %178 : vector<16xf32> to vector<16x1xf32>
    %cst_74 = arith.constant 1.280000e+02 : f32
    %180 = vector.broadcast %cst_74 : f32 to vector<16x1xf32>
    %181 = arith.divf %179, %180 : vector<16x1xf32>
    %cst_75 = arith.constant 9.99999974E-6 : f32
    %182 = vector.broadcast %cst_75 : f32 to vector<16x1xf32>
    %183 = arith.addf %181, %182 : vector<16x1xf32>
    %184 = math.rsqrt %183 : vector<16x1xf32>
    %185 = vector.broadcast %184 : vector<16x1xf32> to vector<16x128xf32>
    %186 = arith.mulf %176, %185 : vector<16x128xf32>
    %187 = vector.broadcast %168 : vector<1x128xf32> to vector<16x128xf32>
    %188 = arith.mulf %186, %187 : vector<16x128xf32>
    %189 = vector.broadcast %170 : vector<1x128xf32> to vector<16x128xf32>
    %190 = arith.addf %188, %189 : vector<16x128xf32>
    %c0_76 = arith.constant 0 : index
    %c0_77 = arith.constant 0 : index
    %c0_78 = arith.constant 0 : index
    %191 = vector.load %arg9[%c0_76, %c0_77, %c0_78] : memref<2x128x256xf32, #tpu.memory_space<vmem>>, vector<1x128x256xf32>
    %192 = vector.shape_cast %191 : vector<1x128x256xf32> to vector<128x256xf32>
    %cst_79 = arith.constant dense<0.000000e+00> : vector<16x256xf32>
    %193 = tpu.matmul %190, %192, %cst_79 {dimension_numbers = #tpu.dot_dimension_numbers<[1], [0], [0], [1], [0, 0, 1, 1], [], []>} : vector<16x128xf32>, vector<128x256xf32>, vector<16x256xf32> -> vector<16x256xf32>
    %c0_80 = arith.constant 0 : index
    %c0_81 = arith.constant 0 : index
    %c0_82 = arith.constant 0 : index
    %194 = vector.load %arg10[%c0_80, %c0_81, %c0_82] : memref<2x1x256xf32, #tpu.memory_space<vmem>>, vector<1x1x256xf32>
    %195 = vector.shape_cast %194 : vector<1x1x256xf32> to vector<1x256xf32>
    %196 = vector.broadcast %195 : vector<1x256xf32> to vector<16x256xf32>
    %197 = arith.addf %193, %196 : vector<16x256xf32>
    %cst_83 = arith.constant 5.000000e-01 : f32
    %198 = vector.broadcast %cst_83 : f32 to vector<16x256xf32>
    %199 = arith.mulf %197, %198 : vector<16x256xf32>
    %cst_84 = arith.constant 0.707106769 : f32
    %200 = vector.broadcast %cst_84 : f32 to vector<16x256xf32>
    %201 = arith.mulf %197, %200 : vector<16x256xf32>
    %202 = math.absf %201 : vector<16x256xf32>
    %cst_85 = arith.constant 0.327591091 : f32
    %203 = vector.broadcast %cst_85 : f32 to vector<16x256xf32>
    %204 = arith.mulf %203, %202 : vector<16x256xf32>
    %cst_86 = arith.constant 1.000000e+00 : f32
    %205 = vector.broadcast %cst_86 : f32 to vector<16x256xf32>
    %206 = arith.addf %205, %204 : vector<16x256xf32>
    %207 = tpu.reciprocal %206 {approx = true} : vector<16x256xf32> -> vector<16x256xf32>
    %cst_87 = arith.constant 1.06140542 : f32
    %208 = vector.broadcast %cst_87 : f32 to vector<16x256xf32>
    %209 = arith.mulf %208, %207 : vector<16x256xf32>
    %cst_88 = arith.constant -1.45315206 : f32
    %210 = vector.broadcast %cst_88 : f32 to vector<16x256xf32>
    %211 = arith.addf %209, %210 : vector<16x256xf32>
    %212 = arith.mulf %211, %207 : vector<16x256xf32>
    %cst_89 = arith.constant 1.42141378 : f32
    %213 = vector.broadcast %cst_89 : f32 to vector<16x256xf32>
    %214 = arith.addf %212, %213 : vector<16x256xf32>
    %215 = arith.mulf %214, %207 : vector<16x256xf32>
    %cst_90 = arith.constant -0.284496725 : f32
    %216 = vector.broadcast %cst_90 : f32 to vector<16x256xf32>
    %217 = arith.addf %215, %216 : vector<16x256xf32>
    %218 = arith.mulf %217, %207 : vector<16x256xf32>
    %cst_91 = arith.constant 0.254829586 : f32
    %219 = vector.broadcast %cst_91 : f32 to vector<16x256xf32>
    %220 = arith.addf %218, %219 : vector<16x256xf32>
    %221 = arith.mulf %220, %207 : vector<16x256xf32>
    %cst_92 = arith.constant 0.000000e+00 : f32
    %222 = vector.broadcast %cst_92 : f32 to vector<16x256xf32>
    %223 = arith.subf %222, %202 : vector<16x256xf32>
    %224 = arith.mulf %223, %202 : vector<16x256xf32>
    %225 = math.exp %224 : vector<16x256xf32>
    %226 = arith.mulf %221, %225 : vector<16x256xf32>
    %cst_93 = arith.constant 1.000000e+00 : f32
    %227 = vector.broadcast %cst_93 : f32 to vector<16x256xf32>
    %228 = arith.subf %227, %226 : vector<16x256xf32>
    %cst_94 = arith.constant 0.000000e+00 : f32
    %229 = vector.broadcast %cst_94 : f32 to vector<16x256xf32>
    %230 = arith.cmpf oge, %201, %229 : vector<16x256xf32>
    %cst_95 = arith.constant 0.000000e+00 : f32
    %231 = vector.broadcast %cst_95 : f32 to vector<16x256xf32>
    %232 = arith.subf %231, %228 : vector<16x256xf32>
    %233 = arith.select %230, %228, %232 : vector<16x256xi1>, vector<16x256xf32>
    %cst_96 = arith.constant 1.000000e+00 : f32
    %234 = vector.broadcast %cst_96 : f32 to vector<16x256xf32>
    %235 = arith.addf %234, %233 : vector<16x256xf32>
    %236 = arith.mulf %199, %235 : vector<16x256xf32>
    %c0_97 = arith.constant 0 : index
    %c0_98 = arith.constant 0 : index
    %c0_99 = arith.constant 0 : index
    %237 = vector.load %arg11[%c0_97, %c0_98, %c0_99] : memref<2x256x128xf32, #tpu.memory_space<vmem>>, vector<1x256x128xf32>
    %238 = vector.shape_cast %237 : vector<1x256x128xf32> to vector<256x128xf32>
    %cst_100 = arith.constant dense<0.000000e+00> : vector<16x128xf32>
    %239 = tpu.matmul %236, %238, %cst_100 {dimension_numbers = #tpu.dot_dimension_numbers<[1], [0], [0], [1], [0, 0, 1, 1], [], []>} : vector<16x256xf32>, vector<256x128xf32>, vector<16x128xf32> -> vector<16x128xf32>
    %c0_101 = arith.constant 0 : index
    %c0_102 = arith.constant 0 : index
    %c0_103 = arith.constant 0 : index
    %240 = vector.load %arg12[%c0_101, %c0_102, %c0_103] : memref<2x1x128xf32, #tpu.memory_space<vmem>>, vector<1x1x128xf32>
    %241 = vector.shape_cast %240 : vector<1x1x128xf32> to vector<1x128xf32>
    %242 = vector.broadcast %241 : vector<1x128xf32> to vector<16x128xf32>
    %243 = arith.addf %239, %242 : vector<16x128xf32>
    %244 = arith.addf %243, %190 : vector<16x128xf32>
    %c0_104 = arith.constant 0 : index
    %c0_105 = arith.constant 0 : index
    %c0_106 = arith.constant 0 : index
    %245 = vector.load %arg13[%c0_104, %c0_105, %c0_106] : memref<2x1x128xf32, #tpu.memory_space<vmem>>, vector<1x1x128xf32>
    %246 = vector.shape_cast %245 : vector<1x1x128xf32> to vector<1x128xf32>
    %c0_107 = arith.constant 0 : index
    %c0_108 = arith.constant 0 : index
    %c0_109 = arith.constant 0 : index
    %247 = vector.load %arg14[%c0_107, %c0_108, %c0_109] : memref<2x1x128xf32, #tpu.memory_space<vmem>>, vector<1x1x128xf32>
    %248 = vector.shape_cast %247 : vector<1x1x128xf32> to vector<1x128xf32>
    %cst_110 = arith.constant dense<0.000000e+00> : vector<16xf32>
    %249 = vector.multi_reduction <add>, %244, %cst_110 [1] : vector<16x128xf32> to vector<16xf32>
    %250 = vector.shape_cast %249 : vector<16xf32> to vector<16x1xf32>
    %cst_111 = arith.constant 1.280000e+02 : f32
    %251 = vector.broadcast %cst_111 : f32 to vector<16x1xf32>
    %252 = arith.divf %250, %251 : vector<16x1xf32>
    %253 = vector.broadcast %252 : vector<16x1xf32> to vector<16x128xf32>
    %254 = arith.subf %244, %253 : vector<16x128xf32>
    %255 = arith.mulf %254, %254 : vector<16x128xf32>
    %cst_112 = arith.constant dense<0.000000e+00> : vector<16xf32>
    %256 = vector.multi_reduction <add>, %255, %cst_112 [1] : vector<16x128xf32> to vector<16xf32>
    %257 = vector.shape_cast %256 : vector<16xf32> to vector<16x1xf32>
    %cst_113 = arith.constant 1.280000e+02 : f32
    %258 = vector.broadcast %cst_113 : f32 to vector<16x1xf32>
    %259 = arith.divf %257, %258 : vector<16x1xf32>
    %cst_114 = arith.constant 9.99999974E-6 : f32
    %260 = vector.broadcast %cst_114 : f32 to vector<16x1xf32>
    %261 = arith.addf %259, %260 : vector<16x1xf32>
    %262 = math.rsqrt %261 : vector<16x1xf32>
    %263 = vector.broadcast %262 : vector<16x1xf32> to vector<16x128xf32>
    %264 = arith.mulf %254, %263 : vector<16x128xf32>
    %265 = vector.broadcast %246 : vector<1x128xf32> to vector<16x128xf32>
    %266 = arith.mulf %264, %265 : vector<16x128xf32>
    %267 = vector.broadcast %248 : vector<1x128xf32> to vector<16x128xf32>
    %268 = arith.addf %266, %267 : vector<16x128xf32>
    %c1_115 = arith.constant 1 : index
    %c0_116 = arith.constant 0 : index
    %c0_117 = arith.constant 0 : index
    %269 = vector.load %arg3[%c1_115, %c0_116, %c0_117] : memref<2x128x384xf32, #tpu.memory_space<vmem>>, vector<1x128x384xf32>
    %270 = vector.shape_cast %269 : vector<1x128x384xf32> to vector<128x384xf32>
    %cst_118 = arith.constant dense<0.000000e+00> : vector<16x384xf32>
    %271 = tpu.matmul %268, %270, %cst_118 {dimension_numbers = #tpu.dot_dimension_numbers<[1], [0], [0], [1], [0, 0, 1, 1], [], []>} : vector<16x128xf32>, vector<128x384xf32>, vector<16x384xf32> -> vector<16x384xf32>
    %c1_119 = arith.constant 1 : index
    %c0_120 = arith.constant 0 : index
    %c0_121 = arith.constant 0 : index
    %272 = vector.load %arg4[%c1_119, %c0_120, %c0_121] : memref<2x1x384xf32, #tpu.memory_space<vmem>>, vector<1x1x384xf32>
    %273 = vector.shape_cast %272 : vector<1x1x384xf32> to vector<1x384xf32>
    %274 = vector.broadcast %273 : vector<1x384xf32> to vector<16x384xf32>
    %275 = arith.addf %271, %274 : vector<16x384xf32>
    %276 = vector.extract_strided_slice %275 {offsets = [0, 0], sizes = [8, 128], strides = [1, 1]} : vector<16x384xf32> to vector<8x128xf32>
    %277 = vector.extract_strided_slice %275 {offsets = [0, 128], sizes = [8, 128], strides = [1, 1]} : vector<16x384xf32> to vector<8x128xf32>
    %278 = vector.extract_strided_slice %275 {offsets = [0, 256], sizes = [8, 128], strides = [1, 1]} : vector<16x384xf32> to vector<8x128xf32>
    %279 = vector.extract_strided_slice %276 {offsets = [0, 0], sizes = [8, 32], strides = [1, 1]} : vector<8x128xf32> to vector<8x32xf32>
    %280 = vector.extract_strided_slice %277 {offsets = [0, 0], sizes = [8, 32], strides = [1, 1]} : vector<8x128xf32> to vector<8x32xf32>
    "tpu.trace_start"() <{level = 10 : i32, message = "qd,kd->qk"}> : () -> ()
    %cst_122 = arith.constant dense<0.000000e+00> : vector<8x8xf32>
    %281 = tpu.matmul %279, %280, %cst_122 {dimension_numbers = #tpu.dot_dimension_numbers<[1], [1], [0], [0], [0, 0, 1, 0], [], []>} : vector<8x32xf32>, vector<8x32xf32>, vector<8x8xf32> -> vector<8x8xf32>
    "tpu.trace_stop"() : () -> ()
    %282 = arith.addf %281, %3 : vector<8x8xf32>
    %cst_123 = arith.constant dense<0xFF800000> : vector<8xf32>
    %283 = vector.multi_reduction <maximumf>, %282, %cst_123 [1] : vector<8x8xf32> to vector<8xf32>
    %284 = vector.shape_cast %283 : vector<8xf32> to vector<8x1xf32>
    %285 = vector.broadcast %284 : vector<8x1xf32> to vector<8x8xf32>
    %286 = arith.subf %282, %285 : vector<8x8xf32>
    %287 = math.exp %286 : vector<8x8xf32>
    %cst_124 = arith.constant dense<0.000000e+00> : vector<8xf32>
    %288 = vector.multi_reduction <add>, %287, %cst_124 [1] : vector<8x8xf32> to vector<8xf32>
    %289 = vector.shape_cast %288 : vector<8xf32> to vector<8x1xf32>
    %290 = vector.extract_strided_slice %278 {offsets = [0, 0], sizes = [8, 32], strides = [1, 1]} : vector<8x128xf32> to vector<8x32xf32>
    %cst_125 = arith.constant dense<0.000000e+00> : vector<8x32xf32>
    %291 = tpu.matmul %287, %290, %cst_125 {dimension_numbers = #tpu.dot_dimension_numbers<[1], [0], [0], [1], [0, 0, 1, 1], [], []>} : vector<8x8xf32>, vector<8x32xf32>, vector<8x32xf32> -> vector<8x32xf32>
    %292 = tpu.reciprocal %289 {approx = true} : vector<8x1xf32> -> vector<8x1xf32>
    %293 = vector.broadcast %292 : vector<8x1xf32> to vector<8x32xf32>
    %294 = arith.mulf %291, %293 : vector<8x32xf32>
    %c0_126 = arith.constant 0 : index
    %c0_127 = arith.constant 0 : index
    %295 = vector.load %arg16[%c0_126, %c0_127] : memref<16x128xf32, #tpu.memory_space<vmem>>, vector<8x32xf32>
    tpu.vector_store %arg16[%c0_126, %c0_127], %294 {strides = array<i32>} : memref<16x128xf32, #tpu.memory_space<vmem>>, vector<8x32xf32>,
    %296 = vector.extract_strided_slice %276 {offsets = [0, 32], sizes = [8, 32], strides = [1, 1]} : vector<8x128xf32> to vector<8x32xf32>
    %297 = vector.extract_strided_slice %277 {offsets = [0, 32], sizes = [8, 32], strides = [1, 1]} : vector<8x128xf32> to vector<8x32xf32>
    "tpu.trace_start"() <{level = 10 : i32, message = "qd,kd->qk"}> : () -> ()
    %cst_128 = arith.constant dense<0.000000e+00> : vector<8x8xf32>
    %298 = tpu.matmul %296, %297, %cst_128 {dimension_numbers = #tpu.dot_dimension_numbers<[1], [1], [0], [0], [0, 0, 1, 0], [], []>} : vector<8x32xf32>, vector<8x32xf32>, vector<8x8xf32> -> vector<8x8xf32>
    "tpu.trace_stop"() : () -> ()
    %299 = arith.addf %298, %3 : vector<8x8xf32>
    %cst_129 = arith.constant dense<0xFF800000> : vector<8xf32>
    %300 = vector.multi_reduction <maximumf>, %299, %cst_129 [1] : vector<8x8xf32> to vector<8xf32>
    %301 = vector.shape_cast %300 : vector<8xf32> to vector<8x1xf32>
    %302 = vector.broadcast %301 : vector<8x1xf32> to vector<8x8xf32>
    %303 = arith.subf %299, %302 : vector<8x8xf32>
    %304 = math.exp %303 : vector<8x8xf32>
    %cst_130 = arith.constant dense<0.000000e+00> : vector<8xf32>
    %305 = vector.multi_reduction <add>, %304, %cst_130 [1] : vector<8x8xf32> to vector<8xf32>
    %306 = vector.shape_cast %305 : vector<8xf32> to vector<8x1xf32>
    %307 = vector.extract_strided_slice %278 {offsets = [0, 32], sizes = [8, 32], strides = [1, 1]} : vector<8x128xf32> to vector<8x32xf32>
    %cst_131 = arith.constant dense<0.000000e+00> : vector<8x32xf32>
    %308 = tpu.matmul %304, %307, %cst_131 {dimension_numbers = #tpu.dot_dimension_numbers<[1], [0], [0], [1], [0, 0, 1, 1], [], []>} : vector<8x8xf32>, vector<8x32xf32>, vector<8x32xf32> -> vector<8x32xf32>
    %309 = tpu.reciprocal %306 {approx = true} : vector<8x1xf32> -> vector<8x1xf32>
    %310 = vector.broadcast %309 : vector<8x1xf32> to vector<8x32xf32>
    %311 = arith.mulf %308, %310 : vector<8x32xf32>
    %c0_132 = arith.constant 0 : index
    %c32_133 = arith.constant 32 : index
    %312 = vector.load %arg16[%c0_132, %c32_133] : memref<16x128xf32, #tpu.memory_space<vmem>>, vector<8x32xf32>
    tpu.vector_store %arg16[%c0_132, %c32_133], %311 {strides = array<i32>} : memref<16x128xf32, #tpu.memory_space<vmem>>, vector<8x32xf32>,
    %313 = vector.extract_strided_slice %276 {offsets = [0, 64], sizes = [8, 32], strides = [1, 1]} : vector<8x128xf32> to vector<8x32xf32>
    %314 = vector.extract_strided_slice %277 {offsets = [0, 64], sizes = [8, 32], strides = [1, 1]} : vector<8x128xf32> to vector<8x32xf32>
    "tpu.trace_start"() <{level = 10 : i32, message = "qd,kd->qk"}> : () -> ()
    %cst_134 = arith.constant dense<0.000000e+00> : vector<8x8xf32>
    %315 = tpu.matmul %313, %314, %cst_134 {dimension_numbers = #tpu.dot_dimension_numbers<[1], [1], [0], [0], [0, 0, 1, 0], [], []>} : vector<8x32xf32>, vector<8x32xf32>, vector<8x8xf32> -> vector<8x8xf32>
    "tpu.trace_stop"() : () -> ()
    %316 = arith.addf %315, %3 : vector<8x8xf32>
    %cst_135 = arith.constant dense<0xFF800000> : vector<8xf32>
    %317 = vector.multi_reduction <maximumf>, %316, %cst_135 [1] : vector<8x8xf32> to vector<8xf32>
    %318 = vector.shape_cast %317 : vector<8xf32> to vector<8x1xf32>
    %319 = vector.broadcast %318 : vector<8x1xf32> to vector<8x8xf32>
    %320 = arith.subf %316, %319 : vector<8x8xf32>
    %321 = math.exp %320 : vector<8x8xf32>
    %cst_136 = arith.constant dense<0.000000e+00> : vector<8xf32>
    %322 = vector.multi_reduction <add>, %321, %cst_136 [1] : vector<8x8xf32> to vector<8xf32>
    %323 = vector.shape_cast %322 : vector<8xf32> to vector<8x1xf32>
    %324 = vector.extract_strided_slice %278 {offsets = [0, 64], sizes = [8, 32], strides = [1, 1]} : vector<8x128xf32> to vector<8x32xf32>
    %cst_137 = arith.constant dense<0.000000e+00> : vector<8x32xf32>
    %325 = tpu.matmul %321, %324, %cst_137 {dimension_numbers = #tpu.dot_dimension_numbers<[1], [0], [0], [1], [0, 0, 1, 1], [], []>} : vector<8x8xf32>, vector<8x32xf32>, vector<8x32xf32> -> vector<8x32xf32>
    %326 = tpu.reciprocal %323 {approx = true} : vector<8x1xf32> -> vector<8x1xf32>
    %327 = vector.broadcast %326 : vector<8x1xf32> to vector<8x32xf32>
    %328 = arith.mulf %325, %327 : vector<8x32xf32>
    %c0_138 = arith.constant 0 : index
    %c64_139 = arith.constant 64 : index
    %329 = vector.load %arg16[%c0_138, %c64_139] : memref<16x128xf32, #tpu.memory_space<vmem>>, vector<8x32xf32>
    tpu.vector_store %arg16[%c0_138, %c64_139], %328 {strides = array<i32>} : memref<16x128xf32, #tpu.memory_space<vmem>>, vector<8x32xf32>,
    %330 = vector.extract_strided_slice %276 {offsets = [0, 96], sizes = [8, 32], strides = [1, 1]} : vector<8x128xf32> to vector<8x32xf32>
    %331 = vector.extract_strided_slice %277 {offsets = [0, 96], sizes = [8, 32], strides = [1, 1]} : vector<8x128xf32> to vector<8x32xf32>
    "tpu.trace_start"() <{level = 10 : i32, message = "qd,kd->qk"}> : () -> ()
    %cst_140 = arith.constant dense<0.000000e+00> : vector<8x8xf32>
    %332 = tpu.matmul %330, %331, %cst_140 {dimension_numbers = #tpu.dot_dimension_numbers<[1], [1], [0], [0], [0, 0, 1, 0], [], []>} : vector<8x32xf32>, vector<8x32xf32>, vector<8x8xf32> -> vector<8x8xf32>
    "tpu.trace_stop"() : () -> ()
    %333 = arith.addf %332, %3 : vector<8x8xf32>
    %cst_141 = arith.constant dense<0xFF800000> : vector<8xf32>
    %334 = vector.multi_reduction <maximumf>, %333, %cst_141 [1] : vector<8x8xf32> to vector<8xf32>
    %335 = vector.shape_cast %334 : vector<8xf32> to vector<8x1xf32>
    %336 = vector.broadcast %335 : vector<8x1xf32> to vector<8x8xf32>
    %337 = arith.subf %333, %336 : vector<8x8xf32>
    %338 = math.exp %337 : vector<8x8xf32>
    %cst_142 = arith.constant dense<0.000000e+00> : vector<8xf32>
    %339 = vector.multi_reduction <add>, %338, %cst_142 [1] : vector<8x8xf32> to vector<8xf32>
    %340 = vector.shape_cast %339 : vector<8xf32> to vector<8x1xf32>
    %341 = vector.extract_strided_slice %278 {offsets = [0, 96], sizes = [8, 32], strides = [1, 1]} : vector<8x128xf32> to vector<8x32xf32>
    %cst_143 = arith.constant dense<0.000000e+00> : vector<8x32xf32>
    %342 = tpu.matmul %338, %341, %cst_143 {dimension_numbers = #tpu.dot_dimension_numbers<[1], [0], [0], [1], [0, 0, 1, 1], [], []>} : vector<8x8xf32>, vector<8x32xf32>, vector<8x32xf32> -> vector<8x32xf32>
    %343 = tpu.reciprocal %340 {approx = true} : vector<8x1xf32> -> vector<8x1xf32>
    %344 = vector.broadcast %343 : vector<8x1xf32> to vector<8x32xf32>
    %345 = arith.mulf %342, %344 : vector<8x32xf32>
    %c0_144 = arith.constant 0 : index
    %c96_145 = arith.constant 96 : index
    %346 = vector.load %arg16[%c0_144, %c96_145] : memref<16x128xf32, #tpu.memory_space<vmem>>, vector<8x32xf32>
    tpu.vector_store %arg16[%c0_144, %c96_145], %345 {strides = array<i32>} : memref<16x128xf32, #tpu.memory_space<vmem>>, vector<8x32xf32>,
    %347 = vector.extract_strided_slice %275 {offsets = [8, 0], sizes = [8, 128], strides = [1, 1]} : vector<16x384xf32> to vector<8x128xf32>
    %348 = vector.extract_strided_slice %275 {offsets = [8, 128], sizes = [8, 128], strides = [1, 1]} : vector<16x384xf32> to vector<8x128xf32>
    %349 = vector.extract_strided_slice %275 {offsets = [8, 256], sizes = [8, 128], strides = [1, 1]} : vector<16x384xf32> to vector<8x128xf32>
    %350 = vector.extract_strided_slice %347 {offsets = [0, 0], sizes = [8, 32], strides = [1, 1]} : vector<8x128xf32> to vector<8x32xf32>
    %351 = vector.extract_strided_slice %348 {offsets = [0, 0], sizes = [8, 32], strides = [1, 1]} : vector<8x128xf32> to vector<8x32xf32>
    "tpu.trace_start"() <{level = 10 : i32, message = "qd,kd->qk"}> : () -> ()
    %cst_146 = arith.constant dense<0.000000e+00> : vector<8x8xf32>
    %352 = tpu.matmul %350, %351, %cst_146 {dimension_numbers = #tpu.dot_dimension_numbers<[1], [1], [0], [0], [0, 0, 1, 0], [], []>} : vector<8x32xf32>, vector<8x32xf32>, vector<8x8xf32> -> vector<8x8xf32>
    "tpu.trace_stop"() : () -> ()
    %353 = arith.addf %352, %7 : vector<8x8xf32>
    %cst_147 = arith.constant dense<0xFF800000> : vector<8xf32>
    %354 = vector.multi_reduction <maximumf>, %353, %cst_147 [1] : vector<8x8xf32> to vector<8xf32>
    %355 = vector.shape_cast %354 : vector<8xf32> to vector<8x1xf32>
    %356 = vector.broadcast %355 : vector<8x1xf32> to vector<8x8xf32>
    %357 = arith.subf %353, %356 : vector<8x8xf32>
    %358 = math.exp %357 : vector<8x8xf32>
    %cst_148 = arith.constant dense<0.000000e+00> : vector<8xf32>
    %359 = vector.multi_reduction <add>, %358, %cst_148 [1] : vector<8x8xf32> to vector<8xf32>
    %360 = vector.shape_cast %359 : vector<8xf32> to vector<8x1xf32>
    %361 = vector.extract_strided_slice %349 {offsets = [0, 0], sizes = [8, 32], strides = [1, 1]} : vector<8x128xf32> to vector<8x32xf32>
    %cst_149 = arith.constant dense<0.000000e+00> : vector<8x32xf32>
    %362 = tpu.matmul %358, %361, %cst_149 {dimension_numbers = #tpu.dot_dimension_numbers<[1], [0], [0], [1], [0, 0, 1, 1], [], []>} : vector<8x8xf32>, vector<8x32xf32>, vector<8x32xf32> -> vector<8x32xf32>
    %363 = tpu.reciprocal %360 {approx = true} : vector<8x1xf32> -> vector<8x1xf32>
    %364 = vector.broadcast %363 : vector<8x1xf32> to vector<8x32xf32>
    %365 = arith.mulf %362, %364 : vector<8x32xf32>
    %c8_150 = arith.constant 8 : index
    %c0_151 = arith.constant 0 : index
    %366 = vector.load %arg16[%c8_150, %c0_151] : memref<16x128xf32, #tpu.memory_space<vmem>>, vector<8x32xf32>
    tpu.vector_store %arg16[%c8_150, %c0_151], %365 {strides = array<i32>} : memref<16x128xf32, #tpu.memory_space<vmem>>, vector<8x32xf32>,
    %367 = vector.extract_strided_slice %347 {offsets = [0, 32], sizes = [8, 32], strides = [1, 1]} : vector<8x128xf32> to vector<8x32xf32>
    %368 = vector.extract_strided_slice %348 {offsets = [0, 32], sizes = [8, 32], strides = [1, 1]} : vector<8x128xf32> to vector<8x32xf32>
    "tpu.trace_start"() <{level = 10 : i32, message = "qd,kd->qk"}> : () -> ()
    %cst_152 = arith.constant dense<0.000000e+00> : vector<8x8xf32>
    %369 = tpu.matmul %367, %368, %cst_152 {dimension_numbers = #tpu.dot_dimension_numbers<[1], [1], [0], [0], [0, 0, 1, 0], [], []>} : vector<8x32xf32>, vector<8x32xf32>, vector<8x8xf32> -> vector<8x8xf32>
    "tpu.trace_stop"() : () -> ()
    %370 = arith.addf %369, %7 : vector<8x8xf32>
    %cst_153 = arith.constant dense<0xFF800000> : vector<8xf32>
    %371 = vector.multi_reduction <maximumf>, %370, %cst_153 [1] : vector<8x8xf32> to vector<8xf32>
    %372 = vector.shape_cast %371 : vector<8xf32> to vector<8x1xf32>
    %373 = vector.broadcast %372 : vector<8x1xf32> to vector<8x8xf32>
    %374 = arith.subf %370, %373 : vector<8x8xf32>
    %375 = math.exp %374 : vector<8x8xf32>
    %cst_154 = arith.constant dense<0.000000e+00> : vector<8xf32>
    %376 = vector.multi_reduction <add>, %375, %cst_154 [1] : vector<8x8xf32> to vector<8xf32>
    %377 = vector.shape_cast %376 : vector<8xf32> to vector<8x1xf32>
    %378 = vector.extract_strided_slice %349 {offsets = [0, 32], sizes = [8, 32], strides = [1, 1]} : vector<8x128xf32> to vector<8x32xf32>
    %cst_155 = arith.constant dense<0.000000e+00> : vector<8x32xf32>
    %379 = tpu.matmul %375, %378, %cst_155 {dimension_numbers = #tpu.dot_dimension_numbers<[1], [0], [0], [1], [0, 0, 1, 1], [], []>} : vector<8x8xf32>, vector<8x32xf32>, vector<8x32xf32> -> vector<8x32xf32>
    %380 = tpu.reciprocal %377 {approx = true} : vector<8x1xf32> -> vector<8x1xf32>
    %381 = vector.broadcast %380 : vector<8x1xf32> to vector<8x32xf32>
    %382 = arith.mulf %379, %381 : vector<8x32xf32>
    %c8_156 = arith.constant 8 : index
    %c32_157 = arith.constant 32 : index
    %383 = vector.load %arg16[%c8_156, %c32_157] : memref<16x128xf32, #tpu.memory_space<vmem>>, vector<8x32xf32>
    tpu.vector_store %arg16[%c8_156, %c32_157], %382 {strides = array<i32>} : memref<16x128xf32, #tpu.memory_space<vmem>>, vector<8x32xf32>,
    %384 = vector.extract_strided_slice %347 {offsets = [0, 64], sizes = [8, 32], strides = [1, 1]} : vector<8x128xf32> to vector<8x32xf32>
    %385 = vector.extract_strided_slice %348 {offsets = [0, 64], sizes = [8, 32], strides = [1, 1]} : vector<8x128xf32> to vector<8x32xf32>
    "tpu.trace_start"() <{level = 10 : i32, message = "qd,kd->qk"}> : () -> ()
    %cst_158 = arith.constant dense<0.000000e+00> : vector<8x8xf32>
    %386 = tpu.matmul %384, %385, %cst_158 {dimension_numbers = #tpu.dot_dimension_numbers<[1], [1], [0], [0], [0, 0, 1, 0], [], []>} : vector<8x32xf32>, vector<8x32xf32>, vector<8x8xf32> -> vector<8x8xf32>
    "tpu.trace_stop"() : () -> ()
    %387 = arith.addf %386, %7 : vector<8x8xf32>
    %cst_159 = arith.constant dense<0xFF800000> : vector<8xf32>
    %388 = vector.multi_reduction <maximumf>, %387, %cst_159 [1] : vector<8x8xf32> to vector<8xf32>
    %389 = vector.shape_cast %388 : vector<8xf32> to vector<8x1xf32>
    %390 = vector.broadcast %389 : vector<8x1xf32> to vector<8x8xf32>
    %391 = arith.subf %387, %390 : vector<8x8xf32>
    %392 = math.exp %391 : vector<8x8xf32>
    %cst_160 = arith.constant dense<0.000000e+00> : vector<8xf32>
    %393 = vector.multi_reduction <add>, %392, %cst_160 [1] : vector<8x8xf32> to vector<8xf32>
    %394 = vector.shape_cast %393 : vector<8xf32> to vector<8x1xf32>
    %395 = vector.extract_strided_slice %349 {offsets = [0, 64], sizes = [8, 32], strides = [1, 1]} : vector<8x128xf32> to vector<8x32xf32>
    %cst_161 = arith.constant dense<0.000000e+00> : vector<8x32xf32>
    %396 = tpu.matmul %392, %395, %cst_161 {dimension_numbers = #tpu.dot_dimension_numbers<[1], [0], [0], [1], [0, 0, 1, 1], [], []>} : vector<8x8xf32>, vector<8x32xf32>, vector<8x32xf32> -> vector<8x32xf32>
    %397 = tpu.reciprocal %394 {approx = true} : vector<8x1xf32> -> vector<8x1xf32>
    %398 = vector.broadcast %397 : vector<8x1xf32> to vector<8x32xf32>
    %399 = arith.mulf %396, %398 : vector<8x32xf32>
    %c8_162 = arith.constant 8 : index
    %c64_163 = arith.constant 64 : index
    %400 = vector.load %arg16[%c8_162, %c64_163] : memref<16x128xf32, #tpu.memory_space<vmem>>, vector<8x32xf32>
    tpu.vector_store %arg16[%c8_162, %c64_163], %399 {strides = array<i32>} : memref<16x128xf32, #tpu.memory_space<vmem>>, vector<8x32xf32>,
    %401 = vector.extract_strided_slice %347 {offsets = [0, 96], sizes = [8, 32], strides = [1, 1]} : vector<8x128xf32> to vector<8x32xf32>
    %402 = vector.extract_strided_slice %348 {offsets = [0, 96], sizes = [8, 32], strides = [1, 1]} : vector<8x128xf32> to vector<8x32xf32>
    "tpu.trace_start"() <{level = 10 : i32, message = "qd,kd->qk"}> : () -> ()
    %cst_164 = arith.constant dense<0.000000e+00> : vector<8x8xf32>
    %403 = tpu.matmul %401, %402, %cst_164 {dimension_numbers = #tpu.dot_dimension_numbers<[1], [1], [0], [0], [0, 0, 1, 0], [], []>} : vector<8x32xf32>, vector<8x32xf32>, vector<8x8xf32> -> vector<8x8xf32>
    "tpu.trace_stop"() : () -> ()
    %404 = arith.addf %403, %7 : vector<8x8xf32>
    %cst_165 = arith.constant dense<0xFF800000> : vector<8xf32>
    %405 = vector.multi_reduction <maximumf>, %404, %cst_165 [1] : vector<8x8xf32> to vector<8xf32>
    %406 = vector.shape_cast %405 : vector<8xf32> to vector<8x1xf32>
    %407 = vector.broadcast %406 : vector<8x1xf32> to vector<8x8xf32>
    %408 = arith.subf %404, %407 : vector<8x8xf32>
    %409 = math.exp %408 : vector<8x8xf32>
    %cst_166 = arith.constant dense<0.000000e+00> : vector<8xf32>
    %410 = vector.multi_reduction <add>, %409, %cst_166 [1] : vector<8x8xf32> to vector<8xf32>
    %411 = vector.shape_cast %410 : vector<8xf32> to vector<8x1xf32>
    %412 = vector.extract_strided_slice %349 {offsets = [0, 96], sizes = [8, 32], strides = [1, 1]} : vector<8x128xf32> to vector<8x32xf32>
    %cst_167 = arith.constant dense<0.000000e+00> : vector<8x32xf32>
    %413 = tpu.matmul %409, %412, %cst_167 {dimension_numbers = #tpu.dot_dimension_numbers<[1], [0], [0], [1], [0, 0, 1, 1], [], []>} : vector<8x8xf32>, vector<8x32xf32>, vector<8x32xf32> -> vector<8x32xf32>
    %414 = tpu.reciprocal %411 {approx = true} : vector<8x1xf32> -> vector<8x1xf32>
    %415 = vector.broadcast %414 : vector<8x1xf32> to vector<8x32xf32>
    %416 = arith.mulf %413, %415 : vector<8x32xf32>
    %c8_168 = arith.constant 8 : index
    %c96_169 = arith.constant 96 : index
    %417 = vector.load %arg16[%c8_168, %c96_169] : memref<16x128xf32, #tpu.memory_space<vmem>>, vector<8x32xf32>
    tpu.vector_store %arg16[%c8_168, %c96_169], %416 {strides = array<i32>} : memref<16x128xf32, #tpu.memory_space<vmem>>, vector<8x32xf32>,
    %c0_170 = arith.constant 0 : index
    %c0_171 = arith.constant 0 : index
    %418 = vector.load %arg16[%c0_170, %c0_171] : memref<16x128xf32, #tpu.memory_space<vmem>>, vector<16x128xf32>
    %c1_172 = arith.constant 1 : index
    %c0_173 = arith.constant 0 : index
    %c0_174 = arith.constant 0 : index
    %419 = vector.load %arg5[%c1_172, %c0_173, %c0_174] : memref<2x128x128xf32, #tpu.memory_space<vmem>>, vector<1x128x128xf32>
    %420 = vector.shape_cast %419 : vector<1x128x128xf32> to vector<128x128xf32>
    %cst_175 = arith.constant dense<0.000000e+00> : vector<16x128xf32>
    %421 = tpu.matmul %418, %420, %cst_175 {dimension_numbers = #tpu.dot_dimension_numbers<[1], [0], [0], [1], [0, 0, 1, 1], [], []>} : vector<16x128xf32>, vector<128x128xf32>, vector<16x128xf32> -> vector<16x128xf32>
    %c1_176 = arith.constant 1 : index
    %c0_177 = arith.constant 0 : index
    %c0_178 = arith.constant 0 : index
    %422 = vector.load %arg6[%c1_176, %c0_177, %c0_178] : memref<2x1x128xf32, #tpu.memory_space<vmem>>, vector<1x1x128xf32>
    %423 = vector.shape_cast %422 : vector<1x1x128xf32> to vector<1x128xf32>
    %424 = vector.broadcast %423 : vector<1x128xf32> to vector<16x128xf32>
    %425 = arith.addf %421, %424 : vector<16x128xf32>
    %426 = arith.addf %425, %268 : vector<16x128xf32>
    %c1_179 = arith.constant 1 : index
    %c0_180 = arith.constant 0 : index
    %c0_181 = arith.constant 0 : index
    %427 = vector.load %arg7[%c1_179, %c0_180, %c0_181] : memref<2x1x128xf32, #tpu.memory_space<vmem>>, vector<1x1x128xf32>
    %428 = vector.shape_cast %427 : vector<1x1x128xf32> to vector<1x128xf32>
    %c1_182 = arith.constant 1 : index
    %c0_183 = arith.constant 0 : index
    %c0_184 = arith.constant 0 : index
    %429 = vector.load %arg8[%c1_182, %c0_183, %c0_184] : memref<2x1x128xf32, #tpu.memory_space<vmem>>, vector<1x1x128xf32>
    %430 = vector.shape_cast %429 : vector<1x1x128xf32> to vector<1x128xf32>
    %cst_185 = arith.constant dense<0.000000e+00> : vector<16xf32>
    %431 = vector.multi_reduction <add>, %426, %cst_185 [1] : vector<16x128xf32> to vector<16xf32>
    %432 = vector.shape_cast %431 : vector<16xf32> to vector<16x1xf32>
    %cst_186 = arith.constant 1.280000e+02 : f32
    %433 = vector.broadcast %cst_186 : f32 to vector<16x1xf32>
    %434 = arith.divf %432, %433 : vector<16x1xf32>
    %435 = vector.broadcast %434 : vector<16x1xf32> to vector<16x128xf32>
    %436 = arith.subf %426, %435 : vector<16x128xf32>
    %437 = arith.mulf %436, %436 : vector<16x128xf32>
    %cst_187 = arith.constant dense<0.000000e+00> : vector<16xf32>
    %438 = vector.multi_reduction <add>, %437, %cst_187 [1] : vector<16x128xf32> to vector<16xf32>
    %439 = vector.shape_cast %438 : vector<16xf32> to vector<16x1xf32>
    %cst_188 = arith.constant 1.280000e+02 : f32
    %440 = vector.broadcast %cst_188 : f32 to vector<16x1xf32>
    %441 = arith.divf %439, %440 : vector<16x1xf32>
    %cst_189 = arith.constant 9.99999974E-6 : f32
    %442 = vector.broadcast %cst_189 : f32 to vector<16x1xf32>
    %443 = arith.addf %441, %442 : vector<16x1xf32>
    %444 = math.rsqrt %443 : vector<16x1xf32>
    %445 = vector.broadcast %444 : vector<16x1xf32> to vector<16x128xf32>
    %446 = arith.mulf %436, %445 : vector<16x128xf32>
    %447 = vector.broadcast %428 : vector<1x128xf32> to vector<16x128xf32>
    %448 = arith.mulf %446, %447 : vector<16x128xf32>
    %449 = vector.broadcast %430 : vector<1x128xf32> to vector<16x128xf32>
    %450 = arith.addf %448, %449 : vector<16x128xf32>
    %c1_190 = arith.constant 1 : index
    %c0_191 = arith.constant 0 : index
    %c0_192 = arith.constant 0 : index
    %451 = vector.load %arg9[%c1_190, %c0_191, %c0_192] : memref<2x128x256xf32, #tpu.memory_space<vmem>>, vector<1x128x256xf32>
    %452 = vector.shape_cast %451 : vector<1x128x256xf32> to vector<128x256xf32>
    %cst_193 = arith.constant dense<0.000000e+00> : vector<16x256xf32>
    %453 = tpu.matmul %450, %452, %cst_193 {dimension_numbers = #tpu.dot_dimension_numbers<[1], [0], [0], [1], [0, 0, 1, 1], [], []>} : vector<16x128xf32>, vector<128x256xf32>, vector<16x256xf32> -> vector<16x256xf32>
    %c1_194 = arith.constant 1 : index
    %c0_195 = arith.constant 0 : index
    %c0_196 = arith.constant 0 : index
    %454 = vector.load %arg10[%c1_194, %c0_195, %c0_196] : memref<2x1x256xf32, #tpu.memory_space<vmem>>, vector<1x1x256xf32>
    %455 = vector.shape_cast %454 : vector<1x1x256xf32> to vector<1x256xf32>
    %456 = vector.broadcast %455 : vector<1x256xf32> to vector<16x256xf32>
    %457 = arith.addf %453, %456 : vector<16x256xf32>
    %cst_197 = arith.constant 5.000000e-01 : f32
    %458 = vector.broadcast %cst_197 : f32 to vector<16x256xf32>
    %459 = arith.mulf %457, %458 : vector<16x256xf32>
    %cst_198 = arith.constant 0.707106769 : f32
    %460 = vector.broadcast %cst_198 : f32 to vector<16x256xf32>
    %461 = arith.mulf %457, %460 : vector<16x256xf32>
    %462 = math.absf %461 : vector<16x256xf32>
    %cst_199 = arith.constant 0.327591091 : f32
    %463 = vector.broadcast %cst_199 : f32 to vector<16x256xf32>
    %464 = arith.mulf %463, %462 : vector<16x256xf32>
    %cst_200 = arith.constant 1.000000e+00 : f32
    %465 = vector.broadcast %cst_200 : f32 to vector<16x256xf32>
    %466 = arith.addf %465, %464 : vector<16x256xf32>
    %467 = tpu.reciprocal %466 {approx = true} : vector<16x256xf32> -> vector<16x256xf32>
    %cst_201 = arith.constant 1.06140542 : f32
    %468 = vector.broadcast %cst_201 : f32 to vector<16x256xf32>
    %469 = arith.mulf %468, %467 : vector<16x256xf32>
    %cst_202 = arith.constant -1.45315206 : f32
    %470 = vector.broadcast %cst_202 : f32 to vector<16x256xf32>
    %471 = arith.addf %469, %470 : vector<16x256xf32>
    %472 = arith.mulf %471, %467 : vector<16x256xf32>
    %cst_203 = arith.constant 1.42141378 : f32
    %473 = vector.broadcast %cst_203 : f32 to vector<16x256xf32>
    %474 = arith.addf %472, %473 : vector<16x256xf32>
    %475 = arith.mulf %474, %467 : vector<16x256xf32>
    %cst_204 = arith.constant -0.284496725 : f32
    %476 = vector.broadcast %cst_204 : f32 to vector<16x256xf32>
    %477 = arith.addf %475, %476 : vector<16x256xf32>
    %478 = arith.mulf %477, %467 : vector<16x256xf32>
    %cst_205 = arith.constant 0.254829586 : f32
    %479 = vector.broadcast %cst_205 : f32 to vector<16x256xf32>
    %480 = arith.addf %478, %479 : vector<16x256xf32>
    %481 = arith.mulf %480, %467 : vector<16x256xf32>
    %cst_206 = arith.constant 0.000000e+00 : f32
    %482 = vector.broadcast %cst_206 : f32 to vector<16x256xf32>
    %483 = arith.subf %482, %462 : vector<16x256xf32>
    %484 = arith.mulf %483, %462 : vector<16x256xf32>
    %485 = math.exp %484 : vector<16x256xf32>
    %486 = arith.mulf %481, %485 : vector<16x256xf32>
    %cst_207 = arith.constant 1.000000e+00 : f32
    %487 = vector.broadcast %cst_207 : f32 to vector<16x256xf32>
    %488 = arith.subf %487, %486 : vector<16x256xf32>
    %cst_208 = arith.constant 0.000000e+00 : f32
    %489 = vector.broadcast %cst_208 : f32 to vector<16x256xf32>
    %490 = arith.cmpf oge, %461, %489 : vector<16x256xf32>
    %cst_209 = arith.constant 0.000000e+00 : f32
    %491 = vector.broadcast %cst_209 : f32 to vector<16x256xf32>
    %492 = arith.subf %491, %488 : vector<16x256xf32>
    %493 = arith.select %490, %488, %492 : vector<16x256xi1>, vector<16x256xf32>
    %cst_210 = arith.constant 1.000000e+00 : f32
    %494 = vector.broadcast %cst_210 : f32 to vector<16x256xf32>
    %495 = arith.addf %494, %493 : vector<16x256xf32>
    %496 = arith.mulf %459, %495 : vector<16x256xf32>
    %c1_211 = arith.constant 1 : index
    %c0_212 = arith.constant 0 : index
    %c0_213 = arith.constant 0 : index
    %497 = vector.load %arg11[%c1_211, %c0_212, %c0_213] : memref<2x256x128xf32, #tpu.memory_space<vmem>>, vector<1x256x128xf32>
    %498 = vector.shape_cast %497 : vector<1x256x128xf32> to vector<256x128xf32>
    %cst_214 = arith.constant dense<0.000000e+00> : vector<16x128xf32>
    %499 = tpu.matmul %496, %498, %cst_214 {dimension_numbers = #tpu.dot_dimension_numbers<[1], [0], [0], [1], [0, 0, 1, 1], [], []>} : vector<16x256xf32>, vector<256x128xf32>, vector<16x128xf32> -> vector<16x128xf32>
    %c1_215 = arith.constant 1 : index
    %c0_216 = arith.constant 0 : index
    %c0_217 = arith.constant 0 : index
    %500 = vector.load %arg12[%c1_215, %c0_216, %c0_217] : memref<2x1x128xf32, #tpu.memory_space<vmem>>, vector<1x1x128xf32>
    %501 = vector.shape_cast %500 : vector<1x1x128xf32> to vector<1x128xf32>
    %502 = vector.broadcast %501 : vector<1x128xf32> to vector<16x128xf32>
    %503 = arith.addf %499, %502 : vector<16x128xf32>
    %504 = arith.addf %503, %450 : vector<16x128xf32>
    %c1_218 = arith.constant 1 : index
    %c0_219 = arith.constant 0 : index
    %c0_220 = arith.constant 0 : index
    %505 = vector.load %arg13[%c1_218, %c0_219, %c0_220] : memref<2x1x128xf32, #tpu.memory_space<vmem>>, vector<1x1x128xf32>
    %506 = vector.shape_cast %505 : vector<1x1x128xf32> to vector<1x128xf32>
    %c1_221 = arith.constant 1 : index
    %c0_222 = arith.constant 0 : index
    %c0_223 = arith.constant 0 : index
    %507 = vector.load %arg14[%c1_221, %c0_222, %c0_223] : memref<2x1x128xf32, #tpu.memory_space<vmem>>, vector<1x1x128xf32>
    %508 = vector.shape_cast %507 : vector<1x1x128xf32> to vector<1x128xf32>
    %cst_224 = arith.constant dense<0.000000e+00> : vector<16xf32>
    %509 = vector.multi_reduction <add>, %504, %cst_224 [1] : vector<16x128xf32> to vector<16xf32>
    %510 = vector.shape_cast %509 : vector<16xf32> to vector<16x1xf32>
    %cst_225 = arith.constant 1.280000e+02 : f32
    %511 = vector.broadcast %cst_225 : f32 to vector<16x1xf32>
    %512 = arith.divf %510, %511 : vector<16x1xf32>
    %513 = vector.broadcast %512 : vector<16x1xf32> to vector<16x128xf32>
    %514 = arith.subf %504, %513 : vector<16x128xf32>
    %515 = arith.mulf %514, %514 : vector<16x128xf32>
    %cst_226 = arith.constant dense<0.000000e+00> : vector<16xf32>
    %516 = vector.multi_reduction <add>, %515, %cst_226 [1] : vector<16x128xf32> to vector<16xf32>
    %517 = vector.shape_cast %516 : vector<16xf32> to vector<16x1xf32>
    %cst_227 = arith.constant 1.280000e+02 : f32
    %518 = vector.broadcast %cst_227 : f32 to vector<16x1xf32>
    %519 = arith.divf %517, %518 : vector<16x1xf32>
    %cst_228 = arith.constant 9.99999974E-6 : f32
    %520 = vector.broadcast %cst_228 : f32 to vector<16x1xf32>
    %521 = arith.addf %519, %520 : vector<16x1xf32>
    %522 = math.rsqrt %521 : vector<16x1xf32>
    %523 = vector.broadcast %522 : vector<16x1xf32> to vector<16x128xf32>
    %524 = arith.mulf %514, %523 : vector<16x128xf32>
    %525 = vector.broadcast %506 : vector<1x128xf32> to vector<16x128xf32>
    %526 = arith.mulf %524, %525 : vector<16x128xf32>
    %527 = vector.broadcast %508 : vector<1x128xf32> to vector<16x128xf32>
    %528 = arith.addf %526, %527 : vector<16x128xf32>
    %c0_229 = arith.constant 0 : index
    %c0_230 = arith.constant 0 : index
    %529 = vector.load %arg15[%c0_229, %c0_230] : memref<16x128xf32, #tpu.memory_space<vmem>>, vector<16x128xf32>
    tpu.vector_store %arg15[%c0_229, %c0_230], %528 {strides = array<i32>} : memref<16x128xf32, #tpu.memory_space<vmem>>, vector<16x128xf32>,
    return
  }
  func.func @transform_0(%arg0: i32) -> (i32, i32) {
    %c0_i32 = arith.constant 0 : i32
    %c0_i32_0 = arith.constant 0 : i32
    return %arg0, %c0_i32 : i32, i32
  }
  func.func @transform_1(%arg0: i32) -> (i32, i32, i32) {
    %c0_i32 = arith.constant 0 : i32
    %c0_i32_0 = arith.constant 0 : i32
    %c0_i32_1 = arith.constant 0 : i32
    return %arg0, %c0_i32, %c0_i32_0 : i32, i32, i32
  }
  func.func @transform_2(%arg0: i32) -> (i32, i32, i32) {
    %c0_i32 = arith.constant 0 : i32
    %c0_i32_0 = arith.constant 0 : i32
    %c0_i32_1 = arith.constant 0 : i32
    %c0_i32_2 = arith.constant 0 : i32
    return %c0_i32, %c0_i32_0, %c0_i32_1 : i32, i32, i32
  }
  func.func @transform_3(%arg0: i32) -> (i32, i32, i32) {
    %c0_i32 = arith.constant 0 : i32
    %c0_i32_0 = arith.constant 0 : i32
    %c0_i32_1 = arith.constant 0 : i32
    %c0_i32_2 = arith.constant 0 : i32
    return %c0_i32, %c0_i32_0, %c0_i32_1 : i32, i32, i32
  }
  func.func @transform_4(%arg0: i32) -> (i32, i32, i32) {
    %c0_i32 = arith.constant 0 : i32
    %c0_i32_0 = arith.constant 0 : i32
    %c0_i32_1 = arith.constant 0 : i32
    %c0_i32_2 = arith.constant 0 : i32
    return %c0_i32, %c0_i32_0, %c0_i32_1 : i32, i32, i32
  }
  func.func @transform_5(%arg0: i32) -> (i32, i32, i32) {
    %c0_i32 = arith.constant 0 : i32
    %c0_i32_0 = arith.constant 0 : i32
    %c0_i32_1 = arith.constant 0 : i32
    %c0_i32_2 = arith.constant 0 : i32
    return %c0_i32, %c0_i32_0, %c0_i32_1 : i32, i32, i32
  }
  func.func @transform_6(%arg0: i32) -> (i32, i32, i32) {
    %c0_i32 = arith.constant 0 : i32
    %c0_i32_0 = arith.constant 0 : i32
    %c0_i32_1 = arith.constant 0 : i32
    %c0_i32_2 = arith.constant 0 : i32
    return %c0_i32, %c0_i32_0, %c0_i32_1 : i32, i32, i32
  }
  func.func @transform_7(%arg0: i32) -> (i32, i32, i32) {
    %c0_i32 = arith.constant 0 : i32
    %c0_i32_0 = arith.constant 0 : i32
    %c0_i32_1 = arith.constant 0 : i32
    %c0_i32_2 = arith.constant 0 : i32
    return %c0_i32, %c0_i32_0, %c0_i32_1 : i32, i32, i32
  }
  func.func @transform_8(%arg0: i32) -> (i32, i32, i32) {
    %c0_i32 = arith.constant 0 : i32
    %c0_i32_0 = arith.constant 0 : i32
    %c0_i32_1 = arith.constant 0 : i32
    %c0_i32_2 = arith.constant 0 : i32
    return %c0_i32, %c0_i32_0, %c0_i32_1 : i32, i32, i32
  }
  func.func @transform_9(%arg0: i32) -> (i32, i32, i32) {
    %c0_i32 = arith.constant 0 : i32
    %c0_i32_0 = arith.constant 0 : i32
    %c0_i32_1 = arith.constant 0 : i32
    %c0_i32_2 = arith.constant 0 : i32
    return %c0_i32, %c0_i32_0, %c0_i32_1 : i32, i32, i32
  }
  func.func @transform_10(%arg0: i32) -> (i32, i32, i32) {
    %c0_i32 = arith.constant 0 : i32
    %c0_i32_0 = arith.constant 0 : i32
    %c0_i32_1 = arith.constant 0 : i32
    %c0_i32_2 = arith.constant 0 : i32
    return %c0_i32, %c0_i32_0, %c0_i32_1 : i32, i32, i32
  }
  func.func @transform_11(%arg0: i32) -> (i32, i32, i32) {
    %c0_i32 = arith.constant 0 : i32
    %c0_i32_0 = arith.constant 0 : i32
    %c0_i32_1 = arith.constant 0 : i32
    %c0_i32_2 = arith.constant 0 : i32
    return %c0_i32, %c0_i32_0, %c0_i32_1 : i32, i32, i32
  }
  func.func @transform_12(%arg0: i32) -> (i32, i32, i32) {
    %c0_i32 = arith.constant 0 : i32
    %c0_i32_0 = arith.constant 0 : i32
    %c0_i32_1 = arith.constant 0 : i32
    %c0_i32_2 = arith.constant 0 : i32
    return %c0_i32, %c0_i32_0, %c0_i32_1 : i32, i32, i32
  }
  func.func @transform_13(%arg0: i32) -> (i32, i32, i32) {
    %c0_i32 = arith.constant 0 : i32
    %c0_i32_0 = arith.constant 0 : i32
    %c0_i32_1 = arith.constant 0 : i32
    %c0_i32_2 = arith.constant 0 : i32
    return %c0_i32, %c0_i32_0, %c0_i32_1 : i32, i32, i32
  }
  func.func @transform_14(%arg0: i32) -> (i32, i32) {
    %c0_i32 = arith.constant 0 : i32
    %c0_i32_0 = arith.constant 0 : i32
    return %arg0, %c0_i32 : i32, i32
  }
}

</mosaic_0001>

<bundles_post_ra>
// kernel: tpu_custom_call.1
= control target key start
LH: loop header
LB: loop body
LE: loop exit
PB: predicated region body
PF: predicated region fallthrough
CT: control target
= control target key end

     0   :  { %19 = vsyncpa [#allocation4], 0  ;;  %s3416_s0 = inlined_call_operand.hbm [shape: f32[16,128], index: 0, kind: input, shape index: {}]   ;;  %s3417_s1 = inlined_call_operand.hbm [shape: f32[2,1,8], index: 1, kind: input, shape index: {}]   ;;  %s3418_s2 = inlined_call_operand.hbm [shape: f32[2,128,384], index: 2, kind: input, shape index: {}]   ;;  %s3419_s3 = inlined_call_operand.hbm [shape: f32[2,1,384], index: 3, kind: input, shape index: {}]   ;;  %s3420_s4 = inlined_call_operand.hbm [shape: f32[2,128,128], index: 4, kind: input, shape index: {}]   ;;  %s3421_s5 = inlined_call_operand.vmem [shape: f32[2,1,128], index: 5, kind: input, shape index: {}]   ;;  %s3422_s6 = inlined_call_operand.hbm [shape: f32[2,1,128], index: 6, kind: input, shape index: {}]   ;;  %s3423_s7 = inlined_call_operand.hbm [shape: f32[2,1,128], index: 7, kind: input, shape index: {}]   ;;  %s3424_s8 = inlined_call_operand.hbm [shape: f32[2,128,256], index: 8, kind: input, shape index: {}]   ;;  %s3425_s9 = inlined_call_operand.vmem [shape: f32[2,1,256], index: 9, kind: input, shape index: {}]   ;;  %s3426_s10 = inlined_call_operand.hbm [shape: f32[2,256,128], index: 10, kind: input, shape index: {}]   ;;  %s3427_s11 = inlined_call_operand.vmem [shape: f32[2,1,128], index: 11, kind: input, shape index: {}]   ;;  %s3428_s12 = inlined_call_operand.vmem [shape: f32[2,1,128], index: 12, kind: input, shape index: {}]   ;;  %s3429_s13 = inlined_call_operand.vmem [shape: f32[2,1,128], index: 13, kind: input, shape index: {}]   ;;  %s3430_s14 = inlined_call_operand.hbm [shape: f32[16,128], index: 14, kind: output, shape index: {}]  }
   0x1   :  { %20 = vsyncpa [#allocation7], 0 }
   0x2   :  { %21 = vsyncpa [#allocation10], 0 }
   0x3   :  { %22 = vsyncpa [#allocation13], 0 }
   0x4   :  { %23 = vsyncpa [#allocation16], 0  ;;  %s42_s15 = sshll.u32 %s3417_s1, 4  ;;  %s43_s15 = int_to_ptr.hbm [resolvable:$true] %s42_s15 }
   0x5   :  { %24 = vsyncpa [#allocation5], 0  ;;  %s2890_s16 = smov [#allocation6]   ;;  %s68_s20 = sshll.u32 %s3419_s3, 4  ;;  %s69_s20 = int_to_ptr.hbm [resolvable:$true] %s68_s20 }
   0x6   :  { %s44_s17 = sshll.u32 %s2890_s16, 4  ;;  %s2891_s21 = smov 16   ;;  %s45_s17 = int_to_ptr.vmem [resolvable:$true] %s44_s17 }
   0x7   :  { %s2892_s22 = smov 1   ;;  %s2893_s23 = smov [#allocation9]  }
   0x8   :  { %50 = dma.hbm_to_vmem [thread:$0]  %s43_s15, 32, %s45_s17, [#allocation7], %s2891_s21, %s2891_s21, %s2892_s22  }
   0x9   :  { %s70_s24 = sshll.u32 %s2893_s23, 4  ;;  %s2894_s1 = smov 48   ;;  %s71_s24 = int_to_ptr.vmem [resolvable:$true] %s70_s24 }
   0xa   :  { %s2895_s25 = smov 3   ;;  %s96_s28 = sshll.u32 %s3422_s6, 4  ;;  %s97_s28 = int_to_ptr.hbm [resolvable:$true] %s96_s28 }
   0xb   :  { %76 = dma.hbm_to_vmem [thread:$0]  %s69_s20, 96, %s71_s24, [#allocation10], %s2894_s1, %s2894_s1, %s2895_s25  }
   0xc   :  { %s2896_s29 = smov [#allocation12]   ;;  %s122_s18 = sshll.u32 %s3424_s8, 4  ;;  %s123_s18 = int_to_ptr.hbm [resolvable:$true] %s122_s18 }
   0xd   :  { %s98_s3 = sshll.u32 %s2896_s29, 4  ;;  %s2897_s15 = smov [#allocation15]   ;;  %s99_s3 = int_to_ptr.vmem [resolvable:$true] %s98_s3 }
   0xe   :  { %104 = dma.hbm_to_vmem [thread:$0]  %s97_s28, 32, %s99_s3, [#allocation13], %s2891_s21, %s2891_s21, %s2892_s22  }
   0xf   :  { %s124_s17 = sshll.u32 %s2897_s15, 4  ;;  %s29_s6 = sshll.u32 %s3416_s0, 4  ;;  %s125_s17 = int_to_ptr.vmem [resolvable:$true] %s124_s17  ;;  %s30_s6 = int_to_ptr.hbm [resolvable:$true] %s29_s6 }
  0x10   :  { %s2898_s23 = smov 256   ;;  %s2899_s24 = smov [#allocation3]  }
  0x11   :  { %130 = dma.hbm_to_vmem [thread:$0]  %s123_s18, 8192, %s125_s17, [#allocation16], %s2898_s23, %s2898_s23, %s2891_s21  }
  0x12   :  { %s31_s1 = sshll.u32 %s2899_s24, 4  ;;  %s2900_s8 = smov 128   ;;  %s32_s1 = int_to_ptr.vmem [resolvable:$true] %s31_s1 }
  0x13   :  { %s2901_s25 = smov 8   ;;  %s55_s28 = sshll.u32 %s3418_s2, 4  ;;  %s56_s28 = int_to_ptr.hbm [resolvable:$true] %s55_s28 }
  0x14   :  { %37 = dma.hbm_to_vmem [thread:$0]  %s30_s6, 256, %s32_s1, [#allocation4], %s2900_s8, %s2900_s8, %s2901_s25  }
  0x15   :  { %s2902_s29 = smov [#allocation8]   ;;  %s81_s16 = sshll.u32 %s3420_s4, 4  ;;  %s82_s16 = int_to_ptr.hbm [resolvable:$true] %s81_s16 }
  0x16   :  { %s57_s0 = sshll.u32 %s2902_s29, 4  ;;  %s2903_s18 = smov 384   ;;  %s58_s0 = int_to_ptr.vmem [resolvable:$true] %s57_s0 }
  0x17   :  { %s2904_s15 = smov 24   ;;  %s2905_s17 = smov [#allocation11]  }
  0x18   :  { %63 = dma.hbm_to_vmem [thread:$0]  %s56_s28, 12288, %s58_s0, [#allocation7], %s2903_s18, %s2903_s18, %s2904_s15  }
  0x19   :  { %s83_s19 = sshll.u32 %s2905_s17, 4  ;;  %s109_s23 = sshll.u32 %s3423_s7, 4  ;;  %s84_s19 = int_to_ptr.vmem [resolvable:$true] %s83_s19  ;;  %s110_s23 = int_to_ptr.hbm [resolvable:$true] %s109_s23 }
  0x1a   :  { %89 = dma.hbm_to_vmem [thread:$0]  %s82_s16, 4096, %s84_s19, [#allocation10], %s2900_s8, %s2900_s8, %s2901_s25  }
  0x1b   :  { %s137_s4 = sshll.u32 %s3426_s10, 4  ;;  %s2906_s1 = smov [#allocation14]   ;;  %s138_s4 = int_to_ptr.hbm [resolvable:$true] %s137_s4 }
  0x1c   :  { %s111_s26 = sshll.u32 %s2906_s1, 4  ;;  %s2907_s27 = smov [#allocation17]   ;;  %s112_s26 = int_to_ptr.vmem [resolvable:$true] %s111_s26 }
  0x1d   :  { %117 = dma.hbm_to_vmem [thread:$0]  %s110_s23, 32, %s112_s26, [#allocation13], %s2891_s21, %s2891_s21, %s2892_s22  }
  0x1e   :  { %s139_s7 = sshll.u32 %s2907_s27, 4  ;;  %s140_s7 = int_to_ptr.vmem [resolvable:$true] %s139_s7 }
  0x1f   :  { %145 = dma.hbm_to_vmem [thread:$0]  %s138_s4, 8192, %s140_s7, [#allocation16], %s2900_s8, %s2900_s8, %s2901_s25  }
  0x20   :  { %2878 = dma.done.wait [#allocation4], 256  }
  0x21   :  { %2879 = vsyncadd [#allocation4], 4294967040 }
  0x22   :  { %2880 = dma.done.wait [#allocation7], 12320  }
  0x23   :  { %2881 = vsyncadd [#allocation7], 4294954976 }
  0x24   :  { %2882 = dma.done.wait [#allocation10], 4192  }
  0x25   :  { %2883 = vsyncadd [#allocation10], 4294963104 }
  0x26   :  { %2884 = dma.done.wait [#allocation13], 64  }
  0x27   :  { %2885 = vsyncadd [#allocation13], 4294967232 }
  0x28   :  { %2886 = dma.done.wait [#allocation16], 16384  }
  0x29   :  { %2887 = vsyncadd [#allocation16], 4294950912  ;;  %v245_v0 = vld [vmem:[#allocation8 + $0x170] sm:$0xff]  ;;  %v246_v1 = vld [vmem:[#allocation8 + $0x178] sm:$0xff]  ;;  %vm324_vm0 = vcmask 261120   ;;  %s2908_s10 = smov 96  }
  0x2a   :  { %v242_v2 = vld [vmem:[#allocation8 + $0x158] sm:$0xff]  ;;  %278 = vmatpush.msra.mxu1 %v245_v0  ;;  %301 = vmatpush.msra.mxu2 %v246_v1  ;;  %v243_v3 = vld [vmem:[#allocation8 + $0x160] sm:$0xff]  ;;  %v244_v4 = vld [vmem:[#allocation8 + $0x168] sm:$0xff]  ;;  %s2909_s21 = smov 64   ;;  %vm351_vm1 = vcmask 64512   ;;  %s2910_s22 = smov 32  }
  0x2b   :  { %255 = vmatpush.msra.mxu0 %v244_v4  ;;  %v239_v5 = vld [vmem:[#allocation8 + $0x140] sm:$0xff]  ;;  %v240_v6 = vld [vmem:[#allocation8 + $0x148] sm:$0xff]  ;;  %v241_v7 = vld [vmem:[#allocation8 + $0x150] sm:$0xff]  ;;  %vm457_vm2 = vcmask 523520   ;;  %vm528_vm3 = vcmask 785920   ;;  %vm599_vm4 = vcmask 1048320  }
  0x2c   :  { %279 = vmatpush.msra.mxu1 %v242_v2  ;;  %302 = vmatpush.msra.mxu2 %v243_v3  ;;  %v238_v8 = vld [vmem:[#allocation8 + $0x138] sm:$0xff]  ;;  %v236_v9 = vld [vmem:[#allocation8 + $0x128] sm:$0xff]  ;;  %v237_v10 = vld [vmem:[#allocation8 + $0x130] sm:$0xff]  ;;  %s2415_s7 = sshll.u32 %s3430_s14, 4  ;;  %s2416_s7 = int_to_ptr.hbm [resolvable:$true] %s2415_s7 }
  0x2d   :  { %256 = vmatpush.msra.mxu0 %v241_v7  ;;  %v235_v11 = vld [vmem:[#allocation8 + $0x120] sm:$0xff]  ;;  %v233_v12 = vld [vmem:[#allocation8 + $0x110] sm:$0xff]  ;;  %v234_v13 = vld [vmem:[#allocation8 + $0x118] sm:$0xff] }
  0x2e   :  { %280 = vmatpush.msra.mxu1 %v239_v5  ;;  %303 = vmatpush.msra.mxu2 %v240_v6  ;;  %v232_v14 = vld [vmem:[#allocation8 + $0x108] sm:$0xff]  ;;  %v230_v15 = vld [vmem:[#allocation8 + $0xf8] sm:$0xff]  ;;  %v231_v16 = vld [vmem:[#allocation8 + $0x100] sm:$0xff] }
  0x2f   :  { %257 = vmatpush.msra.mxu0 %v238_v8  ;;  %v229_v17 = vld [vmem:[#allocation8 + $0xf0] sm:$0xff]  ;;  %v227_v18 = vld [vmem:[#allocation8 + $0xe0] sm:$0xff]  ;;  %v228_v19 = vld [vmem:[#allocation8 + $0xe8] sm:$0xff] }
  0x30   :  { %281 = vmatpush.msra.mxu1 %v236_v9  ;;  %304 = vmatpush.msra.mxu2 %v237_v10  ;;  %v226_v20 = vld [vmem:[#allocation8 + $0xd8] sm:$0xff]  ;;  %v224_v21 = vld [vmem:[#allocation8 + $0xc8] sm:$0xff]  ;;  %v225_v22 = vld [vmem:[#allocation8 + $0xd0] sm:$0xff] }
  0x31   :  { %258 = vmatpush.msra.mxu0 %v235_v11  ;;  %v223_v23 = vld [vmem:[#allocation8 + $0xc0] sm:$0xff]  ;;  %v221_v24 = vld [vmem:[#allocation8 + $0xb0] sm:$0xff]  ;;  %v222_v25 = vld [vmem:[#allocation8 + $0xb8] sm:$0xff] }
  0x32   :  { %282 = vmatpush.msra.mxu1 %v233_v12  ;;  %305 = vmatpush.msra.mxu2 %v234_v13  ;;  %v218_v26 = vld [vmem:[#allocation8 + $0x98] sm:$0xff]  ;;  %v219_v27 = vld [vmem:[#allocation8 + $0xa0] sm:$0xff]  ;;  %v220_v28 = vld [vmem:[#allocation8 + $0xa8] sm:$0xff] }
  0x33   :  { %259 = vmatpush.msra.mxu0 %v232_v14  ;;  %v215_v29 = vld [vmem:[#allocation8 + $0x80] sm:$0xff]  ;;  %v216_v30 = vld [vmem:[#allocation8 + $0x88] sm:$0xff]  ;;  %v217_v31 = vld [vmem:[#allocation8 + $0x90] sm:$0xff] }
  0x34   :  { %283 = vmatpush.msra.mxu1 %v230_v15  ;;  %306 = vmatpush.msra.mxu2 %v231_v16  ;;  %v214_v32 = vld [vmem:[#allocation8 + $0x78] sm:$0xff]  ;;  %v212_v33 = vld [vmem:[#allocation8 + $0x68] sm:$0xff]  ;;  %v213_v34 = vld [vmem:[#allocation8 + $0x70] sm:$0xff] }
  0x35   :  { %260 = vmatpush.msra.mxu0 %v229_v17  ;;  %v211_v35 = vld [vmem:[#allocation8 + $0x60] sm:$0xff]  ;;  %v209_v36 = vld [vmem:[#allocation8 + $0x50] sm:$0xff]  ;;  %v210_v37 = vld [vmem:[#allocation8 + $0x58] sm:$0xff] }
  0x36   :  { %284 = vmatpush.msra.mxu1 %v227_v18  ;;  %307 = vmatpush.msra.mxu2 %v228_v19  ;;  %v208_v38 = vld [vmem:[#allocation8 + $0x48] sm:$0xff]  ;;  %v206_v39 = vld [vmem:[#allocation8 + $0x38] sm:$0xff]  ;;  %v207_v40 = vld [vmem:[#allocation8 + $0x40] sm:$0xff] }
  0x37   :  { %261 = vmatpush.msra.mxu0 %v226_v20  ;;  %v205_v41 = vld [vmem:[#allocation8 + $0x30] sm:$0xff]  ;;  %v203_v42 = vld [vmem:[#allocation8 + $0x20] sm:$0xff]  ;;  %v204_v43 = vld [vmem:[#allocation8 + $0x28] sm:$0xff] }
  0x38   :  { %285 = vmatpush.msra.mxu1 %v224_v21  ;;  %308 = vmatpush.msra.mxu2 %v225_v22  ;;  %v202_v44 = vld [vmem:[#allocation8 + $0x18] sm:$0xff]  ;;  %v200_v45 = vld [vmem:[#allocation8 + $0x8] sm:$0xff]  ;;  %v201_v46 = vld [vmem:[#allocation8 + $0x10] sm:$0xff] }
  0x39   :  { %262 = vmatpush.msra.mxu0 %v223_v23  ;;  %v3034_v47 = vld [vmem:[#allocation3] sm:$0xff]  ;;  %v199_v48 = vld [vmem:[#allocation8] sm:$0xff]  ;;  %v3052_v59 = vld [vmem:[#allocation6] ss:$0 sm:$0xff] }
  0x3a   :  { %286 = vmatpush.msra.mxu1 %v221_v24  ;;  %309 = vmatpush.msra.mxu2 %v222_v25  ;;  %v3039_v49 = vld [vmem:[#allocation9] sm:$0x7]  ;;  %v3056_v63 = vld [vmem:[#allocation3 + $0x8] sm:$0xff] }
  0x3b   :  { %263 = vmatpush.msra.mxu0 %v220_v28  ;;  %v250_v50 = vperm.slane %v3039_v49, 1  ;;  %v249_v51 = vperm.slane %v3039_v49, 0  ;;  %v251_v56 = vperm.slane %v3039_v49, 2 }
  0x3c   :  { %287 = vmatpush.msra.mxu1 %v218_v26  ;;  %310 = vmatpush.msra.mxu2 %v219_v27 }
  0x3d   :  { %264 = vmatpush.msra.mxu0 %v217_v31 }
  0x3e   :  { %288 = vmatpush.msra.mxu1 %v215_v29  ;;  %311 = vmatpush.msra.mxu2 %v216_v30 }
  0x3f   :  { %265 = vmatpush.msra.mxu0 %v214_v32 }
  0x40   :  { %289 = vmatpush.msra.mxu1 %v212_v33  ;;  %312 = vmatpush.msra.mxu2 %v213_v34 }
  0x41   :  { %266 = vmatpush.msra.mxu0 %v211_v35 }
  0x42   :  { %290 = vmatpush.msra.mxu1 %v209_v36  ;;  %313 = vmatpush.msra.mxu2 %v210_v37 }
  0x43   :  { %267 = vmatpush.msra.mxu0 %v208_v38 }
  0x44   :  { %291 = vmatpush.msra.mxu1 %v206_v39  ;;  %314 = vmatpush.msra.mxu2 %v207_v40 }
  0x45   :  { %268 = vmatpush.msra.mxu0 %v205_v41  ;;  %v2509_v41 = vld [vmem:[#allocation6 + $0x1] ss:$0 sm:$0xff] }
  0x46   :  { %292 = vmatpush.msra.mxu1 %v203_v42  ;;  %315 = vmatpush.msra.mxu2 %v204_v43 }
  0x47   :  { %269 = vmatpush.msra.mxu0 %v202_v44 }
  0x48   :  { %293 = vmatpush.msra.mxu1 %v200_v45  ;;  %316 = vmatpush.msra.mxu2 %v201_v46 }
  0x49   :  { %294 = vmatmul.f32.vlgmr.msra.gmra.mxu1 %v3034_v47  ;;  %317 = vmatmul.f32.vlgmr.msra.gmra.mxu2 %v3034_v47 }
  0x4a   :  { %270 = vmatpush.msra.mxu0 %v199_v48 }
  0x4b   :  { %271 = vmatmul.f32.vlgmr.msra.gmra.mxu0 %v3034_v47 }
  0x51   :  { %297 = vmatmul.f32.gmra.mxu1 %v3056_v63  ;;  %320 = vmatmul.f32.gmra.mxu2 %v3056_v63 }
  0x53   :  { %274 = vmatmul.f32.gmra.mxu0 %v3056_v63 }
  0xc6   :  { %v295_v52 = vpop.f32.mrf.mxu1 }
  0xc7   :  { %v296_v53 = vadd.f32 %v295_v52, %v250_v50 }
  0xc8   :  { %v272_v54 = vpop.f32.mrf.mxu0 }
  0xc9   :  { %v273_v55 = vadd.f32 %v272_v54, %v249_v51  ;;  %2432 = vmatpush.xpose.msk.msra.mxu3 %vm324_vm0, %v296_v53 }
  0xcb   :  { %387 = vrot.lane.b32.xlu1 %v273_v55, %s2908_s10 }
  0xcc   :  { %v318_v57 = vpop.f32.mrf.mxu2  ;;  %2433 = vmatmul.msk.f32.vlgmr.msra.gmra.mxu3 %vm324_vm0, %v273_v55 }
  0xcd   :  { %v319_v58 = vadd.f32 %v318_v57, %v251_v56 }
  0xce   :  { %v298_v11 = vpop.f32.mrf.mxu1 }
  0xcf   :  { %425 = vrot.lane.b32.xlu2 %v319_v58, %s2908_s10  ;;  %379 = vmatpush.msrb.mxu3 %v319_v58  ;;  %v299_v12 = vadd.f32 %v298_v11, %v250_v50 }
  0xd0   :  { %v275_v8 = vpop.f32.mrf.mxu0 }
  0xd1   :  { %v3072_v9 = vadd.f32 %v275_v8, %v249_v51 }
  0xd4   :  { %v321_v45 = vpop.f32.mrf.mxu2 }
  0xd5   :  { %v322_v46 = vadd.f32 %v321_v45, %v251_v56  ;;  %v890_v45 = vld [vmem:[#allocation11 + $0x78] sm:$0xff] }
  0xd6   :  { %895 = vmatpush.msrb.mxu2 %v890_v45  ;;  %v1003_v45 = vld [vmem:[#allocation15 + $0xc0] sm:$0xff] }
  0xd7   :  { %461 = vrot.lane.b32.xlu2 %v296_v53, %s2909_s21 }
  0xdf   :  { %459 = vrot.lane.b32.xlu2 %v273_v55, %s2909_s21 }
 0x129   :  { %v426_v4 = vpop.permute.xlu2 %425 }
 0x131   :  { %v462_v7 = vpop.permute.xlu2 %461 }
 0x139   :  { %v460_v29 = vpop.permute.xlu2 %459 }
 0x13d   :  { %v388_v6 = vpop.permute.xlu1 %387 }
 0x14f   :  { %v348_v60 = vpop.f32.mrf.mxu3 }
 0x150   :  { %v349_v61 = vadd.f32 %v3052_v59, %v348_v60 }
 0x152   :  { %v352_v62 = vsel %vm351_vm1, %v349_v61, -inf }
 0x153   :  { %353 = vmax.xlane.f32.xlu0 %v352_v62 }
 0x167   :  { %389 = vrot.lane.b32.xlu0 %v296_v53, %s2908_s10 }
 0x16f   :  { %496 = vrot.lane.b32.xlu0 %v319_v58, %s2909_s21 }
 0x177   :  { %532 = vrot.lane.b32.xlu0 %v296_v53, %s2910_s22 }
 0x17f   :  { %530 = vrot.lane.b32.xlu0 %v273_v55, %s2910_s22 }
 0x187   :  { %662 = vrot.lane.b32.xlu0 %v3072_v9, %s2908_s10 }
 0x18f   :  { %735 = vrot.lane.b32.xlu0 %v299_v12, %s2909_s21 }
 0x197   :  { %805 = vrot.lane.b32.xlu0 %v299_v12, %s2910_s22 }
 0x1c6   :  { %v354_v0 = vpop.xlane.xlu0 %353 }
 0x1c7   :  { %v355_v1 = vsub.f32 %v349_v61, %v354_v0 }
 0x1c9   :  { %v356_v2 = vmul.f32 1.442695, %v355_v1 }
 0x1cb   :  { %2522 = vpow2.f32 %v356_v2 }
 0x1d1   :  { %v3065_v3 = vpop.eup %2522 }
 0x1d2   :  { %2434 = vmatmul.msk.f32.vlgmr.msrb.gmra.mxu3 %vm351_vm1, %v3065_v3  ;;  %v358_v60 = vsel %vm351_vm1, %v3065_v3, 0.0 }
 0x1d9   :  { %v390_v5 = vpop.permute.xlu0 %389 }
 0x1da   :  { %2435 = vmatpush.xpose.msk.msra.mxu3 %vm324_vm0, %v390_v5 }
 0x1dd   :  { %2436 = vmatmul.msk.f32.vlgmr.msra.gmra.mxu3 %vm324_vm0, %v388_v6 }
 0x1de   :  { %446 = vmatpush.msrb.mxu3 %v426_v4 }
 0x1e0   :  { %2438 = vmatpush.xpose.msk.msra.mxu3 %vm324_vm0, %v462_v7 }
 0x1e1   :  { %v497_v10 = vpop.permute.xlu0 %496 }
 0x1e9   :  { %v533_v13 = vpop.permute.xlu0 %532 }
 0x1ea   :  { %2441 = vmatpush.xpose.msk.msrb.mxu0 %vm324_vm0, %v533_v13 }
 0x1f1   :  { %v531_v14 = vpop.permute.xlu0 %530 }
 0x1f2   :  { %2442 = vmatmul.msk.f32.vlgmr.msrb.gmra.mxu0 %vm324_vm0, %v531_v14 }
 0x1f9   :  { %v663_v22 = vpop.permute.xlu0 %662 }
 0x201   :  { %v736_v26 = vpop.permute.xlu0 %735 }
 0x209   :  { %v806_v28 = vpop.permute.xlu0 %805 }
 0x255   :  { %v3080_v15 = vpop.f32.mrf.mxu3 }
 0x260   :  { %v412_v16 = vpop.f32.mrf.mxu3 }
 0x261   :  { %v413_v17 = vadd.f32 %v3052_v59, %v412_v16 }
 0x263   :  { %v415_v18 = vsel %vm351_vm1, %v413_v17, -inf }
 0x264   :  { %416 = vmax.xlane.f32.xlu1 %v415_v18 }
 0x26f   :  { %v555_v19 = vpop.f32.mrf.mxu0 }
 0x270   :  { %v556_v20 = vadd.f32 %v3052_v59, %v555_v19 }
 0x272   :  { %v558_v21 = vsel %vm351_vm1, %v556_v20, -inf }
 0x273   :  { %559 = vmax.xlane.f32.xlu0 %v558_v21 }
 0x27d   :  { %664 = vrot.lane.b32.xlu1 %v299_v12, %s2908_s10 }
 0x285   :  { %803 = vrot.lane.b32.xlu1 %v3072_v9, %s2910_s22 }
 0x28d   :  { %567 = vrot.lane.b32.xlu1 %v319_v58, %s2910_s22 }
 0x2d7   :  { %v417_v23 = vpop.xlane.xlu1 %416 }
 0x2d8   :  { %v418_v24 = vsub.f32 %v413_v17, %v417_v23 }
 0x2da   :  { %v419_v25 = vmul.f32 1.442695, %v418_v24 }
 0x2dc   :  { %2524 = vpow2.f32 %v419_v25 }
 0x2e2   :  { %v3090_v27 = vpop.eup %2524 }
 0x2e3   :  { %2437 = vmatmul.msk.f32.vlgmr.msrb.gmra.mxu3 %vm351_vm1, %v3090_v27  ;;  %v421_v13 = vsel %vm351_vm1, %v3090_v27, 0.0 }
 0x2e4   :  { %517 = vmatpush.msrb.mxu3 %v497_v10 }
 0x2e6   :  { %v560_v30 = vpop.xlane.xlu0 %559 }
 0x2e7   :  { %v561_v32 = vsub.f32 %v556_v20, %v560_v30 }
 0x2e9   :  { %v562_v33 = vmul.f32 1.442695, %v561_v32 }
 0x2eb   :  { %2439 = vmatmul.msk.f32.vlgmr.msra.gmra.mxu3 %vm324_vm0, %v460_v29  ;;  %2526 = vpow2.f32 %v562_v33 }
 0x2ec   :  { %2444 = vmatpush.xpose.msk.msra.mxu3 %vm324_vm0, %v299_v12 }
 0x2ef   :  { %v665_v31 = vpop.permute.xlu1 %664 }
 0x2f0   :  { %2447 = vmatpush.xpose.msk.msra.mxu0 %vm324_vm0, %v665_v31 }
 0x2f1   :  { %v3100_v36 = vpop.eup %2526 }
 0x2f2   :  { %v564_v17 = vsel %vm351_vm1, %v3100_v36, 0.0 }
 0x2f3   :  { %2448 = vmatmul.msk.f32.vlgmr.msra.gmra.mxu0 %vm324_vm0, %v663_v22 }
 0x2f4   :  { %2450 = vmatpush.xpose.msk.msrb.mxu0 %vm324_vm0, %v736_v26 }
 0x2f7   :  { %v804_v34 = vpop.permute.xlu1 %803 }
 0x2f8   :  { %2453 = vmatpush.xpose.msk.msra.mxu0 %vm324_vm0, %v806_v28 }
 0x2ff   :  { %v568_v35 = vpop.permute.xlu1 %567 }
 0x300   :  { %588 = vmatpush.msrb.mxu1 %v568_v35 }
 0x301   :  { %2443 = vmatmul.msk.f32.vlgmr.msrb.gmra.mxu1 %vm351_vm1, %v3100_v36 }
 0x366   :  { %v3104_v37 = vpop.f32.mrf.mxu3 }
 0x36e   :  { %v484_v38 = vpop.f32.mrf.mxu3 }
 0x36f   :  { %v485_v39 = vadd.f32 %v3052_v59, %v484_v38 }
 0x370   :  { %v687_v42 = vpop.f32.mrf.mxu0 }
 0x371   :  { %v487_v40 = vsel %vm351_vm1, %v485_v39, -inf  ;;  %v688_v43 = vadd.f32 %v2509_v41, %v687_v42 }
 0x372   :  { %488 = vmax.xlane.f32.xlu2 %v487_v40 }
 0x373   :  { %v690_v44 = vsel %vm351_vm1, %v688_v43, -inf }
 0x37e   :  { %v590_v32 = vpop.f32.mrf.mxu1 }
 0x38a   :  { %733 = vrot.lane.b32.xlu2 %v3072_v9, %s2909_s21 }
 0x3b3   :  { %691 = vmax.xlane.f32.xlu2 %v690_v44 }
 0x3cb   :  { %700 = vrot.lane.b32.xlu2 %v322_v46, %s2908_s10 }
 0x3e5   :  { %v489_v48 = vpop.xlane.xlu2 %488 }
 0x3e6   :  { %v490_v50 = vsub.f32 %v485_v39, %v489_v48  ;;  %v888_v48 = vld [vmem:[#allocation11 + $0x68] sm:$0xff] }
 0x3e8   :  { %v491_v51 = vmul.f32 1.442695, %v490_v50  ;;  %v887_v50 = vld [vmem:[#allocation11 + $0x60] sm:$0xff] }
 0x3ea   :  { %2528 = vpow2.f32 %v491_v51  ;;  %v886_v51 = vld [vmem:[#allocation11 + $0x58] sm:$0xff] }
 0x3ed   :  { %v734_v52 = vpop.permute.xlu2 %733 }
 0x3ee   :  { %2451 = vmatmul.msk.f32.vlgmr.msrb.gmra.mxu0 %vm324_vm0, %v734_v52  ;;  %v884_v52 = vld [vmem:[#allocation11 + $0x48] sm:$0xff] }
 0x3f0   :  { %v2529_v53 = vpop.eup %2528 }
 0x3f1   :  { %2440 = vmatmul.msk.f32.vlgmr.msrb.gmra.mxu3 %vm351_vm1, %v2529_v53  ;;  %v493_v54 = vsel %vm351_vm1, %v2529_v53, 0.0  ;;  %v883_v53 = vld [vmem:[#allocation11 + $0x40] sm:$0xff] }
 0x3f2   :  { %654 = vmatpush.msrb.mxu3 %v322_v46 }
 0x3f4   :  { %494 = vadd.xlane.f32.xlu2 %v493_v54  ;;  %v882_v54 = vld [vmem:[#allocation11 + $0x38] sm:$0xff] }
 0x3f6   :  { %2454 = vmatmul.msk.f32.vlgmr.msra.gmra.mxu0 %vm324_vm0, %v804_v34 }
 0x3f9   :  { %2445 = vmatmul.msk.f32.vlgmr.msra.gmra.mxu3 %vm324_vm0, %v3072_v9 }
 0x426   :  { %v692_v49 = vpop.xlane.xlu2 %691 }
 0x427   :  { %v693_v55 = vsub.f32 %v688_v43, %v692_v49  ;;  %v881_v49 = vld [vmem:[#allocation11 + $0x30] sm:$0xff] }
 0x429   :  { %v694_v56 = vmul.f32 1.442695, %v693_v55  ;;  %v880_v55 = vld [vmem:[#allocation11 + $0x28] sm:$0xff] }
 0x42b   :  { %2530 = vpow2.f32 %v694_v56 }
 0x42e   :  { %v701_v57 = vpop.permute.xlu2 %700 }
 0x42f   :  { %721 = vmatpush.msra.mxu1 %v701_v57 }
 0x431   :  { %v2531_v58 = vpop.eup %2530 }
 0x432   :  { %v696_v59 = vsel %vm351_vm1, %v2531_v58, 0.0  ;;  %2449 = vmatmul.msk.f32.vlgmr.msra.gmra.mxu1 %vm351_vm1, %v2531_v58 }
 0x433   :  { %697 = vadd.xlane.f32.xlu2 %v696_v59  ;;  %v879_v59 = vld [vmem:[#allocation11 + $0x20] sm:$0xff] }
 0x43b   :  { %359 = vadd.xlane.f32.xlu2 %v358_v60  ;;  %v878_v60 = vld [vmem:[#allocation11 + $0x18] sm:$0xff] }
 0x467   :  { %v495_v61 = vpop.xlane.xlu2 %494 }
 0x468   :  { %2532 = vrcp.f32 %v495_v61  ;;  %v877_v61 = vld [vmem:[#allocation11 + $0x10] sm:$0xff] }
 0x46b   :  { %v758_v62 = vpop.f32.mrf.mxu0 }
 0x46c   :  { %v759_v0 = vadd.f32 %v2509_v41, %v758_v62 }
 0x46e   :  { %v761_v1 = vsel %vm351_vm1, %v759_v0, -inf  ;;  %v2533_v4 = vpop.eup %2532 }
 0x46f   :  { %762 = vmax.xlane.f32.xlu0 %v761_v1  ;;  %v876_v1 = vld [vmem:[#allocation11 + $0x8] sm:$0xff] }
 0x473   :  { %v828_v2 = vpop.f32.mrf.mxu0 }
 0x474   :  { %v829_v5 = vadd.f32 %v2509_v41, %v828_v2  ;;  %v519_v6 = vpop.f32.mrf.mxu3 }
 0x475   :  { %v523_v7 = vmul.f32 %v2533_v4, %v519_v6 }
 0x476   :  { %v831_v8 = vsel %vm351_vm1, %v829_v5, -inf }
 0x477   :  { %832 = vmax.xlane.f32.xlu0 %v831_v8 }
 0x47c   :  { %v624_v9 = vpop.f32.mrf.mxu3 }
 0x47d   :  { %v625_v10 = vadd.f32 %v2509_v41, %v624_v9 }
 0x47f   :  { %v627_v3 = vsel %vm351_vm1, %v625_v10, -inf }
 0x480   :  { %628 = vmax.xlane.f32.xlu1 %v627_v3 }
 0x48b   :  { %770 = vrot.lane.b32.xlu0 %v322_v46, %s2909_s21 }
 0x499   :  { %840 = vrot.lane.b32.xlu1 %v322_v46, %s2910_s22  ;;  %v889_v46 = vld [vmem:[#allocation11 + $0x70] sm:$0xff] }
 0x49a   :  { %896 = vmatpush.msrb.mxu2 %v889_v46  ;;  %v1004_v46 = vld [vmem:[#allocation15 + $0xc8] sm:$0xff] }
 0x49c   :  { %897 = vmatpush.msrb.mxu2 %v888_v48  ;;  %v1001_v48 = vld [vmem:[#allocation15 + $0xb0] sm:$0xff] }
 0x49e   :  { %898 = vmatpush.msrb.mxu2 %v887_v50  ;;  %v1002_v50 = vld [vmem:[#allocation15 + $0xb8] sm:$0xff] }
 0x4a0   :  { %899 = vmatpush.msrb.mxu2 %v886_v51  ;;  %v999_v51 = vld [vmem:[#allocation15 + $0xa0] sm:$0xff] }
 0x4a6   :  { %v698_v11 = vpop.xlane.xlu2 %697 }
 0x4ae   :  { %v360_v12 = vpop.xlane.xlu2 %359 }
 0x4af   :  { %2534 = vrcp.f32 %v360_v12  ;;  %v723_v35 = vpop.f32.mrf.mxu1 }
 0x4b5   :  { %v2535_v14 = vpop.eup %2534  ;;  %422 = vadd.xlane.f32.xlu0 %v421_v13 }
 0x4b6   :  { %v385_v16 = vmul.f32 %v2535_v14, %v3080_v15 }
 0x4b8   :  { %386 = vst.msk [vmem:[#allocation2] sm:$0xff] %vm324_vm0, %v385_v16 }
 0x4c3   :  { %565 = vadd.xlane.f32.xlu1 %v564_v17 }
 0x4e2   :  { %v763_v18 = vpop.xlane.xlu0 %762 }
 0x4e3   :  { %v764_v19 = vsub.f32 %v759_v0, %v763_v18 }
 0x4e5   :  { %v765_v20 = vmul.f32 1.442695, %v764_v19  ;;  %v2510_v19 = vld [vmem:[%s3421_s5] ss:$0 sm:$0xff] }
 0x4e7   :  { %2536 = vpow2.f32 %v765_v20 }
 0x4ea   :  { %v833_v21 = vpop.xlane.xlu0 %832 }
 0x4eb   :  { %v834_v22 = vsub.f32 %v829_v5, %v833_v21 }
 0x4ed   :  { %v2537_v23 = vpop.eup %2536  ;;  %v835_v24 = vmul.f32 1.442695, %v834_v22 }
 0x4ee   :  { %v767_v25 = vsel %vm351_vm1, %v2537_v23, 0.0 }
 0x4ef   :  { %2538 = vpow2.f32 %v835_v24  ;;  %768 = vadd.xlane.f32.xlu0 %v767_v25 }
 0x4f3   :  { %v629_v26 = vpop.xlane.xlu1 %628 }
 0x4f4   :  { %v630_v15 = vsub.f32 %v625_v10, %v629_v26  ;;  %v2911_v26 = vmov 128.0  }
 0x4f5   :  { %v2539_v27 = vpop.eup %2538 }
 0x4f6   :  { %v631_v28 = vmul.f32 1.442695, %v630_v15  ;;  %v837_v29 = vsel %vm351_vm1, %v2539_v27, 0.0 }
 0x4f7   :  { %838 = vadd.xlane.f32.xlu1 %v837_v29 }
 0x4f8   :  { %2540 = vpow2.f32 %v631_v28 }
 0x4f9   :  { %2542 = vrcp.f32 %v698_v11 }
 0x4fd   :  { %v771_v30 = vpop.permute.xlu0 %770 }
 0x4fe   :  { %v2541_v31 = vpop.eup %2540  ;;  %791 = vmatpush.msra.mxu3 %v771_v30 }
 0x4ff   :  { %2446 = vmatmul.msk.f32.vlgmr.msrb.gmra.mxu3 %vm351_vm1, %v2541_v31  ;;  %v2543_v34 = vpop.eup %2542  ;;  %v633_v44 = vsel %vm351_vm1, %v2541_v31, 0.0 }
 0x500   :  { %v727_v36 = vmul.f32 %v2543_v34, %v723_v35  ;;  %v1010_v35 = vld [vmem:[#allocation15 + $0xf8] sm:$0xff] }
 0x501   :  { %1040 = vmatpush.msrb.mxu0 %v1010_v35  ;;  %v1198_v35 = vld [vmem:[#allocation17 + $0xf8] sm:$0xff] }
 0x507   :  { %2452 = vmatmul.msk.f32.vlgmr.msra.gmra.mxu3 %vm351_vm1, %v2537_v23 }
 0x50b   :  { %v841_v33 = vpop.permute.xlu1 %840 }
 0x50c   :  { %861 = vmatpush.msrb.mxu1 %v841_v33 }
 0x50d   :  { %2455 = vmatmul.msk.f32.vlgmr.msrb.gmra.mxu1 %vm351_vm1, %v2539_v27 }
 0x510   :  { %525 = vrot.lane.b32.xlu1 %v523_v7, %s2909_s21  ;;  %v875_v7 = vld [vmem:[#allocation11] sm:$0xff] }
 0x518   :  { %729 = vrot.lane.b32.xlu1 %v727_v36, %s2910_s22  ;;  %v1007_v36 = vld [vmem:[#allocation15 + $0xe0] sm:$0xff] }
 0x528   :  { %v423_v38 = vpop.xlane.xlu0 %422 }
 0x529   :  { %2544 = vrcp.f32 %v423_v38  ;;  %v1008_v38 = vld [vmem:[#allocation15 + $0xe8] sm:$0xff] }
 0x52a   :  { %1041 = vmatpush.msrb.mxu0 %v1008_v38  ;;  %v1196_v38 = vld [vmem:[#allocation17 + $0xe8] sm:$0xff] }
 0x52f   :  { %v2545_v39 = vpop.eup %2544 }
 0x530   :  { %v452_v40 = vmul.f32 %v2545_v39, %v3104_v37  ;;  %v885_v37 = vld [vmem:[#allocation11 + $0x50] sm:$0xff] }
 0x531   :  { %900 = vmatpush.msrb.mxu2 %v885_v37  ;;  %v1000_v37 = vld [vmem:[#allocation15 + $0xa8] sm:$0xff] }
 0x532   :  { %454 = vrot.lane.b32.xlu0 %v452_v40, %s2910_s22 }
 0x533   :  { %901 = vmatpush.msrb.mxu2 %v884_v52  ;;  %v997_v52 = vld [vmem:[#allocation15 + $0x90] sm:$0xff] }
 0x535   :  { %902 = vmatpush.msrb.mxu2 %v883_v53  ;;  %v998_v53 = vld [vmem:[#allocation15 + $0x98] sm:$0xff] }
 0x536   :  { %v566_v41 = vpop.xlane.xlu1 %565 }
 0x537   :  { %2546 = vrcp.f32 %v566_v41  ;;  %903 = vmatpush.msrb.mxu2 %v882_v54  ;;  %v995_v54 = vld [vmem:[#allocation15 + $0x80] sm:$0xff] }
 0x539   :  { %904 = vmatpush.msrb.mxu2 %v881_v49  ;;  %v996_v49 = vld [vmem:[#allocation15 + $0x88] sm:$0xff] }
 0x53b   :  { %905 = vmatpush.msrb.mxu2 %v880_v55  ;;  %v993_v55 = vld [vmem:[#allocation15 + $0x70] sm:$0xff] }
 0x53d   :  { %v2547_v42 = vpop.eup %2546  ;;  %906 = vmatpush.msrb.mxu2 %v879_v59  ;;  %v989_v59 = vld [vmem:[#allocation15 + $0x50] sm:$0xff] }
 0x53e   :  { %v594_v43 = vmul.f32 %v2547_v42, %v590_v32  ;;  %v1005_v42 = vld [vmem:[#allocation15 + $0xd0] sm:$0xff] }
 0x53f   :  { %907 = vmatpush.msrb.mxu2 %v878_v60  ;;  %v990_v60 = vld [vmem:[#allocation15 + $0x58] sm:$0xff] }
 0x540   :  { %596 = vrot.lane.b32.xlu2 %v594_v43, %s2908_s10  ;;  %v1006_v43 = vld [vmem:[#allocation15 + $0xd8] sm:$0xff] }
 0x541   :  { %908 = vmatpush.msrb.mxu2 %v877_v61  ;;  %1042 = vmatpush.msrb.mxu0 %v1006_v43  ;;  %v987_v61 = vld [vmem:[#allocation15 + $0x40] sm:$0xff]  ;;  %v1194_v43 = vld [vmem:[#allocation17 + $0xd8] sm:$0xff] }
 0x543   :  { %909 = vmatpush.msrb.mxu2 %v876_v1  ;;  %1043 = vmatpush.msrb.mxu0 %v1004_v46  ;;  %v986_v1 = vld [vmem:[#allocation15 + $0x38] sm:$0xff]  ;;  %v1179_v46 = vld [vmem:[#allocation17 + $0x60] sm:$0xff] }
 0x545   :  { %910 = vmatpush.msrb.mxu2 %v875_v7  ;;  %1044 = vmatpush.msrb.mxu0 %v1002_v50  ;;  %v979_v7 = vld [vmem:[#allocation15] sm:$0xff] }
 0x547   :  { %1045 = vmatpush.msrb.mxu0 %v1000_v37  ;;  %1226 = vmatpush.msra.mxu2 %v1198_v35  ;;  %v1191_v37 = vld [vmem:[#allocation17 + $0xc0] sm:$0xff] }
 0x549   :  { %1046 = vmatpush.msrb.mxu0 %v998_v53  ;;  %v1177_v53 = vld [vmem:[#allocation17 + $0x50] sm:$0xff] }
 0x54b   :  { %1047 = vmatpush.msrb.mxu0 %v996_v49 }
 0x55c   :  { %634 = vadd.xlane.f32.xlu0 %v633_v44 }
 0x562   :  { %v769_v57 = vpop.xlane.xlu0 %768 }
 0x56a   :  { %v839_v56 = vpop.xlane.xlu1 %838 }
 0x56b   :  { %2548 = vrcp.f32 %v839_v56  ;;  %v994_v56 = vld [vmem:[#allocation15 + $0x78] sm:$0xff] }
 0x56c   :  { %2550 = vrcp.f32 %v769_v57  ;;  %1048 = vmatpush.msrb.mxu0 %v994_v56  ;;  %v991_v57 = vld [vmem:[#allocation15 + $0x60] sm:$0xff]  ;;  %v1189_v56 = vld [vmem:[#allocation17 + $0xb0] sm:$0xff] }
 0x571   :  { %v2549_v62 = vpop.eup %2548 }
 0x572   :  { %v2551_v2 = vpop.eup %2550 }
 0x582   :  { %v656_v58 = vpop.f32.mrf.mxu3  ;;  %v526_v9 = vpop.permute.xlu1 %525 }
 0x58a   :  { %v863_v0 = vpop.f32.mrf.mxu1  ;;  %v793_v5 = vpop.f32.mrf.mxu3 }
 0x58b   :  { %v867_v4 = vmul.f32 %v2549_v62, %v863_v0  ;;  %v797_v6 = vmul.f32 %v2551_v2, %v793_v5  ;;  %v730_v14 = vpop.permute.xlu1 %729  ;;  %v988_v62 = vld [vmem:[#allocation15 + $0x48] sm:$0xff]  ;;  %v985_v0 = vld [vmem:[#allocation15 + $0x30] sm:$0xff]  ;;  %v983_v2 = vld [vmem:[#allocation15 + $0x20] sm:$0xff] }
 0x58c   :  { %v981_v5 = vld [vmem:[#allocation15 + $0x10] sm:$0xff] }
 0x58d   :  { %869 = vrot.lane.b32.xlu1 %v867_v4, %s2908_s10  ;;  %799 = vrot.lane.b32.xlu2 %v797_v6, %s2909_s21  ;;  %v984_v4 = vld [vmem:[#allocation15 + $0x28] sm:$0xff]  ;;  %v982_v6 = vld [vmem:[#allocation15 + $0x18] sm:$0xff] }
 0x59a   :  { %v597_v10 = vpop.permute.xlu2 %596 }
 0x5a4   :  { %v455_v8 = vpop.permute.xlu0 %454 }
 0x5a5   :  { %458 = vst.msk [vmem:[#allocation2] sm:$0xff] %vm457_vm2, %v455_v8  ;;  %v980_v8 = vld [vmem:[#allocation15 + $0x8] sm:$0xff] }
 0x5a6   :  { %529 = vst.msk [vmem:[#allocation2] sm:$0xff] %vm528_vm3, %v526_v9 }
 0x5a7   :  { %600 = vst.msk [vmem:[#allocation2] sm:$0xff] %vm599_vm4, %v597_v10 }
 0x5ae   :  { %v873_v3 = vld [vmem:[#allocation2] sm:$0xff] }
 0x5af   :  { %911 = vmatmul.f32.vlgmr.msrb.gmra.mxu2 %v873_v3 }
 0x5cf   :  { %v635_v11 = vpop.xlane.xlu0 %634 }
 0x5d0   :  { %2552 = vrcp.f32 %v635_v11 }
 0x5d1   :  { %2554 = vrcp.f32 %v2911_v26 }
 0x5d6   :  { %v2553_v12 = vpop.eup %2552 }
 0x5d7   :  { %v660_v13 = vmul.f32 %v2553_v12, %v656_v58  ;;  %v2555_v15 = vpop.eup %2554  ;;  %v992_v58 = vld [vmem:[#allocation15 + $0x68] sm:$0xff] }
 0x5d8   :  { %v927_v27 = vmul.f32 128.0, %v2555_v15  ;;  %vm931_vm5 = vweird.f32 %v2555_v15  ;;  %1049 = vmatpush.msrb.mxu0 %v992_v58 }
 0x5d9   :  { %661 = vst.msk [vmem:[#allocation2 + $0x8] sm:$0xff] %vm324_vm0, %v660_v13 }
 0x5da   :  { %732 = vst.msk [vmem:[#allocation2 + $0x8] sm:$0xff] %vm457_vm2, %v730_v14  ;;  %v928_v28 = vsub.f32 1.0, %v927_v27  ;;  %1050 = vmatpush.msrb.mxu0 %v990_v60  ;;  %v1188_v60 = vld [vmem:[#allocation17 + $0xa8] sm:$0xff] }
 0x5dc   :  { %v929_v29 = vmul.f32 %v2555_v15, %v928_v28  ;;  %1051 = vmatpush.msrb.mxu0 %v988_v62 }
 0x5de   :  { %v930_v30 = vadd.f32 %v2555_v15, %v929_v29  ;;  %1052 = vmatpush.msrb.mxu0 %v986_v1  ;;  %v1187_v1 = vld [vmem:[#allocation17 + $0xa0] sm:$0xff] }
 0x5e0   :  { %v3160_v31 = vsel %vm931_vm5, %v2555_v15, %v930_v30  ;;  %1053 = vmatpush.msrb.mxu0 %v984_v4 }
 0x5e2   :  { %1054 = vmatpush.msrb.mxu0 %v982_v6  ;;  %v1186_v6 = vld [vmem:[#allocation17 + $0x98] sm:$0xff] }
 0x5e4   :  { %1055 = vmatpush.msrb.mxu0 %v980_v8 }
 0x5e7   :  { %v800_v16 = vpop.permute.xlu2 %799 }
 0x5e8   :  { %802 = vst.msk [vmem:[#allocation2 + $0x8] sm:$0xff] %vm528_vm3, %v800_v16 }
 0x5ff   :  { %v870_v17 = vpop.permute.xlu1 %869 }
 0x600   :  { %872 = vst.msk [vmem:[#allocation2 + $0x8] sm:$0xff] %vm599_vm4, %v870_v17 }
 0x607   :  { %v874_v18 = vld [vmem:[#allocation2 + $0x8] sm:$0xff] }
 0x608   :  { %914 = vmatmul.f32.gmra.mxu2 %v874_v18  ;;  %v2511_v18 = vld [vmem:[#allocation12] ss:$0 sm:$0xff] }
 0x632   :  { %v912_v20 = vpop.f32.mrf.mxu2 }
 0x633   :  { %v913_v21 = vadd.f32 %v2510_v19, %v912_v20 }
 0x635   :  { %v918_v22 = vadd.f32 %v913_v21, %v3034_v47  ;;  %v2512_v21 = vld [vmem:[#allocation14] ss:$0 sm:$0xff] }
 0x637   :  { %922 = vadd.xlane.f32.xlu2 %v918_v22 }
 0x68b   :  { %v915_v23 = vpop.f32.mrf.mxu2 }
 0x68c   :  { %v916_v24 = vadd.f32 %v2510_v19, %v915_v23 }
 0x68e   :  { %v919_v25 = vadd.f32 %v916_v24, %v3056_v63  ;;  %v1009_v63 = vld [vmem:[#allocation15 + $0xf0] sm:$0xff] }
 0x68f   :  { %1017 = vmatpush.msrb.mxu3 %v1009_v63 }
 0x690   :  { %924 = vadd.xlane.f32.xlu1 %v919_v25 }
 0x691   :  { %1018 = vmatpush.msrb.mxu3 %v1007_v36  ;;  %v1197_v36 = vld [vmem:[#allocation17 + $0xf0] sm:$0xff] }
 0x692   :  { %1227 = vmatpush.msra.mxu2 %v1197_v36 }
 0x693   :  { %1019 = vmatpush.msrb.mxu3 %v1005_v42  ;;  %v1181_v42 = vld [vmem:[#allocation17 + $0x70] sm:$0xff] }
 0x694   :  { %1228 = vmatpush.msra.mxu2 %v1196_v38 }
 0x695   :  { %1020 = vmatpush.msrb.mxu3 %v1003_v45  ;;  %v1193_v45 = vld [vmem:[#allocation17 + $0xd0] sm:$0xff] }
 0x697   :  { %1021 = vmatpush.msrb.mxu3 %v1001_v48  ;;  %v1192_v48 = vld [vmem:[#allocation17 + $0xc8] sm:$0xff] }
 0x699   :  { %1022 = vmatpush.msrb.mxu3 %v999_v51  ;;  %v1178_v51 = vld [vmem:[#allocation17 + $0x58] sm:$0xff] }
 0x69b   :  { %1023 = vmatpush.msrb.mxu3 %v997_v52 }
 0x69d   :  { %1024 = vmatpush.msrb.mxu3 %v995_v54  ;;  %v1190_v54 = vld [vmem:[#allocation17 + $0xb8] sm:$0xff] }
 0x69f   :  { %1025 = vmatpush.msrb.mxu3 %v993_v55  ;;  %v1176_v55 = vld [vmem:[#allocation17 + $0x48] sm:$0xff] }
 0x6a1   :  { %1026 = vmatpush.msrb.mxu3 %v991_v57 }
 0x6a3   :  { %1027 = vmatpush.msrb.mxu3 %v989_v59  ;;  %v1175_v59 = vld [vmem:[#allocation17 + $0x40] sm:$0xff] }
 0x6a5   :  { %1028 = vmatpush.msrb.mxu3 %v987_v61 }
 0x6a7   :  { %1029 = vmatpush.msrb.mxu3 %v985_v0  ;;  %v1174_v0 = vld [vmem:[#allocation17 + $0x38] sm:$0xff] }
 0x6a9   :  { %1030 = vmatpush.msrb.mxu3 %v983_v2 }
 0x6aa   :  { %v923_v32 = vpop.xlane.xlu2 %922 }
 0x6ab   :  { %v933_v33 = vmul.f32 %v3160_v31, %v923_v32  ;;  %1031 = vmatpush.msrb.mxu3 %v981_v5  ;;  %v1173_v5 = vld [vmem:[#allocation17 + $0x30] sm:$0xff] }
 0x6ad   :  { %v3163_v47 = vsub.f32 %v918_v22, %v933_v33  ;;  %1032 = vmatpush.msrb.mxu3 %v979_v7 }
 0x6af   :  { %v937_v34 = vmul.f32 %v3163_v47, %v3163_v47 }
 0x6b1   :  { %939 = vadd.xlane.f32.xlu0 %v937_v34 }
 0x703   :  { %v925_v39 = vpop.xlane.xlu1 %924 }
 0x704   :  { %v934_v40 = vmul.f32 %v3160_v31, %v925_v39  ;;  %v1182_v39 = vld [vmem:[#allocation17 + $0x78] sm:$0xff] }
 0x705   :  { %1203 = vmatpush.msra.mxu1 %v1182_v39 }
 0x706   :  { %v3168_v41 = vsub.f32 %v919_v25, %v934_v40  ;;  %v1195_v40 = vld [vmem:[#allocation17 + $0xe0] sm:$0xff] }
 0x707   :  { %1229 = vmatpush.msra.mxu2 %v1195_v40  ;;  %1204 = vmatpush.msra.mxu1 %v1181_v42 }
 0x708   :  { %v938_v44 = vmul.f32 %v3168_v41, %v3168_v41 }
 0x709   :  { %1230 = vmatpush.msra.mxu2 %v1194_v43 }
 0x70a   :  { %941 = vadd.xlane.f32.xlu0 %v938_v44  ;;  %v1180_v44 = vld [vmem:[#allocation17 + $0x68] sm:$0xff] }
 0x70b   :  { %1205 = vmatpush.msra.mxu1 %v1180_v44  ;;  %1231 = vmatpush.msra.mxu2 %v1193_v45 }
 0x70d   :  { %1206 = vmatpush.msra.mxu1 %v1179_v46  ;;  %1232 = vmatpush.msra.mxu2 %v1192_v48 }
 0x70f   :  { %1207 = vmatpush.msra.mxu1 %v1178_v51  ;;  %1233 = vmatpush.msra.mxu2 %v1191_v37 }
 0x711   :  { %1208 = vmatpush.msra.mxu1 %v1177_v53  ;;  %1234 = vmatpush.msra.mxu2 %v1190_v54 }
 0x713   :  { %1209 = vmatpush.msra.mxu1 %v1176_v55  ;;  %1235 = vmatpush.msra.mxu2 %v1189_v56 }
 0x715   :  { %1210 = vmatpush.msra.mxu1 %v1175_v59  ;;  %1236 = vmatpush.msra.mxu2 %v1188_v60 }
 0x717   :  { %1211 = vmatpush.msra.mxu1 %v1174_v0  ;;  %1237 = vmatpush.msra.mxu2 %v1187_v1 }
 0x719   :  { %1212 = vmatpush.msra.mxu1 %v1173_v5  ;;  %1238 = vmatpush.msra.mxu2 %v1186_v6 }
 0x724   :  { %v940_v9 = vpop.xlane.xlu0 %939 }
 0x725   :  { %v943_v10 = vmul.f32 %v940_v9, %v3160_v31  ;;  %v1172_v9 = vld [vmem:[#allocation17 + $0x28] sm:$0xff] }
 0x726   :  { %1213 = vmatpush.msra.mxu1 %v1172_v9 }
 0x727   :  { %v945_v3 = vadd.f32 1e-05, %v943_v10  ;;  %v1185_v10 = vld [vmem:[#allocation17 + $0x90] sm:$0xff] }
 0x728   :  { %1239 = vmatpush.msra.mxu2 %v1185_v10 }
 0x729   :  { %2556 = vrsqrt.f32 %v945_v3  ;;  %vm953_vm7 = vweird.f32 %v945_v3 }
 0x72f   :  { %v2557_v11 = vpop.eup %2556 }
 0x730   :  { %v948_v12 = vmul.f32 %v2557_v11, %v945_v3  ;;  %vm954_vm6 = vweird.f32 %v2557_v11 }
 0x731   :  { %vm955_vm8 = vmor %vm953_vm7, %vm954_vm6 }
 0x732   :  { %v949_v13 = vmul.f32 %v2557_v11, %v948_v12  ;;  %v1184_v12 = vld [vmem:[#allocation17 + $0x88] sm:$0xff] }
 0x733   :  { %1240 = vmatpush.msra.mxu2 %v1184_v12 }
 0x734   :  { %v950_v14 = vmul.f32 0.5, %v949_v13 }
 0x736   :  { %v951_v16 = vsub.f32 1.5, %v950_v14  ;;  %v1170_v14 = vld [vmem:[#allocation17 + $0x18] sm:$0xff] }
 0x738   :  { %v952_v17 = vmul.f32 %v2557_v11, %v951_v16  ;;  %v1183_v16 = vld [vmem:[#allocation17 + $0x80] sm:$0xff] }
 0x739   :  { %1241 = vmatpush.msra.mxu2 %v1183_v16 }
 0x73a   :  { %v956_v19 = vsel %vm955_vm8, %v2557_v11, %v952_v17  ;;  %v1171_v11 = vld [vmem:[#allocation17 + $0x20] sm:$0xff] }
 0x73b   :  { %v967_v20 = vmul.f32 %v956_v19, %v3163_v47  ;;  %1214 = vmatpush.msra.mxu1 %v1171_v11 }
 0x73d   :  { %v972_v22 = vmul.f32 %v2511_v18, %v967_v20  ;;  %1215 = vmatpush.msra.mxu1 %v1170_v14 }
 0x73f   :  { %v3174_v23 = vadd.f32 %v2512_v21, %v972_v22  ;;  %v1168_v22 = vld [vmem:[#allocation17 + $0x8] sm:$0xff] }
 0x741   :  { %1033 = vmatmul.f32.vlgmr.msrb.gmra.mxu3 %v3174_v23  ;;  %1056 = vmatmul.f32.vlgmr.msrb.gmra.mxu0 %v3174_v23 }
 0x77d   :  { %v942_v24 = vpop.xlane.xlu0 %941 }
 0x77e   :  { %v944_v25 = vmul.f32 %v942_v24, %v3160_v31  ;;  %v1167_v24 = vld [vmem:[#allocation17] sm:$0xff] }
 0x780   :  { %v946_v26 = vadd.f32 1e-05, %v944_v25 }
 0x782   :  { %2558 = vrsqrt.f32 %v946_v26  ;;  %vm963_vm10 = vweird.f32 %v946_v26 }
 0x788   :  { %v2559_v15 = vpop.eup %2558 }
 0x789   :  { %v958_v27 = vmul.f32 %v2559_v15, %v946_v26  ;;  %vm964_vm9 = vweird.f32 %v2559_v15 }
 0x78a   :  { %vm965_vm11 = vmor %vm963_vm10, %vm964_vm9 }
 0x78b   :  { %v959_v28 = vmul.f32 %v2559_v15, %v958_v27 }
 0x78d   :  { %v960_v29 = vmul.f32 0.5, %v959_v28 }
 0x78f   :  { %v961_v30 = vsub.f32 1.5, %v960_v29 }
 0x791   :  { %v962_v32 = vmul.f32 %v2559_v15, %v961_v30 }
 0x793   :  { %v966_v33 = vsel %vm965_vm11, %v2559_v15, %v962_v32 }
 0x794   :  { %v968_v47 = vmul.f32 %v966_v33, %v3168_v41  ;;  %v3187_v41 = vld [vmem:[%s3425_s9] sm:$0x3] }
 0x795   :  { %v1014_v50 = vperm.slane %v3187_v41, 1  ;;  %v1013_v58 = vperm.slane %v3187_v41, 0 }
 0x796   :  { %v973_v34 = vmul.f32 %v2511_v18, %v968_v47  ;;  %v1169_v18 = vld [vmem:[#allocation17 + $0x10] sm:$0xff] }
 0x797   :  { %1216 = vmatpush.msra.mxu1 %v1169_v18 }
 0x798   :  { %v3180_v63 = vadd.f32 %v2512_v21, %v973_v34 }
 0x799   :  { %1217 = vmatpush.msra.mxu1 %v1168_v22 }
 0x79a   :  { %1036 = vmatmul.f32.gmra.mxu3 %v3180_v63  ;;  %1059 = vmatmul.f32.gmra.mxu0 %v3180_v63 }
 0x79b   :  { %1218 = vmatpush.msra.mxu1 %v1167_v24 }
 0x7be   :  { %v1057_v52 = vpop.f32.mrf.mxu0 }
 0x7bf   :  { %v3192_v49 = vadd.f32 %v1057_v52, %v1014_v50 }
 0x7c1   :  { %v3195_v57 = vmul.f32 0.70710677, %v3192_v49  ;;  %v1064_v60 = vmul.f32 0.5, %v3192_v49 }
 0x7c3   :  { %v1072_v61 = vand.u32 2147483647, %v3195_v57  ;;  %vm1148_vm12 = vcmp.ge.f32.partialorder %v3195_v57, 0.0 }
 0x7c4   :  { %v1034_v62 = vpop.f32.mrf.mxu3 }
 0x7c5   :  { %v1076_v2 = vmul.f32 0.3275911, %v1072_v61  ;;  %v3201_v4 = vadd.f32 %v1034_v62, %v1013_v58  ;;  %v1124_v20 = vsub.f32 0.0, %v1072_v61 }
 0x7c7   :  { %v1080_v7 = vadd.f32 1.0, %v1076_v2  ;;  %v3204_v8 = vmul.f32 0.70710677, %v3201_v4  ;;  %v1128_v26 = vmul.f32 %v1124_v20, %v1072_v61  ;;  %v1063_v5 = vmul.f32 0.5, %v3201_v4 }
 0x7c9   :  { %2560 = vrcp.f32 %v1080_v7  ;;  %v1071_v3 = vand.u32 2147483647, %v3204_v8  ;;  %v1133_v32 = vmul.f32 1.442695, %v1128_v26  ;;  %vm1147_vm13 = vcmp.ge.f32.partialorder %v3204_v8, 0.0 }
 0x7cb   :  { %v1075_v13 = vmul.f32 0.3275911, %v1071_v3  ;;  %v1123_v28 = vsub.f32 0.0, %v1071_v3 }
 0x7cd   :  { %v1079_v17 = vadd.f32 1.0, %v1075_v13  ;;  %v1127_v34 = vmul.f32 %v1123_v28, %v1071_v3 }
 0x7cf   :  { %v2561_v19 = vpop.eup %2560  ;;  %2562 = vrcp.f32 %v1079_v17  ;;  %v1131_v40 = vmul.f32 1.442695, %v1127_v34 }
 0x7d0   :  { %v1088_v21 = vmul.f32 1.0614054, %v2561_v19  ;;  %2564 = vpow2.f32 %v1133_v32 }
 0x7d1   :  { %2566 = vpow2.f32 %v1131_v40 }
 0x7d2   :  { %v1092_v25 = vadd.f32 -1.4531521, %v1088_v21 }
 0x7d4   :  { %v1096_v15 = vmul.f32 %v2561_v19, %v1092_v25 }
 0x7d5   :  { %v2563_v27 = vpop.eup %2562 }
 0x7d6   :  { %v1100_v29 = vadd.f32 1.4214138, %v1096_v15  ;;  %v1087_v30 = vmul.f32 1.0614054, %v2563_v27  ;;  %v2565_v46 = vpop.eup %2564 }
 0x7d7   :  { %v2567_v55 = vpop.eup %2566 }
 0x7d8   :  { %v1104_v33 = vmul.f32 %v2561_v19, %v1100_v29  ;;  %v1091_v47 = vadd.f32 -1.4531521, %v1087_v30 }
 0x7da   :  { %v1108_v35 = vadd.f32 -0.28449672, %v1104_v33  ;;  %v1095_v36 = vmul.f32 %v2563_v27, %v1091_v47 }
 0x7dc   :  { %v1112_v38 = vmul.f32 %v2561_v19, %v1108_v35  ;;  %v1099_v39 = vadd.f32 1.4214138, %v1095_v36 }
 0x7de   :  { %v1116_v42 = vadd.f32 0.2548296, %v1112_v38  ;;  %v1103_v43 = vmul.f32 %v2563_v27, %v1099_v39 }
 0x7e0   :  { %v1120_v44 = vmul.f32 %v2561_v19, %v1116_v42  ;;  %v1107_v45 = vadd.f32 -0.28449672, %v1103_v43 }
 0x7e2   :  { %v1140_v48 = vmul.f32 %v2565_v46, %v1120_v44  ;;  %v1111_v51 = vmul.f32 %v2563_v27, %v1107_v45 }
 0x7e4   :  { %v1144_v37 = vsub.f32 1.0, %v1140_v48  ;;  %v1115_v52 = vadd.f32 0.2548296, %v1111_v51 }
 0x7e6   :  { %v1152_v53 = vsub.f32 0.0, %v1144_v37  ;;  %v1119_v54 = vmul.f32 %v2563_v27, %v1115_v52 }
 0x7e8   :  { %v1156_v56 = vsel %vm1148_vm12, %v1144_v37, %v1152_v53  ;;  %v1139_v59 = vmul.f32 %v2567_v55, %v1119_v54 }
 0x7e9   :  { %v1160_v61 = vadd.f32 1.0, %v1156_v56 }
 0x7ea   :  { %v1143_v62 = vsub.f32 1.0, %v1139_v59 }
 0x7eb   :  { %v1164_v0 = vmul.f32 %v1160_v61, %v1064_v60 }
 0x7ec   :  { %v1151_v1 = vsub.f32 0.0, %v1143_v62 }
 0x7ed   :  { %1242 = vmatmul.f32.vlgmr.msra.gmra.mxu2 %v1164_v0 }
 0x7ee   :  { %v1155_v2 = vsel %vm1147_vm13, %v1143_v62, %v1151_v1  ;;  %v2513_v62 = vld [vmem:[%s3427_s11] ss:$0 sm:$0xff] }
 0x7ef   :  { %v1159_v6 = vadd.f32 1.0, %v1155_v2 }
 0x7f1   :  { %v1163_v7 = vmul.f32 %v1159_v6, %v1063_v5 }
 0x7f3   :  { %1219 = vmatmul.f32.vlgmr.msra.gmra.mxu1 %v1163_v7 }
 0x817   :  { %v1060_v9 = vpop.f32.mrf.mxu0 }
 0x818   :  { %v1061_v57 = vadd.f32 %v1060_v9, %v1014_v50 }
 0x81a   :  { %v1070_v10 = vmul.f32 0.70710677, %v1061_v57  ;;  %v1066_v37 = vmul.f32 0.5, %v1061_v57 }
 0x81c   :  { %v1074_v3 = vand.u32 2147483647, %v1070_v10  ;;  %vm1150_vm14 = vcmp.ge.f32.partialorder %v1070_v10, 0.0 }
 0x81d   :  { %v1037_v49 = vpop.f32.mrf.mxu3 }
 0x81e   :  { %v1078_v11 = vmul.f32 0.3275911, %v1074_v3  ;;  %v1038_v12 = vadd.f32 %v1037_v49, %v1013_v58  ;;  %v1126_v18 = vsub.f32 0.0, %v1074_v3 }
 0x820   :  { %v1082_v13 = vadd.f32 1.0, %v1078_v11  ;;  %v1069_v8 = vmul.f32 0.70710677, %v1038_v12  ;;  %v1130_v21 = vmul.f32 %v1126_v18, %v1074_v3  ;;  %v1065_v59 = vmul.f32 0.5, %v1038_v12 }
 0x822   :  { %2568 = vrcp.f32 %v1082_v13  ;;  %v1073_v14 = vand.u32 2147483647, %v1069_v8  ;;  %v1137_v15 = vmul.f32 1.442695, %v1130_v21  ;;  %vm1149_vm15 = vcmp.ge.f32.partialorder %v1069_v8, 0.0  ;;  %v1349_v8 = vld [vmem:[#allocation8 + $0x2e8] sm:$0xff] }
 0x823   :  { %1361 = vmatpush.msra.mxu3 %v1349_v8  ;;  %v1344_v21 = vld [vmem:[#allocation8 + $0x2c0] sm:$0xff] }
 0x824   :  { %v1077_v16 = vmul.f32 0.3275911, %v1073_v14  ;;  %v1125_v24 = vsub.f32 0.0, %v1073_v14 }
 0x826   :  { %v1081_v4 = vadd.f32 1.0, %v1077_v16  ;;  %v1129_v27 = vmul.f32 %v1125_v24, %v1073_v14  ;;  %v1350_v14 = vld [vmem:[#allocation8 + $0x2f0] sm:$0xff]  ;;  %v1340_v24 = vld [vmem:[#allocation8 + $0x2a0] sm:$0xff] }
 0x827   :  { %1384 = vmatpush.msra.mxu0 %v1350_v14  ;;  %v1346_v16 = vld [vmem:[#allocation8 + $0x2d0] sm:$0xff] }
 0x828   :  { %v2569_v17 = vpop.eup %2568  ;;  %2570 = vrcp.f32 %v1081_v4  ;;  %v1135_v33 = vmul.f32 1.442695, %v1129_v27  ;;  %v1347_v4 = vld [vmem:[#allocation8 + $0x2d8] sm:$0xff]  ;;  %1362 = vmatpush.msra.mxu3 %v1346_v16  ;;  %v1334_v27 = vld [vmem:[#allocation8 + $0x270] sm:$0xff] }
 0x829   :  { %v1090_v19 = vmul.f32 1.0614054, %v2569_v17  ;;  %2572 = vpow2.f32 %v1137_v15  ;;  %1385 = vmatpush.msra.mxu0 %v1347_v4  ;;  %v1337_v15 = vld [vmem:[#allocation8 + $0x288] sm:$0xff] }
 0x82a   :  { %2574 = vpow2.f32 %v1135_v33  ;;  %v1333_v33 = vld [vmem:[#allocation8 + $0x268] sm:$0xff] }
 0x82b   :  { %v1094_v20 = vadd.f32 -1.4531521, %v1090_v19  ;;  %1386 = vmatpush.msra.mxu0 %v1344_v21 }
 0x82d   :  { %v1098_v50 = vmul.f32 %v2569_v17, %v1094_v20  ;;  %v1343_v20 = vld [vmem:[#allocation8 + $0x2b8] sm:$0xff] }
 0x82e   :  { %v2571_v22 = vpop.eup %2570  ;;  %1363 = vmatpush.msra.mxu3 %v1343_v20 }
 0x82f   :  { %v1102_v25 = vadd.f32 1.4214138, %v1098_v50  ;;  %v1089_v26 = vmul.f32 1.0614054, %v2571_v22  ;;  %v2573_v38 = vpop.eup %2572  ;;  %v1345_v50 = vld [vmem:[#allocation8 + $0x2c8] sm:$0xff] }
 0x830   :  { %v2575_v46 = vpop.eup %2574  ;;  %1364 = vmatpush.msra.mxu3 %v1340_v24 }
 0x831   :  { %v1106_v41 = vmul.f32 %v2569_v17, %v1102_v25  ;;  %v1093_v58 = vadd.f32 -1.4531521, %v1089_v26  ;;  %v1341_v25 = vld [vmem:[#allocation8 + $0x2a8] sm:$0xff]  ;;  %v1342_v26 = vld [vmem:[#allocation8 + $0x2b0] sm:$0xff] }
 0x832   :  { %1387 = vmatpush.msra.mxu0 %v1341_v25  ;;  %1365 = vmatpush.msra.mxu3 %v1337_v15 }
 0x833   :  { %v1110_v28 = vadd.f32 -0.28449672, %v1106_v41  ;;  %v1097_v29 = vmul.f32 %v2571_v22, %v1093_v58  ;;  %v1338_v41 = vld [vmem:[#allocation8 + $0x290] sm:$0xff]  ;;  %v1339_v58 = vld [vmem:[#allocation8 + $0x298] sm:$0xff] }
 0x834   :  { %1388 = vmatpush.msra.mxu0 %v1338_v41  ;;  %1366 = vmatpush.msra.mxu3 %v1334_v27 }
 0x835   :  { %v1114_v30 = vmul.f32 %v2569_v17, %v1110_v28  ;;  %v1101_v32 = vadd.f32 1.4214138, %v1097_v29  ;;  %v1335_v28 = vld [vmem:[#allocation8 + $0x278] sm:$0xff]  ;;  %v1336_v29 = vld [vmem:[#allocation8 + $0x280] sm:$0xff] }
 0x836   :  { %1389 = vmatpush.msra.mxu0 %v1335_v28 }
 0x837   :  { %v1118_v47 = vadd.f32 0.2548296, %v1114_v30  ;;  %v1105_v34 = vmul.f32 %v2571_v22, %v1101_v32  ;;  %v1331_v30 = vld [vmem:[#allocation8 + $0x258] sm:$0xff]  ;;  %v1332_v32 = vld [vmem:[#allocation8 + $0x260] sm:$0xff] }
 0x838   :  { %1367 = vmatpush.msra.mxu3 %v1331_v30  ;;  %1390 = vmatpush.msra.mxu0 %v1332_v32 }
 0x839   :  { %v1122_v35 = vmul.f32 %v2569_v17, %v1118_v47  ;;  %v1109_v36 = vadd.f32 -0.28449672, %v1105_v34  ;;  %v1348_v17 = vld [vmem:[#allocation8 + $0x2e0] sm:$0xff]  ;;  %v1329_v34 = vld [vmem:[#allocation8 + $0x248] sm:$0xff] }
 0x83a   :  { %v1328_v47 = vld [vmem:[#allocation8 + $0x240] sm:$0xff]  ;;  %1391 = vmatpush.msra.mxu0 %v1329_v34 }
 0x83b   :  { %v1142_v39 = vmul.f32 %v2573_v38, %v1122_v35  ;;  %v1113_v40 = vmul.f32 %v2571_v22, %v1109_v36  ;;  %v1330_v35 = vld [vmem:[#allocation8 + $0x250] sm:$0xff]  ;;  %1368 = vmatpush.msra.mxu3 %v1328_v47  ;;  %v1325_v36 = vld [vmem:[#allocation8 + $0x228] sm:$0xff] }
 0x83c   :  { %v1326_v38 = vld [vmem:[#allocation8 + $0x230] sm:$0xff] }
 0x83d   :  { %v1146_v42 = vsub.f32 1.0, %v1142_v39  ;;  %v1117_v43 = vadd.f32 0.2548296, %v1113_v40  ;;  %v1327_v39 = vld [vmem:[#allocation8 + $0x238] sm:$0xff]  ;;  %1369 = vmatpush.msra.mxu3 %v1325_v36  ;;  %1392 = vmatpush.msra.mxu0 %v1326_v38  ;;  %v1322_v40 = vld [vmem:[#allocation8 + $0x210] sm:$0xff] }
 0x83f   :  { %v1154_v44 = vsub.f32 0.0, %v1146_v42  ;;  %v1121_v45 = vmul.f32 %v2571_v22, %v1117_v43  ;;  %v1324_v43 = vld [vmem:[#allocation8 + $0x220] sm:$0xff]  ;;  %1370 = vmatpush.msra.mxu3 %v1322_v40 }
 0x841   :  { %v1158_v48 = vsel %vm1150_vm14, %v1146_v42, %v1154_v44  ;;  %v1141_v51 = vmul.f32 %v2575_v46, %v1121_v45  ;;  %v1323_v42 = vld [vmem:[#allocation8 + $0x218] sm:$0xff]  ;;  %v1320_v45 = vld [vmem:[#allocation8 + $0x200] sm:$0xff]  ;;  %v1321_v46 = vld [vmem:[#allocation8 + $0x208] sm:$0xff] }
 0x842   :  { %v1162_v52 = vadd.f32 1.0, %v1158_v48  ;;  %1393 = vmatpush.msra.mxu0 %v1323_v42  ;;  %v1319_v44 = vld [vmem:[#allocation8 + $0x1f8] sm:$0xff]  ;;  %v1316_v48 = vld [vmem:[#allocation8 + $0x1e0] sm:$0xff] }
 0x843   :  { %v1145_v53 = vsub.f32 1.0, %v1141_v51  ;;  %1371 = vmatpush.msra.mxu3 %v1319_v44  ;;  %v1317_v51 = vld [vmem:[#allocation8 + $0x1e8] sm:$0xff] }
 0x844   :  { %v1166_v54 = vmul.f32 %v1162_v52, %v1066_v37  ;;  %1394 = vmatpush.msra.mxu0 %v1320_v45  ;;  %v1318_v37 = vld [vmem:[#allocation8 + $0x1f0] sm:$0xff]  ;;  %v1313_v52 = vld [vmem:[#allocation8 + $0x1c8] sm:$0xff] }
 0x845   :  { %v1153_v55 = vsub.f32 0.0, %v1145_v53  ;;  %1372 = vmatpush.msra.mxu3 %v1316_v48 }
 0x846   :  { %1245 = vmatmul.f32.gmra.mxu2 %v1166_v54  ;;  %1395 = vmatpush.msra.mxu0 %v1317_v51  ;;  %v1315_v54 = vld [vmem:[#allocation8 + $0x1d8] sm:$0xff] }
 0x847   :  { %v1157_v56 = vsel %vm1149_vm15, %v1145_v53, %v1153_v55  ;;  %v1314_v53 = vld [vmem:[#allocation8 + $0x1d0] sm:$0xff]  ;;  %1373 = vmatpush.msra.mxu3 %v1313_v52  ;;  %v2636_v51 = vld [vmem:[#allocation6] ss:$0 sm:$0xff] }
 0x848   :  { %v1161_v60 = vadd.f32 1.0, %v1157_v56  ;;  %1396 = vmatpush.msra.mxu0 %v1314_v53  ;;  %v1310_v55 = vld [vmem:[#allocation8 + $0x1b0] sm:$0xff]  ;;  %v1311_v56 = vld [vmem:[#allocation8 + $0x1b8] sm:$0xff] }
 0x849   :  { %1374 = vmatpush.msra.mxu3 %v1310_v55 }
 0x84a   :  { %v1165_v61 = vmul.f32 %v1161_v60, %v1065_v59  ;;  %v1312_v59 = vld [vmem:[#allocation8 + $0x1c0] sm:$0xff]  ;;  %v1307_v60 = vld [vmem:[#allocation8 + $0x198] sm:$0xff]  ;;  %1397 = vmatpush.msra.mxu0 %v1311_v56 }
 0x84b   :  { %1375 = vmatpush.msra.mxu3 %v1307_v60 }
 0x84c   :  { %1222 = vmatmul.f32.gmra.mxu1 %v1165_v61  ;;  %v1308_v61 = vld [vmem:[#allocation8 + $0x1a0] sm:$0xff] }
 0x84d   :  { %1398 = vmatpush.msra.mxu0 %v1308_v61 }
 0x870   :  { %v1220_v0 = vpop.f32.mrf.mxu1  ;;  %v1243_v2 = vpop.f32.mrf.mxu2 }
 0x871   :  { %v1221_v1 = vadd.f32 %v2513_v62, %v1220_v0  ;;  %v1304_v0 = vld [vmem:[#allocation8 + $0x180] sm:$0xff] }
 0x872   :  { %1376 = vmatpush.msra.mxu3 %v1304_v0 }
 0x873   :  { %v1244_v5 = vadd.f32 %v1243_v2, %v1221_v1  ;;  %v1305_v1 = vld [vmem:[#allocation8 + $0x188] sm:$0xff]  ;;  %v1306_v2 = vld [vmem:[#allocation8 + $0x190] sm:$0xff] }
 0x874   :  { %1399 = vmatpush.msra.mxu0 %v1305_v1 }
 0x875   :  { %v1249_v6 = vadd.f32 %v1244_v5, %v3174_v23  ;;  %v1351_v23 = vld [vmem:[#allocation8 + $0x2f8] sm:$0xff] }
 0x876   :  { %1407 = vmatpush.msrb.mxu1 %v1351_v23  ;;  %v2515_v23 = vld [vmem:[%s3429_s13] ss:$0 sm:$0xff] }
 0x877   :  { %1253 = vadd.xlane.f32.xlu0 %v1249_v6 }
 0x878   :  { %1408 = vmatpush.msrb.mxu1 %v1348_v17 }
 0x87a   :  { %1409 = vmatpush.msrb.mxu1 %v1345_v50 }
 0x87c   :  { %1410 = vmatpush.msrb.mxu1 %v1342_v26 }
 0x87e   :  { %1411 = vmatpush.msrb.mxu1 %v1339_v58  ;;  %v3250_v58 = vld [vmem:[#allocation9 + $0x3] sm:$0x7] }
 0x87f   :  { %v1356_v27 = vperm.slane %v3250_v58, 1  ;;  %v1357_v28 = vperm.slane %v3250_v58, 2 }
 0x880   :  { %1412 = vmatpush.msrb.mxu1 %v1336_v29 }
 0x882   :  { %1413 = vmatpush.msrb.mxu1 %v1333_v33  ;;  %v1355_v33 = vperm.slane %v3250_v58, 0 }
 0x884   :  { %1414 = vmatpush.msrb.mxu1 %v1330_v35 }
 0x886   :  { %1415 = vmatpush.msrb.mxu1 %v1327_v39 }
 0x888   :  { %1416 = vmatpush.msrb.mxu1 %v1324_v43 }
 0x88a   :  { %1417 = vmatpush.msrb.mxu1 %v1321_v46 }
 0x88c   :  { %1418 = vmatpush.msrb.mxu1 %v1318_v37 }
 0x88e   :  { %1419 = vmatpush.msrb.mxu1 %v1315_v54 }
 0x890   :  { %1420 = vmatpush.msrb.mxu1 %v1312_v59 }
 0x8c9   :  { %v1223_v7 = vpop.f32.mrf.mxu1  ;;  %v1246_v57 = vpop.f32.mrf.mxu2 }
 0x8ca   :  { %v1224_v9 = vadd.f32 %v2513_v62, %v1223_v7  ;;  %v1309_v62 = vld [vmem:[#allocation8 + $0x1a8] sm:$0xff] }
 0x8cb   :  { %1421 = vmatpush.msrb.mxu1 %v1309_v62 }
 0x8cc   :  { %v1247_v10 = vadd.f32 %v1246_v57, %v1224_v9 }
 0x8cd   :  { %1422 = vmatpush.msrb.mxu1 %v1306_v2 }
 0x8ce   :  { %v1250_v3 = vadd.f32 %v1247_v10, %v3180_v63 }
 0x8d0   :  { %1255 = vadd.xlane.f32.xlu2 %v1250_v3 }
 0x8ea   :  { %v1254_v49 = vpop.xlane.xlu0 %1253 }
 0x8eb   :  { %v1257_v11 = vmul.f32 %v1254_v49, %v3160_v31 }
 0x8ed   :  { %v3221_v12 = vsub.f32 %v1249_v6, %v1257_v11 }
 0x8ef   :  { %v1261_v13 = vmul.f32 %v3221_v12, %v3221_v12 }
 0x8f1   :  { %1263 = vadd.xlane.f32.xlu0 %v1261_v13  ;;  %v2514_v13 = vld [vmem:[%s3428_s12] ss:$0 sm:$0xff] }
 0x943   :  { %v1256_v63 = vpop.xlane.xlu2 %1255 }
 0x944   :  { %v1258_v18 = vmul.f32 %v1256_v63, %v3160_v31 }
 0x946   :  { %v3226_v19 = vsub.f32 %v1250_v3, %v1258_v18 }
 0x948   :  { %v1262_v22 = vmul.f32 %v3226_v19, %v3226_v19 }
 0x94a   :  { %1265 = vadd.xlane.f32.xlu1 %v1262_v22 }
 0x964   :  { %v1264_v5 = vpop.xlane.xlu0 %1263 }
 0x965   :  { %v1267_v6 = vmul.f32 %v1264_v5, %v3160_v31 }
 0x967   :  { %v1269_v7 = vadd.f32 1e-05, %v1267_v6 }
 0x969   :  { %2576 = vrsqrt.f32 %v1269_v7  ;;  %vm1277_vm6 = vweird.f32 %v1269_v7 }
 0x96f   :  { %v2577_v9 = vpop.eup %2576 }
 0x970   :  { %v1272_v57 = vmul.f32 %v2577_v9, %v1269_v7  ;;  %vm1278_vm5 = vweird.f32 %v2577_v9 }
 0x971   :  { %vm1279_vm7 = vmor %vm1277_vm6, %vm1278_vm5 }
 0x972   :  { %v1273_v10 = vmul.f32 %v2577_v9, %v1272_v57 }
 0x974   :  { %v1274_v3 = vmul.f32 0.5, %v1273_v10 }
 0x976   :  { %v1275_v49 = vsub.f32 1.5, %v1274_v3 }
 0x978   :  { %v1276_v11 = vmul.f32 %v2577_v9, %v1275_v49 }
 0x97a   :  { %v1280_v8 = vsel %vm1279_vm7, %v2577_v9, %v1276_v11 }
 0x97b   :  { %v1291_v14 = vmul.f32 %v1280_v8, %v3221_v12 }
 0x97d   :  { %v1296_v16 = vmul.f32 %v2514_v13, %v1291_v14  ;;  %v2637_v14 = vld [vmem:[#allocation6 + $0x1] ss:$0 sm:$0xff] }
 0x97f   :  { %v3238_v4 = vadd.f32 %v2515_v23, %v1296_v16 }
 0x981   :  { %1377 = vmatmul.f32.vlgmr.msra.gmra.mxu3 %v3238_v4  ;;  %1400 = vmatmul.f32.vlgmr.msra.gmra.mxu0 %v3238_v4 }
 0x982   :  { %1423 = vmatmul.f32.vlgmr.msrb.gmra.mxu1 %v3238_v4 }
 0x9bd   :  { %v1266_v17 = vpop.xlane.xlu1 %1265 }
 0x9be   :  { %v1268_v63 = vmul.f32 %v1266_v17, %v3160_v31 }
 0x9c0   :  { %v1270_v18 = vadd.f32 1e-05, %v1268_v63 }
 0x9c2   :  { %2578 = vrsqrt.f32 %v1270_v18  ;;  %vm1287_vm9 = vweird.f32 %v1270_v18 }
 0x9c8   :  { %v2579_v20 = vpop.eup %2578 }
 0x9c9   :  { %v1282_v12 = vmul.f32 %v2579_v20, %v1270_v18  ;;  %vm1288_vm8 = vweird.f32 %v2579_v20 }
 0x9ca   :  { %vm1289_vm10 = vmor %vm1287_vm9, %vm1288_vm8 }
 0x9cb   :  { %v1283_v21 = vmul.f32 %v2579_v20, %v1282_v12 }
 0x9cd   :  { %v1284_v50 = vmul.f32 0.5, %v1283_v21 }
 0x9cf   :  { %v1285_v22 = vsub.f32 1.5, %v1284_v50 }
 0x9d1   :  { %v1286_v24 = vmul.f32 %v2579_v20, %v1285_v22 }
 0x9d3   :  { %v1290_v25 = vsel %vm1289_vm10, %v2579_v20, %v1286_v24 }
 0x9d4   :  { %v1292_v26 = vmul.f32 %v1290_v25, %v3226_v19 }
 0x9d6   :  { %v1297_v15 = vmul.f32 %v2514_v13, %v1292_v26 }
 0x9d8   :  { %v3245_v41 = vadd.f32 %v2515_v23, %v1297_v15 }
 0x9da   :  { %1380 = vmatmul.f32.gmra.mxu3 %v3245_v41  ;;  %1403 = vmatmul.f32.gmra.mxu0 %v3245_v41 }
 0x9db   :  { %1426 = vmatmul.f32.gmra.mxu1 %v3245_v41 }
 0x9fe   :  { %v1401_v29 = vpop.f32.mrf.mxu0 }
 0x9ff   :  { %v1402_v30 = vadd.f32 %v1401_v29, %v1356_v27  ;;  %v1424_v32 = vpop.f32.mrf.mxu1 }
 0xa00   :  { %v3256_v19 = vadd.f32 %v1424_v32, %v1357_v28 }
 0xa01   :  { %1493 = vrot.lane.b32.xlu1 %v1402_v30, %s2908_s10  ;;  %1564 = vrot.lane.b32.xlu2 %v1402_v30, %s2909_s21 }
 0xa02   :  { %1483 = vmatpush.msrb.mxu3 %v3256_v19  ;;  %2456 = vmatpush.xpose.msk.msrb.mxu2 %vm324_vm0, %v1402_v30 }
 0xa04   :  { %v1378_v47 = vpop.f32.mrf.mxu3 }
 0xa05   :  { %v1379_v34 = vadd.f32 %v1378_v47, %v1355_v33 }
 0xa07   :  { %1562 = vrot.lane.b32.xlu0 %v1379_v34, %s2909_s21  ;;  %2457 = vmatmul.msk.f32.vlgmr.msrb.gmra.mxu2 %vm324_vm0, %v1379_v34 }
 0xa09   :  { %1632 = vrot.lane.b32.xlu1 %v1379_v34, %s2910_s22  ;;  %1491 = vrot.lane.b32.xlu2 %v1379_v34, %s2908_s10 }
 0xa0f   :  { %1634 = vrot.lane.b32.xlu0 %v1402_v30, %s2910_s22 }
 0xa57   :  { %v1404_v35 = vpop.f32.mrf.mxu0 }
 0xa58   :  { %v1405_v36 = vadd.f32 %v1404_v35, %v1356_v27  ;;  %v1427_v11 = vpop.f32.mrf.mxu1 }
 0xa59   :  { %v1428_v13 = vadd.f32 %v1427_v11, %v1357_v28 }
 0xa5a   :  { %1765 = vrot.lane.b32.xlu1 %v1405_v36, %s2908_s10  ;;  %1836 = vrot.lane.b32.xlu2 %v1405_v36, %s2909_s21 }
 0xa5b   :  { %v1565_v38 = vpop.permute.xlu2 %1564 }
 0xa5c   :  { %2462 = vmatpush.xpose.msk.msra.mxu2 %vm324_vm0, %v1565_v38 }
 0xa5d   :  { %v1381_v39 = vpop.f32.mrf.mxu3 }
 0xa5e   :  { %v1382_v40 = vadd.f32 %v1381_v39, %v1355_v33 }
 0xa60   :  { %2468 = vmatpush.xpose.msk.msrb.mxu2 %vm324_vm0, %v1405_v36  ;;  %1834 = vrot.lane.b32.xlu0 %v1382_v40, %s2909_s21 }
 0xa62   :  { %1904 = vrot.lane.b32.xlu1 %v1382_v40, %s2910_s22  ;;  %1763 = vrot.lane.b32.xlu2 %v1382_v40, %s2908_s10 }
 0xa63   :  { %v1492_v43 = vpop.permute.xlu2 %1491 }
 0xa68   :  { %1906 = vrot.lane.b32.xlu0 %v1405_v36, %s2910_s22 }
 0xa73   :  { %v1494_v42 = vpop.permute.xlu1 %1493 }
 0xa74   :  { %2459 = vmatpush.xpose.msk.msrb.mxu0 %vm324_vm0, %v1494_v42 }
 0xa77   :  { %2460 = vmatmul.msk.f32.vlgmr.msrb.gmra.mxu0 %vm324_vm0, %v1492_v43 }
 0xa79   :  { %v1563_v44 = vpop.permute.xlu0 %1562 }
 0xa7a   :  { %2463 = vmatmul.msk.f32.vlgmr.msra.gmra.mxu2 %vm324_vm0, %v1563_v44 }
 0xa7b   :  { %v1633_v46 = vpop.permute.xlu1 %1632 }
 0xa81   :  { %v1635_v45 = vpop.permute.xlu0 %1634 }
 0xa82   :  { %2465 = vmatpush.xpose.msk.msra.mxu0 %vm324_vm0, %v1635_v45  ;;  %2469 = vmatmul.msk.f32.vlgmr.msrb.gmra.mxu2 %vm324_vm0, %v1382_v40 }
 0xa85   :  { %2466 = vmatmul.msk.f32.vlgmr.msra.gmra.mxu0 %vm324_vm0, %v1633_v46 }
 0xa8a   :  { %v1453_v48 = vpop.f32.mrf.mxu2 }
 0xa8b   :  { %v1454_v37 = vadd.f32 %v2636_v51, %v1453_v48 }
 0xa8d   :  { %v1456_v52 = vsel %vm351_vm1, %v1454_v37, -inf }
 0xa8e   :  { %1457 = vmax.xlane.f32.xlu2 %v1456_v52 }
 0xab4   :  { %v1837_v53 = vpop.permute.xlu2 %1836 }
 0xab5   :  { %2474 = vmatpush.xpose.msk.msra.mxu2 %vm324_vm0, %v1837_v53 }
 0xabc   :  { %v1764_v55 = vpop.permute.xlu2 %1763 }
 0xacc   :  { %v1766_v54 = vpop.permute.xlu1 %1765 }
 0xacd   :  { %2471 = vmatpush.xpose.msk.msrb.mxu0 %vm324_vm0, %v1766_v54 }
 0xad0   :  { %2472 = vmatmul.msk.f32.vlgmr.msrb.gmra.mxu0 %vm324_vm0, %v1764_v55 }
 0xad2   :  { %v1835_v56 = vpop.permute.xlu0 %1834 }
 0xad3   :  { %2475 = vmatmul.msk.f32.vlgmr.msra.gmra.mxu2 %vm324_vm0, %v1835_v56 }
 0xad4   :  { %v1905_v60 = vpop.permute.xlu1 %1904 }
 0xada   :  { %v1907_v59 = vpop.permute.xlu0 %1906 }
 0xadb   :  { %2477 = vmatpush.xpose.msk.msra.mxu0 %vm324_vm0, %v1907_v59 }
 0xade   :  { %2478 = vmatmul.msk.f32.vlgmr.msra.gmra.mxu0 %vm324_vm0, %v1905_v60 }
 0xaf4   :  { %v1516_v61 = vpop.f32.mrf.mxu0 }
 0xaf5   :  { %v1517_v62 = vadd.f32 %v2636_v51, %v1516_v61 }
 0xaf7   :  { %v1519_v0 = vsel %vm351_vm1, %v1517_v62, -inf }
 0xaf8   :  { %1520 = vmax.xlane.f32.xlu0 %v1519_v0 }
 0xafd   :  { %v1587_v1 = vpop.f32.mrf.mxu2 }
 0xafe   :  { %v1588_v2 = vadd.f32 %v2636_v51, %v1587_v1 }
 0xb00   :  { %v1590_v5 = vsel %vm351_vm1, %v1588_v2, -inf }
 0xb01   :  { %1591 = vmax.xlane.f32.xlu1 %v1590_v5  ;;  %v1458_v6 = vpop.xlane.xlu2 %1457 }
 0xb02   :  { %v1459_v7 = vsub.f32 %v1454_v37, %v1458_v6  ;;  %v1657_v9 = vpop.f32.mrf.mxu0 }
 0xb03   :  { %v1658_v57 = vadd.f32 %v2636_v51, %v1657_v9 }
 0xb04   :  { %v1460_v10 = vmul.f32 1.442695, %v1459_v7 }
 0xb05   :  { %v1660_v3 = vsel %vm351_vm1, %v1658_v57, -inf  ;;  %v1725_v8 = vpop.f32.mrf.mxu2 }
 0xb06   :  { %2580 = vpow2.f32 %v1460_v10  ;;  %1661 = vmax.xlane.f32.xlu2 %v1660_v3  ;;  %v1726_v23 = vadd.f32 %v2637_v14, %v1725_v8 }
 0xb08   :  { %v1728_v16 = vsel %vm351_vm1, %v1726_v23, -inf }
 0xb0c   :  { %v2581_v49 = vpop.eup %2580  ;;  %1669 = vrot.lane.b32.xlu0 %v3256_v19, %s2910_s22 }
 0xb0d   :  { %2458 = vmatmul.msk.f32.vlgmr.msrb.gmra.mxu3 %vm351_vm1, %v2581_v49  ;;  %v1462_v44 = vsel %vm351_vm1, %v2581_v49, 0.0 }
 0xb1a   :  { %1599 = vrot.lane.b32.xlu1 %v3256_v19, %s2909_s21 }
 0xb1e   :  { %1529 = vrot.lane.b32.xlu2 %v3256_v19, %s2908_s10 }
 0xb22   :  { %1801 = vrot.lane.b32.xlu1 %v1428_v13, %s2908_s10 }
 0xb2a   :  { %1871 = vrot.lane.b32.xlu1 %v1428_v13, %s2909_s21 }
 0xb36   :  { %1729 = vmax.xlane.f32.xlu0 %v1728_v16 }
 0xb4d   :  { %v1788_v17 = vpop.f32.mrf.mxu0 }
 0xb4e   :  { %v1789_v63 = vadd.f32 %v2637_v14, %v1788_v17 }
 0xb50   :  { %v1791_v18 = vsel %vm351_vm1, %v1789_v63, -inf }
 0xb51   :  { %1792 = vmax.xlane.f32.xlu0 %v1791_v18 }
 0xb56   :  { %v1859_v20 = vpop.f32.mrf.mxu2 }
 0xb57   :  { %v1860_v12 = vadd.f32 %v2637_v14, %v1859_v20 }
 0xb59   :  { %v1862_v21 = vsel %vm351_vm1, %v1860_v12, -inf }
 0xb5a   :  { %1863 = vmax.xlane.f32.xlu0 %v1862_v21 }
 0xb5b   :  { %v1929_v50 = vpop.f32.mrf.mxu0 }
 0xb5c   :  { %v1930_v22 = vadd.f32 %v2637_v14, %v1929_v50 }
 0xb5e   :  { %v1932_v24 = vsel %vm351_vm1, %v1930_v22, -inf }
 0xb5f   :  { %1933 = vmax.xlane.f32.xlu2 %v1932_v24  ;;  %v1991_v24 = vld [vmem:[#allocation11 + $0xf0] sm:$0xff] }
 0xb6b   :  { %v1521_v25 = vpop.xlane.xlu0 %1520 }
 0xb6c   :  { %v1522_v26 = vsub.f32 %v1517_v62, %v1521_v25 }
 0xb6e   :  { %v1523_v15 = vmul.f32 1.442695, %v1522_v26  ;;  %1941 = vrot.lane.b32.xlu0 %v1428_v13, %s2910_s22 }
 0xb70   :  { %2582 = vpow2.f32 %v1523_v15 }
 0xb74   :  { %v1592_v30 = vpop.xlane.xlu1 %1591 }
 0xb75   :  { %v1593_v19 = vsub.f32 %v1588_v2, %v1592_v30  ;;  %v1990_v30 = vld [vmem:[#allocation11 + $0xe8] sm:$0xff] }
 0xb76   :  { %v2583_v58 = vpop.eup %2582 }
 0xb77   :  { %v1525_v27 = vsel %vm351_vm1, %v2583_v58, 0.0  ;;  %v1594_v47 = vmul.f32 1.442695, %v1593_v19  ;;  %v1988_v19 = vld [vmem:[#allocation11 + $0xd8] sm:$0xff] }
 0xb78   :  { %1526 = vadd.xlane.f32.xlu1 %v1525_v27 }
 0xb79   :  { %v1662_v28 = vpop.xlane.xlu2 %1661 }
 0xb7a   :  { %v1663_v29 = vsub.f32 %v1658_v57, %v1662_v28 }
 0xb7c   :  { %v1664_v32 = vmul.f32 1.442695, %v1663_v29 }
 0xb7e   :  { %2584 = vpow2.f32 %v1664_v32  ;;  %v1670_v34 = vpop.permute.xlu0 %1669  ;;  %v1989_v32 = vld [vmem:[#allocation11 + $0xe0] sm:$0xff] }
 0xb7f   :  { %2586 = vpow2.f32 %v1594_v47 }
 0xb81   :  { %v1530_v33 = vpop.permute.xlu2 %1529 }
 0xb82   :  { %1550 = vmatpush.msra.mxu1 %v1530_v33  ;;  %v1987_v33 = vld [vmem:[#allocation11 + $0xd0] sm:$0xff] }
 0xb83   :  { %2461 = vmatmul.msk.f32.vlgmr.msra.gmra.mxu1 %vm351_vm1, %v2583_v58 }
 0xb84   :  { %v2585_v35 = vpop.eup %2584  ;;  %1690 = vmatpush.msrb.mxu1 %v1670_v34 }
 0xb85   :  { %v1666_v36 = vsel %vm351_vm1, %v2585_v35, 0.0  ;;  %v2587_v39 = vpop.eup %2586 }
 0xb86   :  { %1667 = vadd.xlane.f32.xlu2 %v1666_v36  ;;  %v1596_v42 = vsel %vm351_vm1, %v2587_v39, 0.0  ;;  %v1986_v36 = vld [vmem:[#allocation11 + $0xc8] sm:$0xff] }
 0xb8b   :  { %2467 = vmatmul.msk.f32.vlgmr.msrb.gmra.mxu1 %vm351_vm1, %v2585_v35 }
 0xb8c   :  { %v1600_v38 = vpop.permute.xlu1 %1599 }
 0xb8d   :  { %1620 = vmatpush.msra.mxu3 %v1600_v38 }
 0xb8e   :  { %2464 = vmatmul.msk.f32.vlgmr.msra.gmra.mxu3 %vm351_vm1, %v2587_v39 }
 0xb8f   :  { %1755 = vmatpush.msrb.mxu3 %v1428_v13 }
 0xb90   :  { %v1485_v14 = vpop.f32.mrf.mxu3 }
 0xb94   :  { %v1802_v40 = vpop.permute.xlu1 %1801 }
 0xb95   :  { %1822 = vmatpush.msra.mxu1 %v1802_v40  ;;  %v1985_v40 = vld [vmem:[#allocation11 + $0xc0] sm:$0xff] }
 0xb98   :  { %1597 = vadd.xlane.f32.xlu0 %v1596_v42 }
 0xb9c   :  { %v1872_v43 = vpop.permute.xlu1 %1871 }
 0xb9d   :  { %1892 = vmatpush.msra.mxu3 %v1872_v43 }
 0xba0   :  { %1463 = vadd.xlane.f32.xlu0 %v1462_v44 }
 0xba9   :  { %v1730_v45 = vpop.xlane.xlu0 %1729 }
 0xbaa   :  { %v1731_v46 = vsub.f32 %v1726_v23, %v1730_v45  ;;  %v1984_v45 = vld [vmem:[#allocation11 + $0xb8] sm:$0xff] }
 0xbac   :  { %v1732_v48 = vmul.f32 1.442695, %v1731_v46  ;;  %v1983_v46 = vld [vmem:[#allocation11 + $0xb0] sm:$0xff] }
 0xbae   :  { %2588 = vpow2.f32 %v1732_v48  ;;  %v1982_v48 = vld [vmem:[#allocation11 + $0xa8] sm:$0xff] }
 0xbb4   :  { %v2589_v51 = vpop.eup %2588 }
 0xbb5   :  { %2470 = vmatmul.msk.f32.vlgmr.msrb.gmra.mxu3 %vm351_vm1, %v2589_v51  ;;  %v1734_v9 = vsel %vm351_vm1, %v2589_v51, 0.0  ;;  %v1981_v51 = vld [vmem:[#allocation11 + $0xa0] sm:$0xff] }
 0xbc4   :  { %v1793_v37 = vpop.xlane.xlu0 %1792 }
 0xbc5   :  { %v1794_v52 = vsub.f32 %v1789_v63, %v1793_v37  ;;  %v1980_v37 = vld [vmem:[#allocation11 + $0x98] sm:$0xff] }
 0xbc7   :  { %v1795_v53 = vmul.f32 1.442695, %v1794_v52  ;;  %v1979_v52 = vld [vmem:[#allocation11 + $0x90] sm:$0xff] }
 0xbc9   :  { %2590 = vpow2.f32 %v1795_v53  ;;  %v1978_v53 = vld [vmem:[#allocation11 + $0x88] sm:$0xff] }
 0xbcd   :  { %v1864_v54 = vpop.xlane.xlu0 %1863 }
 0xbce   :  { %v1865_v55 = vsub.f32 %v1860_v12, %v1864_v54  ;;  %v1977_v54 = vld [vmem:[#allocation11 + $0x80] sm:$0xff] }
 0xbcf   :  { %v2591_v56 = vpop.eup %2590 }
 0xbd0   :  { %v1866_v59 = vmul.f32 1.442695, %v1865_v55  ;;  %2473 = vmatmul.msk.f32.vlgmr.msra.gmra.mxu1 %vm351_vm1, %v2591_v56  ;;  %v1797_v60 = vsel %vm351_vm1, %v2591_v56, 0.0 }
 0xbd1   :  { %1798 = vadd.xlane.f32.xlu2 %v1797_v60 }
 0xbd2   :  { %2592 = vpow2.f32 %v1866_v59  ;;  %v1934_v61 = vpop.xlane.xlu2 %1933 }
 0xbd3   :  { %v1935_v62 = vsub.f32 %v1930_v22, %v1934_v61  ;;  %v1992_v22 = vld [vmem:[#allocation11 + $0xf8] sm:$0xff] }
 0xbd4   :  { %1998 = vmatpush.msrb.mxu2 %v1992_v22  ;;  %v2101_v22 = vld [vmem:[#allocation15 + $0x1b8] sm:$0xff] }
 0xbd5   :  { %v1936_v0 = vmul.f32 1.442695, %v1935_v62 }
 0xbd6   :  { %1999 = vmatpush.msrb.mxu2 %v1991_v24  ;;  %v2098_v24 = vld [vmem:[#allocation15 + $0x1a0] sm:$0xff] }
 0xbd7   :  { %2594 = vpow2.f32 %v1936_v0 }
 0xbd8   :  { %v2593_v1 = vpop.eup %2592  ;;  %2000 = vmatpush.msrb.mxu2 %v1990_v30  ;;  %v2090_v30 = vld [vmem:[#allocation15 + $0x160] sm:$0xff] }
 0xbd9   :  { %2476 = vmatmul.msk.f32.vlgmr.msra.gmra.mxu3 %vm351_vm1, %v2593_v1  ;;  %v1868_v2 = vsel %vm351_vm1, %v2593_v1, 0.0 }
 0xbda   :  { %1869 = vadd.xlane.f32.xlu2 %v1868_v2  ;;  %2001 = vmatpush.msrb.mxu2 %v1989_v32  ;;  %v2516_v2 = vld [vmem:[%s3421_s5 + $0x1] ss:$0 sm:$0xff]  ;;  %v2091_v32 = vld [vmem:[#allocation15 + $0x168] sm:$0xff] }
 0xbdc   :  { %2002 = vmatpush.msrb.mxu2 %v1988_v19  ;;  %v2088_v19 = vld [vmem:[#allocation15 + $0x150] sm:$0xff] }
 0xbdd   :  { %v2595_v5 = vpop.eup %2594 }
 0xbde   :  { %v1938_v6 = vsel %vm351_vm1, %v2595_v5, 0.0  ;;  %2003 = vmatpush.msrb.mxu2 %v1987_v33  ;;  %v2089_v33 = vld [vmem:[#allocation15 + $0x158] sm:$0xff] }
 0xbdf   :  { %1939 = vadd.xlane.f32.xlu1 %v1938_v6 }
 0xbe0   :  { %v1942_v7 = vpop.permute.xlu0 %1941  ;;  %2004 = vmatpush.msrb.mxu2 %v1986_v36  ;;  %v2085_v36 = vld [vmem:[#allocation15 + $0x138] sm:$0xff] }
 0xbe1   :  { %1962 = vmatpush.msrb.mxu1 %v1942_v7 }
 0xbe2   :  { %1735 = vadd.xlane.f32.xlu2 %v1734_v9  ;;  %2479 = vmatmul.msk.f32.vlgmr.msrb.gmra.mxu1 %vm351_vm1, %v2595_v5 }
 0xbe3   :  { %2005 = vmatpush.msrb.mxu2 %v1985_v40  ;;  %v2080_v40 = vld [vmem:[#allocation15 + $0x110] sm:$0xff] }
 0xbe5   :  { %2006 = vmatpush.msrb.mxu2 %v1984_v45 }
 0xbe7   :  { %2007 = vmatpush.msrb.mxu2 %v1983_v46 }
 0xbe9   :  { %2008 = vmatpush.msrb.mxu2 %v1982_v48 }
 0xbeb   :  { %v1527_v57 = vpop.xlane.xlu1 %1526  ;;  %2009 = vmatpush.msrb.mxu2 %v1981_v51 }
 0xbec   :  { %2596 = vrcp.f32 %v1527_v57 }
 0xbed   :  { %2010 = vmatpush.msrb.mxu2 %v1980_v37 }
 0xbef   :  { %2011 = vmatpush.msrb.mxu2 %v1979_v52 }
 0xbf1   :  { %2012 = vmatpush.msrb.mxu2 %v1978_v53 }
 0xbf2   :  { %v2597_v3 = vpop.eup %2596 }
 0xbf3   :  { %2013 = vmatpush.msrb.mxu2 %v1977_v54 }
 0xbf9   :  { %v1668_v10 = vpop.xlane.xlu2 %1667 }
 0xbfa   :  { %2598 = vrcp.f32 %v1668_v10 }
 0xc00   :  { %v1552_v49 = vpop.f32.mrf.mxu1  ;;  %v2599_v13 = vpop.eup %2598 }
 0xc01   :  { %v1556_v11 = vmul.f32 %v2597_v3, %v1552_v49 }
 0xc03   :  { %1558 = vrot.lane.b32.xlu1 %v1556_v11, %s2910_s22 }
 0xc08   :  { %v1692_v8 = vpop.f32.mrf.mxu1 }
 0xc09   :  { %v1696_v23 = vmul.f32 %v2599_v13, %v1692_v8  ;;  %v2108_v8 = vld [vmem:[#allocation15 + $0x1f0] sm:$0xff] }
 0xc0a   :  { %2117 = vmatpush.msrb.mxu3 %v2108_v8 }
 0xc0b   :  { %v1598_v16 = vpop.xlane.xlu0 %1597  ;;  %1698 = vrot.lane.b32.xlu2 %v1696_v23, %s2908_s10  ;;  %v2106_v23 = vld [vmem:[#allocation15 + $0x1e0] sm:$0xff] }
 0xc0c   :  { %2600 = vrcp.f32 %v1598_v16  ;;  %2118 = vmatpush.msrb.mxu3 %v2106_v23  ;;  %v2298_v23 = vld [vmem:[#allocation17 + $0x1f0] sm:$0xff] }
 0xc11   :  { %v1622_v17 = vpop.f32.mrf.mxu3 }
 0xc12   :  { %v2601_v63 = vpop.eup %2600 }
 0xc13   :  { %v1626_v18 = vmul.f32 %v2601_v63, %v1622_v17  ;;  %v1464_v20 = vpop.xlane.xlu0 %1463 }
 0xc14   :  { %2602 = vrcp.f32 %v1464_v20  ;;  %v2105_v20 = vld [vmem:[#allocation15 + $0x1d8] sm:$0xff] }
 0xc15   :  { %1628 = vrot.lane.b32.xlu0 %v1626_v18, %s2909_s21  ;;  %v2104_v18 = vld [vmem:[#allocation15 + $0x1d0] sm:$0xff] }
 0xc16   :  { %2119 = vmatpush.msrb.mxu3 %v2104_v18  ;;  %v2295_v18 = vld [vmem:[#allocation17 + $0x1d8] sm:$0xff] }
 0xc1a   :  { %v2603_v12 = vpop.eup %2602 }
 0xc1b   :  { %v1489_v21 = vmul.f32 %v2603_v12, %v1485_v14  ;;  %v2109_v14 = vld [vmem:[#allocation15 + $0x1f8] sm:$0xff]  ;;  %v2102_v12 = vld [vmem:[#allocation15 + $0x1c0] sm:$0xff] }
 0xc1c   :  { %2140 = vmatpush.msrb.mxu0 %v2109_v14  ;;  %2120 = vmatpush.msrb.mxu3 %v2102_v12  ;;  %v2299_v14 = vld [vmem:[#allocation17 + $0x1f8] sm:$0xff]  ;;  %v2294_v12 = vld [vmem:[#allocation17 + $0x1d0] sm:$0xff] }
 0xc1d   :  { %1490 = vst.msk [vmem:[#allocation2] sm:$0xff] %vm324_vm0, %v1489_v21  ;;  %v2103_v21 = vld [vmem:[#allocation15 + $0x1c8] sm:$0xff]  ;;  %2328 = vmatpush.msra.mxu2 %v2299_v14 }
 0xc1f   :  { %2329 = vmatpush.msra.mxu2 %v2298_v23 }
 0xc38   :  { %v1757_v27 = vpop.f32.mrf.mxu3 }
 0xc44   :  { %v1799_v50 = vpop.xlane.xlu2 %1798 }
 0xc45   :  { %2604 = vrcp.f32 %v1799_v50  ;;  %v2100_v50 = vld [vmem:[#allocation15 + $0x1b0] sm:$0xff] }
 0xc46   :  { %2121 = vmatpush.msrb.mxu3 %v2100_v50  ;;  %v2293_v50 = vld [vmem:[#allocation17 + $0x1c8] sm:$0xff] }
 0xc48   :  { %2122 = vmatpush.msrb.mxu3 %v2098_v24  ;;  %v2279_v24 = vld [vmem:[#allocation17 + $0x158] sm:$0xff] }
 0xc4b   :  { %v2605_v25 = vpop.eup %2604 }
 0xc4d   :  { %v1824_v26 = vpop.f32.mrf.mxu1  ;;  %v1870_v15 = vpop.xlane.xlu2 %1869 }
 0xc4e   :  { %v1828_v58 = vmul.f32 %v2605_v25, %v1824_v26  ;;  %2606 = vrcp.f32 %v1870_v15  ;;  %v2099_v25 = vld [vmem:[#allocation15 + $0x1a8] sm:$0xff]  ;;  %v2096_v26 = vld [vmem:[#allocation15 + $0x190] sm:$0xff]  ;;  %v2097_v15 = vld [vmem:[#allocation15 + $0x198] sm:$0xff] }
 0xc4f   :  { %2123 = vmatpush.msrb.mxu3 %v2096_v26 }
 0xc50   :  { %1830 = vrot.lane.b32.xlu0 %v1828_v58, %s2910_s22  ;;  %v2094_v58 = vld [vmem:[#allocation15 + $0x180] sm:$0xff] }
 0xc51   :  { %2124 = vmatpush.msrb.mxu3 %v2094_v58  ;;  %v2291_v58 = vld [vmem:[#allocation17 + $0x1b8] sm:$0xff] }
 0xc52   :  { %v1940_v29 = vpop.xlane.xlu1 %1939 }
 0xc54   :  { %v2607_v47 = vpop.eup %2606 }
 0xc55   :  { %v1736_v28 = vpop.xlane.xlu2 %1735 }
 0xc56   :  { %2608 = vrcp.f32 %v1736_v28  ;;  %v2092_v28 = vld [vmem:[#allocation15 + $0x170] sm:$0xff] }
 0xc57   :  { %2610 = vrcp.f32 %v1940_v29  ;;  %v2093_v29 = vld [vmem:[#allocation15 + $0x178] sm:$0xff]  ;;  %2125 = vmatpush.msrb.mxu3 %v2092_v28  ;;  %v2277_v28 = vld [vmem:[#allocation17 + $0x148] sm:$0xff] }
 0xc59   :  { %2126 = vmatpush.msrb.mxu3 %v2090_v30 }
 0xc5b   :  { %2127 = vmatpush.msrb.mxu3 %v2088_v19  ;;  %v2276_v19 = vld [vmem:[#allocation17 + $0x140] sm:$0xff] }
 0xc5c   :  { %v2609_v34 = vpop.eup %2608  ;;  %v1894_v35 = vpop.f32.mrf.mxu3 }
 0xc5d   :  { %v1761_v38 = vmul.f32 %v2609_v34, %v1757_v27  ;;  %v1898_v39 = vmul.f32 %v2607_v47, %v1894_v35  ;;  %v2611_v42 = vpop.eup %2610  ;;  %v2095_v27 = vld [vmem:[#allocation15 + $0x188] sm:$0xff]  ;;  %v2086_v47 = vld [vmem:[#allocation15 + $0x140] sm:$0xff]  ;;  %v2084_v35 = vld [vmem:[#allocation15 + $0x130] sm:$0xff] }
 0xc5e   :  { %v2087_v34 = vld [vmem:[#allocation15 + $0x148] sm:$0xff]  ;;  %2128 = vmatpush.msrb.mxu3 %v2086_v47 }
 0xc5f   :  { %1762 = vst.msk [vmem:[#allocation2 + $0x8] sm:$0xff] %vm324_vm0, %v1761_v38  ;;  %v1964_v43 = vpop.f32.mrf.mxu1  ;;  %1900 = vrot.lane.b32.xlu1 %v1898_v39, %s2909_s21  ;;  %v2082_v38 = vld [vmem:[#allocation15 + $0x120] sm:$0xff]  ;;  %v2083_v39 = vld [vmem:[#allocation15 + $0x128] sm:$0xff] }
 0xc60   :  { %v1968_v44 = vmul.f32 %v2611_v42, %v1964_v43  ;;  %2129 = vmatpush.msrb.mxu3 %v2084_v35  ;;  %v2081_v42 = vld [vmem:[#allocation15 + $0x118] sm:$0xff]  ;;  %v2078_v43 = vld [vmem:[#allocation15 + $0x100] sm:$0xff] }
 0xc61   :  { %v2275_v35 = vld [vmem:[#allocation17 + $0x138] sm:$0xff] }
 0xc62   :  { %1970 = vrot.lane.b32.xlu2 %v1968_v44, %s2908_s10  ;;  %2130 = vmatpush.msrb.mxu3 %v2082_v38  ;;  %v2079_v44 = vld [vmem:[#allocation15 + $0x108] sm:$0xff] }
 0xc64   :  { %2131 = vmatpush.msrb.mxu3 %v2080_v40  ;;  %v2274_v40 = vld [vmem:[#allocation17 + $0x130] sm:$0xff] }
 0xc65   :  { %v1699_v59 = vpop.permute.xlu2 %1698 }
 0xc66   :  { %2132 = vmatpush.msrb.mxu3 %v2078_v43 }
 0xc75   :  { %v1559_v55 = vpop.permute.xlu1 %1558 }
 0xc76   :  { %1561 = vst.msk [vmem:[#allocation2] sm:$0xff] %vm457_vm2, %v1559_v55 }
 0xc87   :  { %v1629_v56 = vpop.permute.xlu0 %1628 }
 0xc88   :  { %1631 = vst.msk [vmem:[#allocation2] sm:$0xff] %vm528_vm3, %v1629_v56  ;;  %v2517_v56 = vld [vmem:[#allocation12 + $0x1] ss:$0 sm:$0xff] }
 0xc89   :  { %1701 = vst.msk [vmem:[#allocation2] sm:$0xff] %vm599_vm4, %v1699_v59 }
 0xc90   :  { %v1974_v60 = vld [vmem:[#allocation2] sm:$0xff] }
 0xc91   :  { %2014 = vmatmul.f32.vlgmr.msrb.gmra.mxu2 %v1974_v60 }
 0xcbc   :  { %v1971_v0 = vpop.permute.xlu2 %1970 }
 0xcc2   :  { %v1831_v61 = vpop.permute.xlu0 %1830 }
 0xcc3   :  { %1833 = vst.msk [vmem:[#allocation2 + $0x8] sm:$0xff] %vm457_vm2, %v1831_v61  ;;  %v2518_v61 = vld [vmem:[#allocation14 + $0x1] ss:$0 sm:$0xff] }
 0xcd1   :  { %v1901_v62 = vpop.permute.xlu1 %1900 }
 0xcd2   :  { %1903 = vst.msk [vmem:[#allocation2 + $0x8] sm:$0xff] %vm528_vm3, %v1901_v62 }
 0xcd3   :  { %1973 = vst.msk [vmem:[#allocation2 + $0x8] sm:$0xff] %vm599_vm4, %v1971_v0 }
 0xcda   :  { %v1975_v1 = vld [vmem:[#allocation2 + $0x8] sm:$0xff] }
 0xcdb   :  { %2017 = vmatmul.f32.gmra.mxu2 %v1975_v1 }
 0xd14   :  { %v2015_v5 = vpop.f32.mrf.mxu2 }
 0xd15   :  { %v2016_v6 = vadd.f32 %v2516_v2, %v2015_v5 }
 0xd17   :  { %v2021_v7 = vadd.f32 %v2016_v6, %v3238_v4  ;;  %v2107_v4 = vld [vmem:[#allocation15 + $0x1e8] sm:$0xff] }
 0xd18   :  { %2141 = vmatpush.msrb.mxu0 %v2107_v4  ;;  %v2297_v4 = vld [vmem:[#allocation17 + $0x1e8] sm:$0xff] }
 0xd19   :  { %2027 = vadd.xlane.f32.xlu0 %v2021_v7  ;;  %2330 = vmatpush.msra.mxu2 %v2297_v4 }
 0xd1a   :  { %2142 = vmatpush.msrb.mxu0 %v2105_v20  ;;  %v2281_v20 = vld [vmem:[#allocation17 + $0x168] sm:$0xff] }
 0xd1c   :  { %2143 = vmatpush.msrb.mxu0 %v2103_v21  ;;  %v2280_v21 = vld [vmem:[#allocation17 + $0x160] sm:$0xff] }
 0xd1e   :  { %2144 = vmatpush.msrb.mxu0 %v2101_v22 }
 0xd20   :  { %2145 = vmatpush.msrb.mxu0 %v2099_v25  ;;  %v2292_v25 = vld [vmem:[#allocation17 + $0x1c0] sm:$0xff] }
 0xd22   :  { %2146 = vmatpush.msrb.mxu0 %v2097_v15  ;;  %v2278_v15 = vld [vmem:[#allocation17 + $0x150] sm:$0xff] }
 0xd24   :  { %2147 = vmatpush.msrb.mxu0 %v2095_v27 }
 0xd26   :  { %2148 = vmatpush.msrb.mxu0 %v2093_v29  ;;  %v2290_v29 = vld [vmem:[#allocation17 + $0x1b0] sm:$0xff] }
 0xd28   :  { %2149 = vmatpush.msrb.mxu0 %v2091_v32 }
 0xd2a   :  { %2150 = vmatpush.msrb.mxu0 %v2089_v33  ;;  %v2289_v33 = vld [vmem:[#allocation17 + $0x1a8] sm:$0xff] }
 0xd2c   :  { %2151 = vmatpush.msrb.mxu0 %v2087_v34 }
 0xd2e   :  { %2152 = vmatpush.msrb.mxu0 %v2085_v36  ;;  %v2288_v36 = vld [vmem:[#allocation17 + $0x1a0] sm:$0xff] }
 0xd30   :  { %2153 = vmatpush.msrb.mxu0 %v2083_v39 }
 0xd32   :  { %2154 = vmatpush.msrb.mxu0 %v2081_v42  ;;  %v2287_v42 = vld [vmem:[#allocation17 + $0x198] sm:$0xff] }
 0xd34   :  { %2155 = vmatpush.msrb.mxu0 %v2079_v44 }
 0xd5e   :  { %v2018_v9 = vpop.f32.mrf.mxu2 }
 0xd5f   :  { %v2019_v57 = vadd.f32 %v2516_v2, %v2018_v9 }
 0xd61   :  { %v2022_v10 = vadd.f32 %v2019_v57, %v3245_v41 }
 0xd63   :  { %2029 = vadd.xlane.f32.xlu1 %v2022_v10 }
 0xd8c   :  { %v2028_v3 = vpop.xlane.xlu0 %2027 }
 0xd8d   :  { %v2031_v49 = vmul.f32 %v2028_v3, %v3160_v31 }
 0xd8f   :  { %v3343_v11 = vsub.f32 %v2021_v7, %v2031_v49 }
 0xd91   :  { %v2035_v13 = vmul.f32 %v3343_v11, %v3343_v11 }
 0xd93   :  { %2037 = vadd.xlane.f32.xlu2 %v2035_v13 }
 0xdd6   :  { %v2030_v16 = vpop.xlane.xlu1 %2029 }
 0xdd7   :  { %v2032_v41 = vmul.f32 %v2030_v16, %v3160_v31  ;;  %v2283_v16 = vld [vmem:[#allocation17 + $0x178] sm:$0xff] }
 0xdd8   :  { %2305 = vmatpush.msra.mxu1 %v2283_v16 }
 0xdd9   :  { %v3348_v17 = vsub.f32 %v2022_v10, %v2032_v41  ;;  %v2296_v41 = vld [vmem:[#allocation17 + $0x1e0] sm:$0xff] }
 0xdda   :  { %2331 = vmatpush.msra.mxu2 %v2296_v41 }
 0xddb   :  { %v2036_v63 = vmul.f32 %v3348_v17, %v3348_v17 }
 0xddc   :  { %2332 = vmatpush.msra.mxu2 %v2295_v18 }
 0xddd   :  { %2039 = vadd.xlane.f32.xlu0 %v2036_v63  ;;  %v2282_v63 = vld [vmem:[#allocation17 + $0x170] sm:$0xff] }
 0xdde   :  { %2306 = vmatpush.msra.mxu1 %v2282_v63  ;;  %2333 = vmatpush.msra.mxu2 %v2294_v12 }
 0xde0   :  { %2307 = vmatpush.msra.mxu1 %v2281_v20  ;;  %2334 = vmatpush.msra.mxu2 %v2293_v50 }
 0xde2   :  { %2308 = vmatpush.msra.mxu1 %v2280_v21  ;;  %2335 = vmatpush.msra.mxu2 %v2292_v25 }
 0xde4   :  { %2309 = vmatpush.msra.mxu1 %v2279_v24  ;;  %2336 = vmatpush.msra.mxu2 %v2291_v58 }
 0xde6   :  { %2310 = vmatpush.msra.mxu1 %v2278_v15  ;;  %2337 = vmatpush.msra.mxu2 %v2290_v29 }
 0xde8   :  { %2311 = vmatpush.msra.mxu1 %v2277_v28  ;;  %2338 = vmatpush.msra.mxu2 %v2289_v33 }
 0xdea   :  { %2312 = vmatpush.msra.mxu1 %v2276_v19  ;;  %2339 = vmatpush.msra.mxu2 %v2288_v36 }
 0xdec   :  { %2313 = vmatpush.msra.mxu1 %v2275_v35  ;;  %2340 = vmatpush.msra.mxu2 %v2287_v42 }
 0xdee   :  { %2314 = vmatpush.msra.mxu1 %v2274_v40 }
 0xe06   :  { %v2038_v45 = vpop.xlane.xlu2 %2037 }
 0xe07   :  { %v2041_v46 = vmul.f32 %v2038_v45, %v3160_v31  ;;  %v2273_v45 = vld [vmem:[#allocation17 + $0x128] sm:$0xff] }
 0xe08   :  { %2315 = vmatpush.msra.mxu1 %v2273_v45 }
 0xe09   :  { %v2043_v48 = vadd.f32 1e-05, %v2041_v46  ;;  %v2286_v46 = vld [vmem:[#allocation17 + $0x190] sm:$0xff] }
 0xe0a   :  { %2341 = vmatpush.msra.mxu2 %v2286_v46 }
 0xe0b   :  { %2612 = vrsqrt.f32 %v2043_v48  ;;  %vm2051_vm1 = vweird.f32 %v2043_v48 }
 0xe11   :  { %v2613_v51 = vpop.eup %2612 }
 0xe12   :  { %v2046_v37 = vmul.f32 %v2613_v51, %v2043_v48  ;;  %vm2052_vm0 = vweird.f32 %v2613_v51 }
 0xe13   :  { %vm2053_vm2 = vmor %vm2051_vm1, %vm2052_vm0 }
 0xe14   :  { %v2047_v52 = vmul.f32 %v2613_v51, %v2046_v37  ;;  %v2285_v37 = vld [vmem:[#allocation17 + $0x188] sm:$0xff] }
 0xe15   :  { %2342 = vmatpush.msra.mxu2 %v2285_v37 }
 0xe16   :  { %v2048_v53 = vmul.f32 0.5, %v2047_v52 }
 0xe18   :  { %v2049_v54 = vsub.f32 1.5, %v2048_v53  ;;  %v2271_v53 = vld [vmem:[#allocation17 + $0x118] sm:$0xff] }
 0xe1a   :  { %v2050_v55 = vmul.f32 %v2613_v51, %v2049_v54  ;;  %v2284_v54 = vld [vmem:[#allocation17 + $0x180] sm:$0xff] }
 0xe1b   :  { %2343 = vmatpush.msra.mxu2 %v2284_v54 }
 0xe1c   :  { %v2054_v59 = vsel %vm2053_vm2, %v2613_v51, %v2050_v55  ;;  %v2272_v51 = vld [vmem:[#allocation17 + $0x120] sm:$0xff] }
 0xe1d   :  { %v2065_v60 = vmul.f32 %v2054_v59, %v3343_v11  ;;  %2316 = vmatpush.msra.mxu1 %v2272_v51 }
 0xe1f   :  { %v2070_v62 = vmul.f32 %v2517_v56, %v2065_v60  ;;  %2317 = vmatpush.msra.mxu1 %v2271_v53 }
 0xe21   :  { %v3354_v0 = vadd.f32 %v2518_v61, %v2070_v62  ;;  %v2269_v62 = vld [vmem:[#allocation17 + $0x108] sm:$0xff] }
 0xe23   :  { %2133 = vmatmul.f32.vlgmr.msrb.gmra.mxu3 %v3354_v0  ;;  %2156 = vmatmul.f32.vlgmr.msrb.gmra.mxu0 %v3354_v0 }
 0xe50   :  { %v2040_v1 = vpop.xlane.xlu0 %2039 }
 0xe51   :  { %v2042_v2 = vmul.f32 %v2040_v1, %v3160_v31  ;;  %v2268_v1 = vld [vmem:[#allocation17 + $0x100] sm:$0xff] }
 0xe53   :  { %v2044_v5 = vadd.f32 1e-05, %v2042_v2 }
 0xe55   :  { %2614 = vrsqrt.f32 %v2044_v5  ;;  %vm2061_vm4 = vweird.f32 %v2044_v5 }
 0xe5b   :  { %v2615_v6 = vpop.eup %2614 }
 0xe5c   :  { %v2056_v7 = vmul.f32 %v2615_v6, %v2044_v5  ;;  %vm2062_vm3 = vweird.f32 %v2615_v6 }
 0xe5d   :  { %vm2063_vm11 = vmor %vm2061_vm4, %vm2062_vm3 }
 0xe5e   :  { %v2057_v9 = vmul.f32 %v2615_v6, %v2056_v7 }
 0xe60   :  { %v2058_v57 = vmul.f32 0.5, %v2057_v9 }
 0xe62   :  { %v2059_v10 = vsub.f32 1.5, %v2058_v57 }
 0xe64   :  { %v2060_v3 = vmul.f32 %v2615_v6, %v2059_v10 }
 0xe66   :  { %v2064_v49 = vsel %vm2063_vm11, %v2615_v6, %v2060_v3 }
 0xe67   :  { %v2066_v11 = vmul.f32 %v2064_v49, %v3348_v17  ;;  %v3367_v17 = vld [vmem:[%s3425_s9 + $0x2] sm:$0x3] }
 0xe68   :  { %v2114_v22 = vperm.slane %v3367_v17, 1  ;;  %v2113_v32 = vperm.slane %v3367_v17, 0 }
 0xe69   :  { %v2071_v13 = vmul.f32 %v2517_v56, %v2066_v11  ;;  %v2270_v56 = vld [vmem:[#allocation17 + $0x110] sm:$0xff] }
 0xe6a   :  { %2318 = vmatpush.msra.mxu1 %v2270_v56 }
 0xe6b   :  { %v3360_v8 = vadd.f32 %v2518_v61, %v2071_v13 }
 0xe6c   :  { %2319 = vmatpush.msra.mxu1 %v2269_v62 }
 0xe6d   :  { %2136 = vmatmul.f32.gmra.mxu3 %v3360_v8  ;;  %2159 = vmatmul.f32.gmra.mxu0 %v3360_v8 }
 0xe6e   :  { %2320 = vmatpush.msra.mxu1 %v2268_v1 }
 0xea0   :  { %v2157_v26 = vpop.f32.mrf.mxu0 }
 0xea1   :  { %v3372_v27 = vadd.f32 %v2157_v26, %v2114_v22 }
 0xea3   :  { %v3375_v30 = vmul.f32 0.70710677, %v3372_v27  ;;  %v2164_v33 = vmul.f32 0.5, %v3372_v27 }
 0xea5   :  { %v2172_v47 = vand.u32 2147483647, %v3375_v30  ;;  %vm2248_vm12 = vcmp.ge.f32.partialorder %v3375_v30, 0.0 }
 0xea6   :  { %v2134_v34 = vpop.f32.mrf.mxu3 }
 0xea7   :  { %v2176_v38 = vmul.f32 0.3275911, %v2172_v47  ;;  %v3381_v39 = vadd.f32 %v2134_v34, %v2113_v32  ;;  %v2224_v60 = vsub.f32 0.0, %v2172_v47 }
 0xea9   :  { %v2180_v43 = vadd.f32 1.0, %v2176_v38  ;;  %v3384_v44 = vmul.f32 0.70710677, %v3381_v39  ;;  %v2228_v5 = vmul.f32 %v2224_v60, %v2172_v47  ;;  %v2163_v40 = vmul.f32 0.5, %v3381_v39 }
 0xeab   :  { %2616 = vrcp.f32 %v2180_v43  ;;  %v2171_v48 = vand.u32 2147483647, %v3384_v44  ;;  %v2233_v3 = vmul.f32 1.442695, %v2228_v5  ;;  %vm2247_vm13 = vcmp.ge.f32.partialorder %v3384_v44, 0.0 }
 0xead   :  { %v2175_v52 = vmul.f32 0.3275911, %v2171_v48  ;;  %v2223_v9 = vsub.f32 0.0, %v2171_v48 }
 0xeaf   :  { %v2179_v55 = vadd.f32 1.0, %v2175_v52  ;;  %v2227_v13 = vmul.f32 %v2223_v9, %v2171_v48 }
 0xeb1   :  { %v2617_v59 = vpop.eup %2616  ;;  %2618 = vrcp.f32 %v2179_v55  ;;  %v2231_v41 = vmul.f32 1.442695, %v2227_v13 }
 0xeb2   :  { %v2188_v61 = vmul.f32 1.0614054, %v2617_v59  ;;  %2620 = vpow2.f32 %v2233_v3 }
 0xeb3   :  { %2622 = vpow2.f32 %v2231_v41 }
 0xeb4   :  { %v2192_v2 = vadd.f32 -1.4531521, %v2188_v61 }
 0xeb6   :  { %v2196_v6 = vmul.f32 %v2617_v59, %v2192_v2 }
 0xeb7   :  { %v2619_v7 = vpop.eup %2618 }
 0xeb8   :  { %v2200_v57 = vadd.f32 1.4214138, %v2196_v6  ;;  %v2187_v10 = vmul.f32 1.0614054, %v2619_v7  ;;  %v2621_v21 = vpop.eup %2620 }
 0xeb9   :  { %v2623_v28 = vpop.eup %2622 }
 0xeba   :  { %v2204_v49 = vmul.f32 %v2617_v59, %v2200_v57  ;;  %v2191_v11 = vadd.f32 -1.4531521, %v2187_v10 }
 0xebc   :  { %v2208_v14 = vadd.f32 -0.28449672, %v2204_v49  ;;  %v2195_v23 = vmul.f32 %v2619_v7, %v2191_v11 }
 0xebe   :  { %v2212_v4 = vmul.f32 %v2617_v59, %v2208_v14  ;;  %v2199_v16 = vadd.f32 1.4214138, %v2195_v23 }
 0xec0   :  { %v2216_v63 = vadd.f32 0.2548296, %v2212_v4  ;;  %v2203_v18 = vmul.f32 %v2619_v7, %v2199_v16 }
 0xec2   :  { %v2220_v20 = vmul.f32 %v2617_v59, %v2216_v63  ;;  %v2207_v12 = vadd.f32 -0.28449672, %v2203_v18 }
 0xec4   :  { %v2240_v50 = vmul.f32 %v2621_v21, %v2220_v20  ;;  %v2211_v24 = vmul.f32 %v2619_v7, %v2207_v12 }
 0xec6   :  { %v2244_v25 = vsub.f32 1.0, %v2240_v50  ;;  %v2215_v26 = vadd.f32 0.2548296, %v2211_v24 }
 0xec8   :  { %v2252_v15 = vsub.f32 0.0, %v2244_v25  ;;  %v2219_v58 = vmul.f32 %v2619_v7, %v2215_v26 }
 0xeca   :  { %v2256_v29 = vsel %vm2248_vm12, %v2244_v25, %v2252_v15  ;;  %v2239_v19 = vmul.f32 %v2623_v28, %v2219_v58 }
 0xecb   :  { %v2260_v47 = vadd.f32 1.0, %v2256_v29 }
 0xecc   :  { %v2243_v34 = vsub.f32 1.0, %v2239_v19 }
 0xecd   :  { %v2264_v35 = vmul.f32 %v2260_v47, %v2164_v33 }
 0xece   :  { %v2251_v36 = vsub.f32 0.0, %v2243_v34 }
 0xecf   :  { %2344 = vmatmul.f32.vlgmr.msra.gmra.mxu2 %v2264_v35 }
 0xed0   :  { %v2255_v38 = vsel %vm2247_vm13, %v2243_v34, %v2251_v36  ;;  %v2519_v34 = vld [vmem:[%s3427_s11 + $0x1] ss:$0 sm:$0xff] }
 0xed1   :  { %v2259_v42 = vadd.f32 1.0, %v2255_v38 }
 0xed3   :  { %v2263_v43 = vmul.f32 %v2259_v42, %v2163_v40 }
 0xed5   :  { %2321 = vmatmul.f32.vlgmr.msra.gmra.mxu1 %v2263_v43 }
 0xeea   :  { %v2160_v45 = vpop.f32.mrf.mxu0 }
 0xeeb   :  { %v2161_v30 = vadd.f32 %v2160_v45, %v2114_v22 }
 0xeed   :  { %v2170_v46 = vmul.f32 0.70710677, %v2161_v30  ;;  %v2166_v25 = vmul.f32 0.5, %v2161_v30 }
 0xeef   :  { %v2174_v48 = vand.u32 2147483647, %v2170_v46  ;;  %vm2250_vm14 = vcmp.ge.f32.partialorder %v2170_v46, 0.0 }
 0xef0   :  { %v2137_v27 = vpop.f32.mrf.mxu3 }
 0xef1   :  { %v2178_v51 = vmul.f32 0.3275911, %v2174_v48  ;;  %v2138_v37 = vadd.f32 %v2137_v27, %v2113_v32  ;;  %v2226_v56 = vsub.f32 0.0, %v2174_v48 }
 0xef3   :  { %v2182_v52 = vadd.f32 1.0, %v2178_v51  ;;  %v2169_v44 = vmul.f32 0.70710677, %v2138_v37  ;;  %v2230_v61 = vmul.f32 %v2226_v56, %v2174_v48  ;;  %v2165_v19 = vmul.f32 0.5, %v2138_v37 }
 0xef5   :  { %2624 = vrcp.f32 %v2182_v52  ;;  %v2173_v53 = vand.u32 2147483647, %v2169_v44  ;;  %v2237_v6 = vmul.f32 1.442695, %v2230_v61  ;;  %vm2249_vm15 = vcmp.ge.f32.partialorder %v2169_v44, 0.0 }
 0xef7   :  { %v2177_v54 = vmul.f32 0.3275911, %v2173_v53  ;;  %v2225_v1 = vsub.f32 0.0, %v2173_v53 }
 0xef9   :  { %v2181_v39 = vadd.f32 1.0, %v2177_v54  ;;  %v2229_v7 = vmul.f32 %v2225_v1, %v2173_v53  ;;  %v2520_v1 = vld [vmem:[%s3428_s12 + $0x1] ss:$0 sm:$0xff]  ;;  %s2912_s12 = smov [#allocation18]  }
 0xefb   :  { %v2625_v55 = vpop.eup %2624  ;;  %2626 = vrcp.f32 %v2181_v39  ;;  %v2235_v49 = vmul.f32 1.442695, %v2229_v7 }
 0xefc   :  { %v2190_v59 = vmul.f32 1.0614054, %v2625_v55  ;;  %2628 = vpow2.f32 %v2237_v6  ;;  %v2521_v6 = vld [vmem:[%s3429_s13 + $0x1] ss:$0 sm:$0xff]  ;;  %s2413_s13 = sshll.u32 %s2912_s12, 4  ;;  %s2414_s13 = int_to_ptr.vmem [resolvable:$true] %s2413_s13 }
 0xefd   :  { %2630 = vpow2.f32 %v2235_v49 }
 0xefe   :  { %v2194_v60 = vadd.f32 -1.4531521, %v2190_v59 }
 0xf00   :  { %v2198_v22 = vmul.f32 %v2625_v55, %v2194_v60 }
 0xf01   :  { %v2627_v62 = vpop.eup %2626 }
 0xf02   :  { %v2202_v2 = vadd.f32 1.4214138, %v2198_v22  ;;  %v2189_v5 = vmul.f32 1.0614054, %v2627_v62  ;;  %v2629_v4 = vpop.eup %2628 }
 0xf03   :  { %v2631_v21 = vpop.eup %2630 }
 0xf04   :  { %v2206_v17 = vmul.f32 %v2625_v55, %v2202_v2  ;;  %v2193_v32 = vadd.f32 -1.4531521, %v2189_v5 }
 0xf06   :  { %v2210_v9 = vadd.f32 -0.28449672, %v2206_v17  ;;  %v2197_v57 = vmul.f32 %v2627_v62, %v2193_v32 }
 0xf08   :  { %v2214_v10 = vmul.f32 %v2625_v55, %v2210_v9  ;;  %v2201_v3 = vadd.f32 1.4214138, %v2197_v57 }
 0xf0a   :  { %v2218_v11 = vadd.f32 0.2548296, %v2214_v10  ;;  %v2205_v13 = vmul.f32 %v2627_v62, %v2201_v3 }
 0xf0c   :  { %v2222_v14 = vmul.f32 %v2625_v55, %v2218_v11  ;;  %v2209_v23 = vadd.f32 -0.28449672, %v2205_v13 }
 0xf0e   :  { %v2242_v16 = vmul.f32 %v2629_v4, %v2222_v14  ;;  %v2213_v41 = vmul.f32 %v2627_v62, %v2209_v23 }
 0xf10   :  { %v2246_v63 = vsub.f32 1.0, %v2242_v16  ;;  %v2217_v18 = vadd.f32 0.2548296, %v2213_v41 }
 0xf12   :  { %v2254_v20 = vsub.f32 0.0, %v2246_v63  ;;  %v2221_v12 = vmul.f32 %v2627_v62, %v2217_v18 }
 0xf14   :  { %v2258_v50 = vsel %vm2250_vm14, %v2246_v63, %v2254_v20  ;;  %v2241_v24 = vmul.f32 %v2631_v21, %v2221_v12 }
 0xf15   :  { %v2262_v26 = vadd.f32 1.0, %v2258_v50 }
 0xf16   :  { %v2245_v15 = vsub.f32 1.0, %v2241_v24 }
 0xf17   :  { %v2266_v58 = vmul.f32 %v2262_v26, %v2166_v25 }
 0xf18   :  { %v2253_v28 = vsub.f32 0.0, %v2245_v15 }
 0xf19   :  { %2347 = vmatmul.f32.gmra.mxu2 %v2266_v58 }
 0xf1a   :  { %v2257_v29 = vsel %vm2249_vm15, %v2245_v15, %v2253_v28 }
 0xf1b   :  { %v2261_v33 = vadd.f32 1.0, %v2257_v29 }
 0xf1d   :  { %v2265_v47 = vmul.f32 %v2261_v33, %v2165_v19 }
 0xf1f   :  { %2324 = vmatmul.f32.gmra.mxu1 %v2265_v47 }
 0xf52   :  { %v2322_v35 = vpop.f32.mrf.mxu1  ;;  %v2345_v38 = vpop.f32.mrf.mxu2 }
 0xf53   :  { %v2323_v36 = vadd.f32 %v2519_v34, %v2322_v35 }
 0xf55   :  { %v2346_v40 = vadd.f32 %v2345_v38, %v2323_v36 }
 0xf57   :  { %v2351_v42 = vadd.f32 %v2346_v40, %v3354_v0 }
 0xf59   :  { %2357 = vadd.xlane.f32.xlu1 %v2351_v42 }
 0xf9c   :  { %v2325_v43 = vpop.f32.mrf.mxu1  ;;  %v2348_v30 = vpop.f32.mrf.mxu2 }
 0xf9d   :  { %v2326_v45 = vadd.f32 %v2519_v34, %v2325_v43 }
 0xf9f   :  { %v2349_v46 = vadd.f32 %v2348_v30, %v2326_v45 }
 0xfa1   :  { %v2352_v48 = vadd.f32 %v2349_v46, %v3360_v8 }
 0xfa3   :  { %2359 = vadd.xlane.f32.xlu2 %v2352_v48 }
 0xfcc   :  { %v2358_v27 = vpop.xlane.xlu1 %2357 }
 0xfcd   :  { %v2361_v51 = vmul.f32 %v2358_v27, %v3160_v31 }
 0xfcf   :  { %v2363_v37 = vsub.f32 %v2351_v42, %v2361_v51 }
 0xfd1   :  { %v2365_v52 = vmul.f32 %v2363_v37, %v2363_v37 }
 0xfd3   :  { %2367 = vadd.xlane.f32.xlu0 %v2365_v52 }
0x1016   :  { %v2360_v44 = vpop.xlane.xlu2 %2359 }
0x1017   :  { %v2362_v53 = vmul.f32 %v2360_v44, %v3160_v31 }
0x1019   :  { %v2364_v54 = vsub.f32 %v2352_v48, %v2362_v53 }
0x101b   :  { %v2366_v39 = vmul.f32 %v2364_v54, %v2364_v54 }
0x101d   :  { %2369 = vadd.xlane.f32.xlu1 %v2366_v39 }
0x1046   :  { %v2368_v0 = vpop.xlane.xlu0 %2367 }
0x1047   :  { %v2371_v55 = vmul.f32 %v2368_v0, %v3160_v31 }
0x1049   :  { %v2373_v56 = vadd.f32 1e-05, %v2371_v55 }
0x104b   :  { %2632 = vrsqrt.f32 %v2373_v56  ;;  %vm2381_vm6 = vweird.f32 %v2373_v56 }
0x1051   :  { %v2633_v59 = vpop.eup %2632 }
0x1052   :  { %v2376_v8 = vmul.f32 %v2633_v59, %v2373_v56  ;;  %vm2382_vm5 = vweird.f32 %v2633_v59 }
0x1053   :  { %vm2383_vm7 = vmor %vm2381_vm6, %vm2382_vm5 }
0x1054   :  { %v2377_v60 = vmul.f32 %v2633_v59, %v2376_v8 }
0x1056   :  { %v2378_v61 = vmul.f32 0.5, %v2377_v60 }
0x1058   :  { %v2379_v22 = vsub.f32 1.5, %v2378_v61 }
0x105a   :  { %v2380_v62 = vmul.f32 %v2633_v59, %v2379_v22 }
0x105c   :  { %v2384_v2 = vsel %vm2383_vm7, %v2633_v59, %v2380_v62 }
0x105d   :  { %v2395_v5 = vmul.f32 %v2384_v2, %v2363_v37 }
0x105f   :  { %v2400_v17 = vmul.f32 %v2520_v1, %v2395_v5 }
0x1061   :  { %v2405_v32 = vadd.f32 %v2521_v6, %v2400_v17 }
0x1063   :  { %2407 = vst [vmem:[#allocation18] sm:$0xff] %v2405_v32 }
0x1090   :  { %v2370_v7 = vpop.xlane.xlu1 %2369 }
0x1091   :  { %v2372_v9 = vmul.f32 %v2370_v7, %v3160_v31 }
0x1093   :  { %v2374_v57 = vadd.f32 1e-05, %v2372_v9 }
0x1095   :  { %2634 = vrsqrt.f32 %v2374_v57  ;;  %vm2391_vm9 = vweird.f32 %v2374_v57 }
0x109b   :  { %v2635_v10 = vpop.eup %2634 }
0x109c   :  { %v2386_v3 = vmul.f32 %v2635_v10, %v2374_v57  ;;  %vm2392_vm8 = vweird.f32 %v2635_v10 }
0x109d   :  { %vm2393_vm10 = vmor %vm2391_vm9, %vm2392_vm8 }
0x109e   :  { %v2387_v49 = vmul.f32 %v2635_v10, %v2386_v3 }
0x10a0   :  { %v2388_v11 = vmul.f32 0.5, %v2387_v49 }
0x10a2   :  { %v2389_v13 = vsub.f32 1.5, %v2388_v11 }
0x10a4   :  { %v2390_v14 = vmul.f32 %v2635_v10, %v2389_v13 }
0x10a6   :  { %v2394_v23 = vsel %vm2393_vm10, %v2635_v10, %v2390_v14 }
0x10a7   :  { %v2396_v4 = vmul.f32 %v2394_v23, %v2364_v54 }
0x10a9   :  { %v2401_v31 = vmul.f32 %v2520_v1, %v2396_v4 }
0x10ab   :  { %v2406_v16 = vadd.f32 %v2521_v6, %v2401_v31 }
0x10ad   :  { %2408 = vst [vmem:[#allocation18 + $0x8] sm:$0xff] %v2406_v16 }
0x10ae   :  { %2421 = dma.vmem_to_hbm [thread:$0]  %s2414_s13, 256, %s2416_s7, [#allocation5], %s2900_s8, %s2900_s8, %s2901_s25  }
0x10af   :  { %2888 = dma.done.wait [#allocation5], 256  }
0x10b0   :  { %2889 = vsyncadd [#allocation5], 4294967040 }
0x10b1   :  { %2426 = vsyncpa [#allocation4], 1 }
0x10b2   :  { %2427 = vsyncpa [#allocation7], 1 }
0x10b3   :  { %2428 = vsyncpa [#allocation10], 1 }
0x10b4   :  { %2429 = vsyncpa [#allocation13], 1 }
0x10b5   :  { %2430 = vsyncpa [#allocation16], 1 }
0x10b6   :  { %2431 = vsyncpa [#allocation5], 1 }

</bundles_post_ra>
